<compile_context>
chip_gen: v7x
topology: tpu7x:2x2x1
jax: 0.10.0
libtpu: 0.0.40
codegen_flags: <defaults>
</compile_context>

<pallas_src>
import jax
import jax.numpy as jnp
from jax.experimental import pallas as pl
from jax.experimental.pallas import tpu as pltpu


def _round_up(x, m):
    return (x + m - 1) // m * m


# ----------------------------------------------------------------------------
# In-kernel SGRU cell (dropout = 0). Weights are pre-split per input half and
# padded so every gate slice of the (B, 5*DP) output is lane-aligned.
# ----------------------------------------------------------------------------
def _sgru(x, h, gWx, gWh, gb, uWx, uWh, ub):
    D = x.shape[1]
    gates = (jnp.dot(x, gWx, preferred_element_type=jnp.float32)
             + jnp.dot(h, gWh, preferred_element_type=jnp.float32)
             + gb)
    g0 = gates[:, 0 * D:1 * D]
    g1 = gates[:, 1 * D:2 * D]
    g2 = gates[:, 2 * D:3 * D]
    g3 = gates[:, 3 * D:4 * D]
    g4 = gates[:, 4 * D:5 * D]
    rx = jax.nn.sigmoid(g0)
    rh = jax.nn.sigmoid(g1)
    # softmax over the 3 stacked z-gates (elementwise over D)
    zm = jnp.maximum(jnp.maximum(g2, g3), g4)
    e2 = jnp.exp(g2 - zm)
    e3 = jnp.exp(g3 - zm)
    e4 = jnp.exp(g4 - zm)
    inv_den = 1.0 / (e2 + e3 + e4)          # one-time preamble op: keep exact
    u = jnp.tanh(jnp.dot(x * rx, uWx, preferred_element_type=jnp.float32)
                 + jnp.dot(h * rh, uWh, preferred_element_type=jnp.float32)
                 + ub)
    return (e2 * x + e3 * h + e4 * u) * inv_den


# ----------------------------------------------------------------------------
# Kernel: grid = (2, n_vtiles).  Axis 0 = softmax pass (0: logits + stats,
# 1: finalize), axis 1 = vocab tile.  Both axes are sequential ("arbitrary").
# ----------------------------------------------------------------------------
def decoder_output_kernel(enc_ref, summ_ref, memids_ref, memencs_ref, memmask_ref,
                          g1Wx_ref, g1Wh_ref, g1b_ref, u1Wx_ref, u1Wh_ref, u1b_ref,
                          g2Wx_ref, g2Wh_ref, g2b_ref, u2Wx_ref, u2Wh_ref, u2b_ref,
                          outW_ref, biasg_ref, mixW_ref, mixb_ref,
                          probs_ref, memsumm_ref,
                          h2_sc, mix_sc, alphas_sc, m_sc, l_sc, logits_sc):
    p = pl.program_id(0)          # 0 = logits/stats pass, 1 = finalize pass
    j = pl.program_id(1)          # vocab tile index
    TV = outW_ref.shape[1]
    BP, N = memids_ref.shape

    # ---- one-time preamble (SGRUs, memory attention, mixer) ----
    @pl.when(jnp.logical_and(p == 0, j == 0))
    def _():
        enc = enc_ref[...]
        summ = summ_ref[...]
        memencs = memencs_ref[...]          # (BP, N, DP)
        memmask = memmask_ref[...]          # (BP, N)

        h = _sgru(summ, enc, g1Wx_ref[...], g1Wh_ref[...], g1b_ref[...],
                  u1Wx_ref[...], u1Wh_ref[...], u1b_ref[...])

        # memory attention: per-batch matvec as VPU multiply + XLU reduce
        mem_w = jnp.sum(h[:, None, :] * memencs, axis=-1)            # (BP, N)
        mem_w = jnp.where(memmask > 0.0, mem_w, -1e30)               # no log()
        mem_w = mem_w - jnp.max(mem_w, axis=-1, keepdims=True)
        mem_e = jnp.exp(mem_w)
        alphas = mem_e * pl.reciprocal(jnp.sum(mem_e, axis=-1, keepdims=True),
                                       approx=True)                  # (BP, N)
        alphas_sc[...] = alphas

        mem_summ = jnp.sum(alphas[:, :, None] * memencs, axis=1)     # (BP, DP)
        memsumm_ref[...] = mem_summ

        h2 = _sgru(h, mem_summ, g2Wx_ref[...], g2Wh_ref[...], g2b_ref[...],
                   u2Wx_ref[...], u2Wh_ref[...], u2b_ref[...])
        h2_sc[...] = h2

        mix_logits = (jnp.dot(h2, mixW_ref[...], preferred_element_type=jnp.float32)
                      + mixb_ref[...])
        mix_sc[...] = jax.nn.softmax(mix_logits, axis=-1)            # (BP, 2)

        m_sc[...] = jnp.full_like(m_sc, -1e30)
        l_sc[...] = jnp.zeros_like(l_sc)

    # ---- pass 0: bf16 vocab matmul for this tile, cache logits, update stats ----
    @pl.when(p == 0)
    def _():
        h2_bf16 = h2_sc[...].astype(jnp.bfloat16)
        logits = (jnp.dot(h2_bf16, outW_ref[...],
                          preferred_element_type=jnp.float32)
                  + biasg_ref[...])                                  # (BP, TV) f32
        logits_sc[j] = logits                                        # cache for pass 1

        m_prev = m_sc[...]
        m_new = jnp.maximum(m_prev, jnp.max(logits, axis=-1, keepdims=True))
        l_sc[...] = (l_sc[...] * jnp.exp(m_prev - m_new)
                     + jnp.sum(jnp.exp(logits - m_new), axis=-1, keepdims=True))
        m_sc[...] = m_new

    # ---- pass 1: finalize probabilities for this tile (no outW traffic) ----
    @pl.when(p == 1)
    def _():
        logits = logits_sc[j]                                        # cached (BP, TV)
        probs_gen = jnp.exp(logits - m_sc[...]) * pl.reciprocal(l_sc[...],
                                                                approx=True)

        # scatter-add of memory alphas restricted to this vocab tile:
        # loop over the (small) N memory slots with a 2-D lane iota — no
        # (BP, N, TV) temporaries are ever materialized.
        memids = memids_ref[...]                                     # (BP, N) int32
        alphas = alphas_sc[...]                                      # (BP, N)
        col = jax.lax.broadcasted_iota(jnp.int32, (BP, TV), 1) + j * TV
        probs_mem = jnp.zeros((BP, TV), jnp.float32)
        for n in range(N):                                           # N is small/static
            probs_mem = probs_mem + jnp.where(col == memids[:, n:n + 1],
                                              alphas[:, n:n + 1], 0.0)

        mix = mix_sc[...]                                            # (BP, 2)
        probs_ref[...] = mix[:, 0:1] * probs_gen + mix[:, 1:2] * probs_mem


# ----------------------------------------------------------------------------
# Wrapper: pads / splits parameters into lane-aligned slabs and launches the
# vocab-tiled kernel.
# ----------------------------------------------------------------------------
def decoder_output_layer(enc, summ, memids, memencs, memmask, params, *,
                         tile_v=2048, vmem_limit_bytes=48 * 1024 * 1024):
    B, M, Z = memids.shape
    D = enc.shape[1]
    V = params["outW"].shape[1]
    N = M * Z

    BP = _round_up(max(B, 8), 8)                        # sublane tile
    DP = _round_up(D, 128)                              # lane tile
    TV = _round_up(min(tile_v, _round_up(V, 128)), 128) # vocab tile (lane-dense)
    VP = _round_up(V, TV)
    nV = VP // TV
    last = nV - 1

    f32 = jnp.float32

    def pad2(a, r, c, val=0.0):
        a = a.astype(f32)
        return jnp.pad(a, ((0, r - a.shape[0]), (0, c - a.shape[1])),
                       constant_values=val)

    def split_gate_w(gW):
        # (2D, 5D) -> two (DP, 5DP) halves; pad each of the 5 gate column blocks
        def padg(w):
            w = w.reshape(D, 5, D).astype(f32)
            w = jnp.pad(w, ((0, DP - D), (0, 0), (0, DP - D)))
            return w.reshape(DP, 5 * DP)
        return padg(gW[:D]), padg(gW[D:])

    def pad_gate_b(gb):
        b = gb.reshape(1, 5, D).astype(f32)
        b = jnp.pad(b, ((0, 0), (0, 0), (0, DP - D)))
        return b.reshape(1, 5 * DP)

    def split_u_w(uW):
        return pad2(uW[:D], DP, DP), pad2(uW[D:], DP, DP)

    g1Wx, g1Wh = split_gate_w(params["g1W"])
    g2Wx, g2Wh = split_gate_w(params["g2W"])
    g1b = pad_gate_b(params["g1b"])
    g2b = pad_gate_b(params["g2b"])
    u1Wx, u1Wh = split_u_w(params["u1W"])
    u2Wx, u2Wh = split_u_w(params["u2W"])
    u1b = pad2(params["u1b"], 1, DP)
    u2b = pad2(params["u2b"], 1, DP)

    # outW streamed once, in bf16 (f32 accumulation on the MXU).
    outW = pad2(params["outW"], DP, VP).astype(jnp.bfloat16)
    # fold output bias + unk mask + vocab-padding mask into one additive f32 bias
    biasg = params["outb"].astype(f32) + jnp.where(params["unk"] > 0.0, 0.0, -1e30)
    biasg = jnp.pad(biasg, ((0, 0), (0, VP - V)), constant_values=-1e30)

    mixW = pad2(params["mixW"], DP, 2)
    mixb = params["mixb"].astype(f32)

    enc_p = pad2(enc, BP, DP)
    summ_p = pad2(summ, BP, DP)
    memids_p = jnp.pad(memids.reshape(B, N).astype(jnp.int32), ((0, BP - B), (0, 0)))
    memencs_p = jnp.pad(memencs.reshape(B, N, D).astype(f32),
                        ((0, BP - B), (0, 0), (0, DP - D)))
    memmask_p = jnp.pad(memmask.reshape(B, N).astype(f32), ((0, BP - B), (0, 0)))

    def cspec(shape):
        zeros = (0,) * len(shape)
        return pl.BlockSpec(shape, lambda p, j: zeros)   # resident block

    # outW / biasg: advance over vocab tiles in pass 0; park on the last pass-0
    # tile in pass 1 so no further DMAs are issued (logits are read from VMEM).
    outw_map = lambda p, j: (0, j * (1 - p) + p * last)
    # probs: only advance in pass 1 -> pass-0 steps never write back garbage.
    probs_map = lambda p, j: (0, j * p)

    in_specs = [
        cspec((BP, DP)), cspec((BP, DP)),                       # enc, summ
        cspec((BP, N)), cspec((BP, N, DP)), cspec((BP, N)),     # memids, memencs, memmask
        cspec((DP, 5 * DP)), cspec((DP, 5 * DP)), cspec((1, 5 * DP)),   # merger gateW
        cspec((DP, DP)), cspec((DP, DP)), cspec((1, DP)),               # merger gateU
        cspec((DP, 5 * DP)), cspec((DP, 5 * DP)), cspec((1, 5 * DP)),   # merger2 gateW
        cspec((DP, DP)), cspec((DP, DP)), cspec((1, DP)),               # merger2 gateU
        pl.BlockSpec((DP, TV), outw_map),                       # outW (bf16, single pass)
        pl.BlockSpec((1, TV), outw_map),                        # folded gen bias
        cspec((DP, 2)), cspec((1, 2)),                          # mixer
    ]
    out_specs = (
        pl.BlockSpec((BP, TV), probs_map),                      # probs (pass-1 only)
        pl.BlockSpec((BP, DP), lambda p, j: (0, 0)),            # mem_summ (resident)
    )
    scratch_shapes = [
        pltpu.VMEM((BP, DP), f32),        # h2
        pltpu.VMEM((BP, 2), f32),         # mix
        pltpu.VMEM((BP, N), f32),         # mem_alphas
        pltpu.VMEM((BP, 1), f32),         # running max
        pltpu.VMEM((BP, 1), f32),         # running sum-exp
        pltpu.VMEM((nV, BP, TV), f32),    # cached generation logits (whole padded vocab)
    ]

    cost = pl.CostEstimate(
        flops=(2 * BP * DP * VP                              # vocab projection (1 pass)
               + 2 * (4 * BP * DP * 5 * DP + 4 * BP * DP * DP)   # two SGRU cells
               + 4 * BP * N * DP                             # attention + mem_summ
               + 2 * BP * N * VP                             # memory scatter (pass 1)
               + 8 * BP * VP),                               # softmax stats + finalize
        transcendentals=2 * BP * VP + BP * N + 10 * BP * DP,
        bytes_accessed=(2 * DP * VP                          # bf16 outW, single pass
                        + 4 * VP + 4 * BP * VP               # biasg + probs writeback
                        + 4 * BP * N * DP + 8 * BP * N       # memencs, memids, memmask
                        + 4 * (4 * DP * 5 * DP + 4 * DP * DP)  # SGRU weight slabs
                        + 4 * 6 * BP * DP),
    )

    probs_p, memsumm_p = pl.pallas_call(
        decoder_output_kernel,
        out_shape=(jax.ShapeDtypeStruct((BP, VP), f32),
                   jax.ShapeDtypeStruct((BP, DP), f32)),
        grid_spec=pltpu.PrefetchScalarGridSpec(
            num_scalar_prefetch=0,
            grid=(2, nV),
            in_specs=in_specs,
            out_specs=out_specs,
            scratch_shapes=scratch_shapes),
        compiler_params=pltpu.CompilerParams(
            dimension_semantics=("arbitrary", "arbitrary"),
            vmem_limit_bytes=vmem_limit_bytes),
        cost_estimate=cost,
    )(enc_p, summ_p, memids_p, memencs_p, memmask_p,
      g1Wx, g1Wh, g1b, u1Wx, u1Wh, u1b,
      g2Wx, g2Wh, g2b, u2Wx, u2Wh, u2b,
      outW, biasg, mixW, mixb)

    return probs_p[:B, :V], memsumm_p[:B, :D]


# ----------------------------------------------------------------------------
# Pure-JAX reference mirroring the PyTorch module (f32 throughout).
# ----------------------------------------------------------------------------
def _sgru_ref(x, h, gW, gb, uW, ub):
    D = x.shape[1]
    gates = x @ gW[:D] + h @ gW[D:] + gb
    g0, g1, g2, g3, g4 = [gates[:, k * D:(k + 1) * D] for k in range(5)]
    rx = jax.nn.sigmoid(g0)
    rh = jax.nn.sigmoid(g1)
    z = jax.nn.softmax(jnp.stack([g2, g3, g4], axis=-1), axis=-1)
    u = jnp.tanh((x * rx) @ uW[:D] + (h * rh) @ uW[D:] + ub)
    return z[..., 0] * x + z[..., 1] * h + z[..., 2] * u


def decoder_output_layer_ref(enc, summ, memids, memencs, memmask, params):
    B, M, Z = memids.shape
    V = params["outb"].shape[-1]
    h = _sgru_ref(summ, enc, params["g1W"], params["g1b"], params["u1W"], params["u1b"])
    mem_w = jnp.einsum('bd,bmzd->bmz', h, memencs) + jnp.log(memmask.astype(jnp.float32))
    mem_w = mem_w.reshape(B, M * Z)
    mem_a = jax.nn.softmax(mem_w, axis=-1)
    mem_summ = (mem_a[:, :, None] * memencs.reshape(B, M * Z, -1)).sum(1)
    onehot = jax.nn.one_hot(memids.reshape(B, M * Z), V, dtype=jnp.float32)
    probs_mem = (mem_a[:, :, None] * onehot).sum(1)
    h2 = _sgru_ref(h, mem_summ, params["g2W"], params["g2b"], params["u2W"], params["u2b"])
    logits_gen = h2 @ params["outW"] + params["outb"] + jnp.log(params["unk"])
    probs_gen = jax.nn.softmax(logits_gen, -1)
    mix = jax.nn.softmax(h2 @ params["mixW"] + params["mixb"], -1)
    probs = mix[:, 0:1] * probs_gen + mix[:, 1:2] * probs_mem
    return probs, mem_summ


def make_params(key, dim, vocsize, unktoks):
    ks = jax.random.split(key, 12)
    s = 0.1
    params = {
        "g1W": jax.random.normal(ks[0], (2 * dim, 5 * dim), jnp.float32) * s,
        "g1b": jax.random.normal(ks[1], (1, 5 * dim), jnp.float32) * s,
        "u1W": jax.random.normal(ks[2], (2 * dim, dim), jnp.float32) * s,
        "u1b": jax.random.normal(ks[3], (1, dim), jnp.float32) * s,
        "g2W": jax.random.normal(ks[4], (2 * dim, 5 * dim), jnp.float32) * s,
        "g2b": jax.random.normal(ks[5], (1, 5 * dim), jnp.float32) * s,
        "u2W": jax.random.normal(ks[6], (2 * dim, dim), jnp.float32) * s,
        "u2b": jax.random.normal(ks[7], (1, dim), jnp.float32) * s,
        "outW": jax.random.normal(ks[8], (dim, vocsize), jnp.float32) * s,
        "outb": jax.random.normal(ks[9], (1, vocsize), jnp.float32) * s,
        "mixW": jax.random.normal(ks[10], (dim, 2), jnp.float32) * s,
        "mixb": jax.random.normal(ks[11], (1, 2), jnp.float32) * s,
    }
    unk = jnp.ones((vocsize,), jnp.float32)
    for t in unktoks:
        unk = unk.at[t].set(0.0)
    params["unk"] = unk.reshape(1, vocsize)
    return params


if __name__ == "__main__":
    B, D, M, Z, V = 2, 32, 4, 8, 32
    unktoks = {0, 3}

    key = jax.random.PRNGKey(0)
    kp, ke, ks, ki, km = jax.random.split(key, 5)

    params = make_params(kp, D, V, unktoks)

    enc = jax.random.normal(ke, (B, D), jnp.float32)
    summ = jax.random.normal(ks, (B, D), jnp.float32)
    memids = jax.random.randint(ki, (B, M, Z), 0, V, jnp.int32)
    memencs = jax.random.normal(km, (B, M, Z, D), jnp.float32)
    # mark the last 2 positions of every memory sequence as padding
    pos = jnp.arange(Z)[None, None, :]
    memmask = jnp.where(pos < Z - 2, 1.0, 0.0) * jnp.ones((B, M, Z), jnp.float32)

    probs, mem_summ = decoder_output_layer(enc, summ, memids, memencs, memmask, params)
    jax.block_until_ready((probs, mem_summ))

    probs_ref, mem_summ_ref = decoder_output_layer_ref(enc, summ, memids, memencs,
                                                       memmask, params)
    assert probs.shape == (B, V) and mem_summ.shape == (B, D)
    # bf16 vocab-projection stream + approx EUP reciprocals -> loosened tolerances
    assert jnp.allclose(probs, probs_ref, atol=5e-3, rtol=5e-2)
    assert jnp.allclose(mem_summ, mem_summ_ref, atol=1e-2, rtol=5e-2)
    # mixture of two distributions still sums to 1
    assert jnp.allclose(probs.sum(-1), 1.0, atol=1e-2)
    # unk tokens cannot be generated; they only appear via memory copying
    assert jnp.all(probs >= 0.0)

    print("KERNEL_OK")
</pallas_src>

<mosaic_0001>
module attributes {stable_mosaic.version = 11 : i64} {
  func.func @decoder_output_kernel(%arg0: i32, %arg1: i32, %arg2: memref<8x128xf32, #tpu.memory_space<vmem>>, %arg3: memref<8x128xf32, #tpu.memory_space<vmem>>, %arg4: memref<8x32xi32, #tpu.memory_space<vmem>>, %arg5: memref<8x32x128xf32, #tpu.memory_space<vmem>>, %arg6: memref<8x32xf32, #tpu.memory_space<vmem>>, %arg7: memref<128x640xf32, #tpu.memory_space<vmem>>, %arg8: memref<128x640xf32, #tpu.memory_space<vmem>>, %arg9: memref<1x640xf32, #tpu.memory_space<vmem>>, %arg10: memref<128x128xf32, #tpu.memory_space<vmem>>, %arg11: memref<128x128xf32, #tpu.memory_space<vmem>>, %arg12: memref<1x128xf32, #tpu.memory_space<vmem>>, %arg13: memref<128x640xf32, #tpu.memory_space<vmem>>, %arg14: memref<128x640xf32, #tpu.memory_space<vmem>>, %arg15: memref<1x640xf32, #tpu.memory_space<vmem>>, %arg16: memref<128x128xf32, #tpu.memory_space<vmem>>, %arg17: memref<128x128xf32, #tpu.memory_space<vmem>>, %arg18: memref<1x128xf32, #tpu.memory_space<vmem>>, %arg19: memref<128x128xbf16, #tpu.memory_space<vmem>>, %arg20: memref<1x128xf32, #tpu.memory_space<vmem>>, %arg21: memref<128x2xf32, #tpu.memory_space<vmem>>, %arg22: memref<1x2xf32, #tpu.memory_space<vmem>>, %arg23: memref<8x128xf32, #tpu.memory_space<vmem>>, %arg24: memref<8x128xf32, #tpu.memory_space<vmem>>, %arg25: memref<8x128xf32, #tpu.memory_space<vmem>>, %arg26: memref<8x2xf32, #tpu.memory_space<vmem>>, %arg27: memref<8x32xf32, #tpu.memory_space<vmem>>, %arg28: memref<8x1xf32, #tpu.memory_space<vmem>>, %arg29: memref<8x1xf32, #tpu.memory_space<vmem>>, %arg30: memref<1x8x128xf32, #tpu.memory_space<vmem>>) attributes {dimension_semantics = [#tpu.dimension_semantics<arbitrary>, #tpu.dimension_semantics<arbitrary>], iteration_bounds = array<i64: 2, 1>, scalar_prefetch = 0 : i64, scratch_operands = 6 : i64, tpu.core_type = #tpu.core_type<tc>, window_params = [{pipeline_mode = #tpu.pipeline_mode<synchronous>, transform_indices = @transform_0, window_bounds = array<i64: 8, 128>}, {pipeline_mode = #tpu.pipeline_mode<synchronous>, transform_indices = @transform_1, window_bounds = array<i64: 8, 128>}, {pipeline_mode = #tpu.pipeline_mode<synchronous>, transform_indices = @transform_2, window_bounds = array<i64: 8, 32>}, {pipeline_mode = #tpu.pipeline_mode<synchronous>, transform_indices = @transform_3, window_bounds = array<i64: 8, 32, 128>}, {pipeline_mode = #tpu.pipeline_mode<synchronous>, transform_indices = @transform_4, window_bounds = array<i64: 8, 32>}, {pipeline_mode = #tpu.pipeline_mode<synchronous>, transform_indices = @transform_5, window_bounds = array<i64: 128, 640>}, {pipeline_mode = #tpu.pipeline_mode<synchronous>, transform_indices = @transform_6, window_bounds = array<i64: 128, 640>}, {pipeline_mode = #tpu.pipeline_mode<synchronous>, transform_indices = @transform_7, window_bounds = array<i64: 1, 640>}, {pipeline_mode = #tpu.pipeline_mode<synchronous>, transform_indices = @transform_8, window_bounds = array<i64: 128, 128>}, {pipeline_mode = #tpu.pipeline_mode<synchronous>, transform_indices = @transform_9, window_bounds = array<i64: 128, 128>}, {pipeline_mode = #tpu.pipeline_mode<synchronous>, transform_indices = @transform_10, window_bounds = array<i64: 1, 128>}, {pipeline_mode = #tpu.pipeline_mode<synchronous>, transform_indices = @transform_11, window_bounds = array<i64: 128, 640>}, {pipeline_mode = #tpu.pipeline_mode<synchronous>, transform_indices = @transform_12, window_bounds = array<i64: 128, 640>}, {pipeline_mode = #tpu.pipeline_mode<synchronous>, transform_indices = @transform_13, window_bounds = array<i64: 1, 640>}, {pipeline_mode = #tpu.pipeline_mode<synchronous>, transform_indices = @transform_14, window_bounds = array<i64: 128, 128>}, {pipeline_mode = #tpu.pipeline_mode<synchronous>, transform_indices = @transform_15, window_bounds = array<i64: 128, 128>}, {pipeline_mode = #tpu.pipeline_mode<synchronous>, transform_indices = @transform_16, window_bounds = array<i64: 1, 128>}, {transform_indices = @transform_17, window_bounds = array<i64: 128, 128>}, {transform_indices = @transform_18, window_bounds = array<i64: 1, 128>}, {pipeline_mode = #tpu.pipeline_mode<synchronous>, transform_indices = @transform_19, window_bounds = array<i64: 128, 2>}, {pipeline_mode = #tpu.pipeline_mode<synchronous>, transform_indices = @transform_20, window_bounds = array<i64: 1, 2>}, {transform_indices = @transform_21, window_bounds = array<i64: 8, 128>}, {pipeline_mode = #tpu.pipeline_mode<synchronous>, transform_indices = @transform_22, window_bounds = array<i64: 8, 128>}]} {
    %c0_i32 = arith.constant 0 : i32
    %0 = arith.cmpi eq, %arg0, %c0_i32 : i32
    %c0_i32_0 = arith.constant 0 : i32
    %1 = arith.cmpi eq, %arg1, %c0_i32_0 : i32
    %2 = arith.andi %0, %1 : i1
    %3 = arith.extui %2 : i1 to i32
    %c0_i32_1 = arith.constant 0 : i32
    %4 = arith.cmpi ne, %3, %c0_i32_1 : i32
    scf.if %4 {
      %c0 = arith.constant 0 : index
      %c0_5 = arith.constant 0 : index
      %11 = vector.load %arg2[%c0, %c0_5] : memref<8x128xf32, #tpu.memory_space<vmem>>, vector<8x128xf32>
      %c0_6 = arith.constant 0 : index
      %c0_7 = arith.constant 0 : index
      %12 = vector.load %arg3[%c0_6, %c0_7] : memref<8x128xf32, #tpu.memory_space<vmem>>, vector<8x128xf32>
      %c0_8 = arith.constant 0 : index
      %c0_9 = arith.constant 0 : index
      %c0_10 = arith.constant 0 : index
      %13 = vector.load %arg5[%c0_8, %c0_9, %c0_10] : memref<8x32x128xf32, #tpu.memory_space<vmem>>, vector<8x32x128xf32>
      %c0_11 = arith.constant 0 : index
      %c0_12 = arith.constant 0 : index
      %14 = vector.load %arg6[%c0_11, %c0_12] : memref<8x32xf32, #tpu.memory_space<vmem>>, vector<8x32xf32>
      %c0_13 = arith.constant 0 : index
      %c0_14 = arith.constant 0 : index
      %15 = vector.load %arg7[%c0_13, %c0_14] : memref<128x640xf32, #tpu.memory_space<vmem>>, vector<128x640xf32>
      %c0_15 = arith.constant 0 : index
      %c0_16 = arith.constant 0 : index
      %16 = vector.load %arg8[%c0_15, %c0_16] : memref<128x640xf32, #tpu.memory_space<vmem>>, vector<128x640xf32>
      %c0_17 = arith.constant 0 : index
      %c0_18 = arith.constant 0 : index
      %17 = vector.load %arg9[%c0_17, %c0_18] : memref<1x640xf32, #tpu.memory_space<vmem>>, vector<1x640xf32>
      %c0_19 = arith.constant 0 : index
      %c0_20 = arith.constant 0 : index
      %18 = vector.load %arg10[%c0_19, %c0_20] : memref<128x128xf32, #tpu.memory_space<vmem>>, vector<128x128xf32>
      %c0_21 = arith.constant 0 : index
      %c0_22 = arith.constant 0 : index
      %19 = vector.load %arg11[%c0_21, %c0_22] : memref<128x128xf32, #tpu.memory_space<vmem>>, vector<128x128xf32>
      %c0_23 = arith.constant 0 : index
      %c0_24 = arith.constant 0 : index
      %20 = vector.load %arg12[%c0_23, %c0_24] : memref<1x128xf32, #tpu.memory_space<vmem>>, vector<1x128xf32>
      %cst = arith.constant dense<0.000000e+00> : vector<8x640xf32>
      %21 = tpu.matmul %12, %15, %cst {dimension_numbers = #tpu.dot_dimension_numbers<[1], [0], [0], [1], [0, 0, 1, 1], [], []>} : vector<8x128xf32>, vector<128x640xf32>, vector<8x640xf32> -> vector<8x640xf32>
      %cst_25 = arith.constant dense<0.000000e+00> : vector<8x640xf32>
      %22 = tpu.matmul %11, %16, %cst_25 {dimension_numbers = #tpu.dot_dimension_numbers<[1], [0], [0], [1], [0, 0, 1, 1], [], []>} : vector<8x128xf32>, vector<128x640xf32>, vector<8x640xf32> -> vector<8x640xf32>
      %23 = arith.addf %21, %22 : vector<8x640xf32>
      %24 = vector.broadcast %17 : vector<1x640xf32> to vector<8x640xf32>
      %25 = arith.addf %23, %24 : vector<8x640xf32>
      %26 = vector.extract_strided_slice %25 {offsets = [0, 0], sizes = [8, 128], strides = [1, 1]} : vector<8x640xf32> to vector<8x128xf32>
      %27 = vector.extract_strided_slice %25 {offsets = [0, 128], sizes = [8, 128], strides = [1, 1]} : vector<8x640xf32> to vector<8x128xf32>
      %28 = vector.extract_strided_slice %25 {offsets = [0, 256], sizes = [8, 128], strides = [1, 1]} : vector<8x640xf32> to vector<8x128xf32>
      %29 = vector.extract_strided_slice %25 {offsets = [0, 384], sizes = [8, 128], strides = [1, 1]} : vector<8x640xf32> to vector<8x128xf32>
      %30 = vector.extract_strided_slice %25 {offsets = [0, 512], sizes = [8, 128], strides = [1, 1]} : vector<8x640xf32> to vector<8x128xf32>
      %31 = arith.negf %26 : vector<8x128xf32>
      %32 = math.exp %31 : vector<8x128xf32>
      %cst_26 = arith.constant 1.000000e+00 : f32
      %33 = vector.broadcast %cst_26 : f32 to vector<8x128xf32>
      %34 = arith.addf %33, %32 : vector<8x128xf32>
      %35 = arith.divf %33, %34 : vector<8x128xf32>
      %36 = arith.negf %27 : vector<8x128xf32>
      %37 = math.exp %36 : vector<8x128xf32>
      %cst_27 = arith.constant 1.000000e+00 : f32
      %38 = vector.broadcast %cst_27 : f32 to vector<8x128xf32>
      %39 = arith.addf %38, %37 : vector<8x128xf32>
      %40 = arith.divf %38, %39 : vector<8x128xf32>
      %41 = arith.maximumf %28, %29 : vector<8x128xf32>
      %42 = arith.maximumf %41, %30 : vector<8x128xf32>
      %43 = arith.subf %28, %42 : vector<8x128xf32>
      %44 = math.exp %43 : vector<8x128xf32>
      %45 = arith.subf %29, %42 : vector<8x128xf32>
      %46 = math.exp %45 : vector<8x128xf32>
      %47 = arith.subf %30, %42 : vector<8x128xf32>
      %48 = math.exp %47 : vector<8x128xf32>
      %49 = arith.addf %44, %46 : vector<8x128xf32>
      %50 = arith.addf %49, %48 : vector<8x128xf32>
      %cst_28 = arith.constant 1.000000e+00 : f32
      %51 = vector.broadcast %cst_28 : f32 to vector<8x128xf32>
      %52 = arith.divf %51, %50 : vector<8x128xf32>
      %53 = arith.mulf %12, %35 : vector<8x128xf32>
      %cst_29 = arith.constant dense<0.000000e+00> : vector<8x128xf32>
      %54 = tpu.matmul %53, %18, %cst_29 {dimension_numbers = #tpu.dot_dimension_numbers<[1], [0], [0], [1], [0, 0, 1, 1], [], []>} : vector<8x128xf32>, vector<128x128xf32>, vector<8x128xf32> -> vector<8x128xf32>
      %55 = arith.mulf %11, %40 : vector<8x128xf32>
      %cst_30 = arith.constant dense<0.000000e+00> : vector<8x128xf32>
      %56 = tpu.matmul %55, %19, %cst_30 {dimension_numbers = #tpu.dot_dimension_numbers<[1], [0], [0], [1], [0, 0, 1, 1], [], []>} : vector<8x128xf32>, vector<128x128xf32>, vector<8x128xf32> -> vector<8x128xf32>
      %57 = arith.addf %54, %56 : vector<8x128xf32>
      %58 = vector.broadcast %20 : vector<1x128xf32> to vector<8x128xf32>
      %59 = arith.addf %57, %58 : vector<8x128xf32>
      %60 = math.tanh %59 : vector<8x128xf32>
      %61 = arith.mulf %44, %12 : vector<8x128xf32>
      %62 = arith.mulf %46, %11 : vector<8x128xf32>
      %63 = arith.addf %61, %62 : vector<8x128xf32>
      %64 = arith.mulf %48, %60 : vector<8x128xf32>
      %65 = arith.addf %63, %64 : vector<8x128xf32>
      %66 = arith.mulf %65, %52 : vector<8x128xf32>
      %67 = vector.shape_cast %66 : vector<8x128xf32> to vector<8x1x128xf32>
      %68 = vector.broadcast %67 : vector<8x1x128xf32> to vector<8x32x128xf32>
      %69 = arith.mulf %68, %13 : vector<8x32x128xf32>
      %cst_31 = arith.constant dense<0.000000e+00> : vector<8x32xf32>
      %70 = vector.multi_reduction <add>, %69, %cst_31 [2] : vector<8x32x128xf32> to vector<8x32xf32>
      %cst_32 = arith.constant 0.000000e+00 : f32
      %71 = vector.broadcast %cst_32 : f32 to vector<8x32xf32>
      %72 = arith.cmpf ogt, %14, %71 : vector<8x32xf32>
      %cst_33 = arith.constant -1.000000e+30 : f32
      %73 = vector.broadcast %cst_33 : f32 to vector<8x32xf32>
      %74 = arith.select %72, %70, %73 : vector<8x32xi1>, vector<8x32xf32>
      %cst_34 = arith.constant dense<0xFF800000> : vector<8xf32>
      %75 = vector.multi_reduction <maximumf>, %74, %cst_34 [1] : vector<8x32xf32> to vector<8xf32>
      %76 = vector.shape_cast %75 : vector<8xf32> to vector<8x1xf32>
      %77 = vector.broadcast %76 : vector<8x1xf32> to vector<8x32xf32>
      %78 = arith.subf %74, %77 : vector<8x32xf32>
      %79 = math.exp %78 : vector<8x32xf32>
      %cst_35 = arith.constant dense<0.000000e+00> : vector<8xf32>
      %80 = vector.multi_reduction <add>, %79, %cst_35 [1] : vector<8x32xf32> to vector<8xf32>
      %81 = vector.shape_cast %80 : vector<8xf32> to vector<8x1xf32>
      %82 = tpu.reciprocal %81 {approx = true} : vector<8x1xf32> -> vector<8x1xf32>
      %83 = vector.broadcast %82 : vector<8x1xf32> to vector<8x32xf32>
      %84 = arith.mulf %79, %83 : vector<8x32xf32>
      %c0_36 = arith.constant 0 : index
      %c0_37 = arith.constant 0 : index
      %85 = vector.load %arg27[%c0_36, %c0_37] : memref<8x32xf32, #tpu.memory_space<vmem>>, vector<8x32xf32>
      tpu.vector_store %arg27[%c0_36, %c0_37], %84 {strides = array<i32>} : memref<8x32xf32, #tpu.memory_space<vmem>>, vector<8x32xf32>,
      %86 = vector.shape_cast %84 : vector<8x32xf32> to vector<8x32x1xf32>
      %87 = vector.broadcast %86 : vector<8x32x1xf32> to vector<8x32x128xf32>
      %88 = arith.mulf %87, %13 : vector<8x32x128xf32>
      %cst_38 = arith.constant dense<0.000000e+00> : vector<8x128xf32>
      %89 = vector.multi_reduction <add>, %88, %cst_38 [1] : vector<8x32x128xf32> to vector<8x128xf32>
      %c0_39 = arith.constant 0 : index
      %c0_40 = arith.constant 0 : index
      %90 = vector.load %arg24[%c0_39, %c0_40] : memref<8x128xf32, #tpu.memory_space<vmem>>, vector<8x128xf32>
      tpu.vector_store %arg24[%c0_39, %c0_40], %89 {strides = array<i32>} : memref<8x128xf32, #tpu.memory_space<vmem>>, vector<8x128xf32>,
      %c0_41 = arith.constant 0 : index
      %c0_42 = arith.constant 0 : index
      %91 = vector.load %arg13[%c0_41, %c0_42] : memref<128x640xf32, #tpu.memory_space<vmem>>, vector<128x640xf32>
      %c0_43 = arith.constant 0 : index
      %c0_44 = arith.constant 0 : index
      %92 = vector.load %arg14[%c0_43, %c0_44] : memref<128x640xf32, #tpu.memory_space<vmem>>, vector<128x640xf32>
      %c0_45 = arith.constant 0 : index
      %c0_46 = arith.constant 0 : index
      %93 = vector.load %arg15[%c0_45, %c0_46] : memref<1x640xf32, #tpu.memory_space<vmem>>, vector<1x640xf32>
      %c0_47 = arith.constant 0 : index
      %c0_48 = arith.constant 0 : index
      %94 = vector.load %arg16[%c0_47, %c0_48] : memref<128x128xf32, #tpu.memory_space<vmem>>, vector<128x128xf32>
      %c0_49 = arith.constant 0 : index
      %c0_50 = arith.constant 0 : index
      %95 = vector.load %arg17[%c0_49, %c0_50] : memref<128x128xf32, #tpu.memory_space<vmem>>, vector<128x128xf32>
      %c0_51 = arith.constant 0 : index
      %c0_52 = arith.constant 0 : index
      %96 = vector.load %arg18[%c0_51, %c0_52] : memref<1x128xf32, #tpu.memory_space<vmem>>, vector<1x128xf32>
      %cst_53 = arith.constant dense<0.000000e+00> : vector<8x640xf32>
      %97 = tpu.matmul %66, %91, %cst_53 {dimension_numbers = #tpu.dot_dimension_numbers<[1], [0], [0], [1], [0, 0, 1, 1], [], []>} : vector<8x128xf32>, vector<128x640xf32>, vector<8x640xf32> -> vector<8x640xf32>
      %cst_54 = arith.constant dense<0.000000e+00> : vector<8x640xf32>
      %98 = tpu.matmul %89, %92, %cst_54 {dimension_numbers = #tpu.dot_dimension_numbers<[1], [0], [0], [1], [0, 0, 1, 1], [], []>} : vector<8x128xf32>, vector<128x640xf32>, vector<8x640xf32> -> vector<8x640xf32>
      %99 = arith.addf %97, %98 : vector<8x640xf32>
      %100 = vector.broadcast %93 : vector<1x640xf32> to vector<8x640xf32>
      %101 = arith.addf %99, %100 : vector<8x640xf32>
      %102 = vector.extract_strided_slice %101 {offsets = [0, 0], sizes = [8, 128], strides = [1, 1]} : vector<8x640xf32> to vector<8x128xf32>
      %103 = vector.extract_strided_slice %101 {offsets = [0, 128], sizes = [8, 128], strides = [1, 1]} : vector<8x640xf32> to vector<8x128xf32>
      %104 = vector.extract_strided_slice %101 {offsets = [0, 256], sizes = [8, 128], strides = [1, 1]} : vector<8x640xf32> to vector<8x128xf32>
      %105 = vector.extract_strided_slice %101 {offsets = [0, 384], sizes = [8, 128], strides = [1, 1]} : vector<8x640xf32> to vector<8x128xf32>
      %106 = vector.extract_strided_slice %101 {offsets = [0, 512], sizes = [8, 128], strides = [1, 1]} : vector<8x640xf32> to vector<8x128xf32>
      %107 = arith.negf %102 : vector<8x128xf32>
      %108 = math.exp %107 : vector<8x128xf32>
      %cst_55 = arith.constant 1.000000e+00 : f32
      %109 = vector.broadcast %cst_55 : f32 to vector<8x128xf32>
      %110 = arith.addf %109, %108 : vector<8x128xf32>
      %111 = arith.divf %109, %110 : vector<8x128xf32>
      %112 = arith.negf %103 : vector<8x128xf32>
      %113 = math.exp %112 : vector<8x128xf32>
      %cst_56 = arith.constant 1.000000e+00 : f32
      %114 = vector.broadcast %cst_56 : f32 to vector<8x128xf32>
      %115 = arith.addf %114, %113 : vector<8x128xf32>
      %116 = arith.divf %114, %115 : vector<8x128xf32>
      %117 = arith.maximumf %104, %105 : vector<8x128xf32>
      %118 = arith.maximumf %117, %106 : vector<8x128xf32>
      %119 = arith.subf %104, %118 : vector<8x128xf32>
      %120 = math.exp %119 : vector<8x128xf32>
      %121 = arith.subf %105, %118 : vector<8x128xf32>
      %122 = math.exp %121 : vector<8x128xf32>
      %123 = arith.subf %106, %118 : vector<8x128xf32>
      %124 = math.exp %123 : vector<8x128xf32>
      %125 = arith.addf %120, %122 : vector<8x128xf32>
      %126 = arith.addf %125, %124 : vector<8x128xf32>
      %cst_57 = arith.constant 1.000000e+00 : f32
      %127 = vector.broadcast %cst_57 : f32 to vector<8x128xf32>
      %128 = arith.divf %127, %126 : vector<8x128xf32>
      %129 = arith.mulf %66, %111 : vector<8x128xf32>
      %cst_58 = arith.constant dense<0.000000e+00> : vector<8x128xf32>
      %130 = tpu.matmul %129, %94, %cst_58 {dimension_numbers = #tpu.dot_dimension_numbers<[1], [0], [0], [1], [0, 0, 1, 1], [], []>} : vector<8x128xf32>, vector<128x128xf32>, vector<8x128xf32> -> vector<8x128xf32>
      %131 = arith.mulf %89, %116 : vector<8x128xf32>
      %cst_59 = arith.constant dense<0.000000e+00> : vector<8x128xf32>
      %132 = tpu.matmul %131, %95, %cst_59 {dimension_numbers = #tpu.dot_dimension_numbers<[1], [0], [0], [1], [0, 0, 1, 1], [], []>} : vector<8x128xf32>, vector<128x128xf32>, vector<8x128xf32> -> vector<8x128xf32>
      %133 = arith.addf %130, %132 : vector<8x128xf32>
      %134 = vector.broadcast %96 : vector<1x128xf32> to vector<8x128xf32>
      %135 = arith.addf %133, %134 : vector<8x128xf32>
      %136 = math.tanh %135 : vector<8x128xf32>
      %137 = arith.mulf %120, %66 : vector<8x128xf32>
      %138 = arith.mulf %122, %89 : vector<8x128xf32>
      %139 = arith.addf %137, %138 : vector<8x128xf32>
      %140 = arith.mulf %124, %136 : vector<8x128xf32>
      %141 = arith.addf %139, %140 : vector<8x128xf32>
      %142 = arith.mulf %141, %128 : vector<8x128xf32>
      %c0_60 = arith.constant 0 : index
      %c0_61 = arith.constant 0 : index
      %143 = vector.load %arg25[%c0_60, %c0_61] : memref<8x128xf32, #tpu.memory_space<vmem>>, vector<8x128xf32>
      tpu.vector_store %arg25[%c0_60, %c0_61], %142 {strides = array<i32>} : memref<8x128xf32, #tpu.memory_space<vmem>>, vector<8x128xf32>,
      %c0_62 = arith.constant 0 : index
      %c0_63 = arith.constant 0 : index
      %144 = vector.load %arg21[%c0_62, %c0_63] : memref<128x2xf32, #tpu.memory_space<vmem>>, vector<128x2xf32>
      %cst_64 = arith.constant dense<0.000000e+00> : vector<8x2xf32>
      %145 = tpu.matmul %142, %144, %cst_64 {dimension_numbers = #tpu.dot_dimension_numbers<[1], [0], [0], [1], [0, 0, 1, 1], [], []>} : vector<8x128xf32>, vector<128x2xf32>, vector<8x2xf32> -> vector<8x2xf32>
      %c0_65 = arith.constant 0 : index
      %c0_66 = arith.constant 0 : index
      %146 = vector.load %arg22[%c0_65, %c0_66] : memref<1x2xf32, #tpu.memory_space<vmem>>, vector<1x2xf32>
      %147 = vector.broadcast %146 : vector<1x2xf32> to vector<8x2xf32>
      %148 = arith.addf %145, %147 : vector<8x2xf32>
      %cst_67 = arith.constant dense<0xFF800000> : vector<8xf32>
      %149 = vector.multi_reduction <maximumf>, %148, %cst_67 [1] : vector<8x2xf32> to vector<8xf32>
      %cst_68 = arith.constant 0xFF800000 : f32
      %150 = vector.broadcast %cst_68 : f32 to vector<8xf32>
      %151 = arith.maximumf %150, %149 : vector<8xf32>
      %152 = vector.shape_cast %151 : vector<8xf32> to vector<8x1xf32>
      %153 = vector.broadcast %152 : vector<8x1xf32> to vector<8x2xf32>
      %154 = arith.subf %148, %153 : vector<8x2xf32>
      %155 = math.exp %154 : vector<8x2xf32>
      %cst_69 = arith.constant dense<0.000000e+00> : vector<8xf32>
      %156 = vector.multi_reduction <add>, %155, %cst_69 [1] : vector<8x2xf32> to vector<8xf32>
      %157 = vector.shape_cast %156 : vector<8xf32> to vector<8x1xf32>
      %158 = vector.broadcast %157 : vector<8x1xf32> to vector<8x2xf32>
      %159 = arith.divf %155, %158 : vector<8x2xf32>
      %c0_70 = arith.constant 0 : index
      %c0_71 = arith.constant 0 : index
      %160 = vector.load %arg26[%c0_70, %c0_71] : memref<8x2xf32, #tpu.memory_space<vmem>>, vector<8x2xf32>
      tpu.vector_store %arg26[%c0_70, %c0_71], %159 {strides = array<i32>} : memref<8x2xf32, #tpu.memory_space<vmem>>, vector<8x2xf32>,
      %cst_72 = arith.constant -1.000000e+30 : f32
      %161 = vector.broadcast %cst_72 : f32 to vector<8x1xf32>
      %c0_73 = arith.constant 0 : index
      %c0_74 = arith.constant 0 : index
      %162 = vector.load %arg28[%c0_73, %c0_74] : memref<8x1xf32, #tpu.memory_space<vmem>>, vector<8x1xf32>
      tpu.vector_store %arg28[%c0_73, %c0_74], %161 {strides = array<i32>} : memref<8x1xf32, #tpu.memory_space<vmem>>, vector<8x1xf32>,
      %cst_75 = arith.constant 0.000000e+00 : f32
      %163 = vector.broadcast %cst_75 : f32 to vector<8x1xf32>
      %c0_76 = arith.constant 0 : index
      %c0_77 = arith.constant 0 : index
      %164 = vector.load %arg29[%c0_76, %c0_77] : memref<8x1xf32, #tpu.memory_space<vmem>>, vector<8x1xf32>
      tpu.vector_store %arg29[%c0_76, %c0_77], %163 {strides = array<i32>} : memref<8x1xf32, #tpu.memory_space<vmem>>, vector<8x1xf32>,
    } else {
    }
    %c0_i32_2 = arith.constant 0 : i32
    %5 = arith.cmpi eq, %arg0, %c0_i32_2 : i32
    %6 = arith.extui %5 : i1 to i32
    %c0_i32_3 = arith.constant 0 : i32
    %7 = arith.cmpi ne, %6, %c0_i32_3 : i32
    scf.if %7 {
      %c0 = arith.constant 0 : index
      %c0_5 = arith.constant 0 : index
      %11 = vector.load %arg25[%c0, %c0_5] : memref<8x128xf32, #tpu.memory_space<vmem>>, vector<8x128xf32>
      %12 = arith.truncf %11 : vector<8x128xf32> to vector<8x128xbf16>
      %c0_6 = arith.constant 0 : index
      %c0_7 = arith.constant 0 : index
      %13 = vector.load %arg19[%c0_6, %c0_7] : memref<128x128xbf16, #tpu.memory_space<vmem>>, vector<128x128xbf16>
      %cst = arith.constant dense<0.000000e+00> : vector<8x128xf32>
      %14 = tpu.matmul %12, %13, %cst {dimension_numbers = #tpu.dot_dimension_numbers<[1], [0], [0], [1], [0, 0, 1, 1], [], []>} : vector<8x128xbf16>, vector<128x128xbf16>, vector<8x128xf32> -> vector<8x128xf32>
      %c0_8 = arith.constant 0 : index
      %c0_9 = arith.constant 0 : index
      %15 = vector.load %arg20[%c0_8, %c0_9] : memref<1x128xf32, #tpu.memory_space<vmem>>, vector<1x128xf32>
      %16 = vector.broadcast %15 : vector<1x128xf32> to vector<8x128xf32>
      %17 = arith.addf %14, %16 : vector<8x128xf32>
      %18 = arith.index_cast %arg1 : i32 to index
      %c0_10 = arith.constant 0 : index
      %c0_11 = arith.constant 0 : index
      %19 = vector.load %arg30[%18, %c0_10, %c0_11] : memref<1x8x128xf32, #tpu.memory_space<vmem>>, vector<1x8x128xf32>
      %20 = vector.shape_cast %19 : vector<1x8x128xf32> to vector<8x128xf32>
      %21 = vector.shape_cast %17 : vector<8x128xf32> to vector<1x8x128xf32>
      tpu.vector_store %arg30[%18, %c0_10, %c0_11], %21 {strides = array<i32>} : memref<1x8x128xf32, #tpu.memory_space<vmem>>, vector<1x8x128xf32>,
      %c0_12 = arith.constant 0 : index
      %c0_13 = arith.constant 0 : index
      %22 = vector.load %arg28[%c0_12, %c0_13] : memref<8x1xf32, #tpu.memory_space<vmem>>, vector<8x1xf32>
      %cst_14 = arith.constant dense<0xFF800000> : vector<8xf32>
      %23 = vector.multi_reduction <maximumf>, %17, %cst_14 [1] : vector<8x128xf32> to vector<8xf32>
      %24 = vector.shape_cast %23 : vector<8xf32> to vector<8x1xf32>
      %25 = arith.maximumf %22, %24 : vector<8x1xf32>
      %c0_15 = arith.constant 0 : index
      %c0_16 = arith.constant 0 : index
      %26 = vector.load %arg29[%c0_15, %c0_16] : memref<8x1xf32, #tpu.memory_space<vmem>>, vector<8x1xf32>
      %27 = arith.subf %22, %25 : vector<8x1xf32>
      %28 = math.exp %27 : vector<8x1xf32>
      %29 = arith.mulf %26, %28 : vector<8x1xf32>
      %30 = vector.broadcast %25 : vector<8x1xf32> to vector<8x128xf32>
      %31 = arith.subf %17, %30 : vector<8x128xf32>
      %32 = math.exp %31 : vector<8x128xf32>
      %cst_17 = arith.constant dense<0.000000e+00> : vector<8xf32>
      %33 = vector.multi_reduction <add>, %32, %cst_17 [1] : vector<8x128xf32> to vector<8xf32>
      %34 = vector.shape_cast %33 : vector<8xf32> to vector<8x1xf32>
      %35 = arith.addf %29, %34 : vector<8x1xf32>
      %c0_18 = arith.constant 0 : index
      %c0_19 = arith.constant 0 : index
      %36 = vector.load %arg29[%c0_18, %c0_19] : memref<8x1xf32, #tpu.memory_space<vmem>>, vector<8x1xf32>
      tpu.vector_store %arg29[%c0_18, %c0_19], %35 {strides = array<i32>} : memref<8x1xf32, #tpu.memory_space<vmem>>, vector<8x1xf32>,
      %c0_20 = arith.constant 0 : index
      %c0_21 = arith.constant 0 : index
      %37 = vector.load %arg28[%c0_20, %c0_21] : memref<8x1xf32, #tpu.memory_space<vmem>>, vector<8x1xf32>
      tpu.vector_store %arg28[%c0_20, %c0_21], %25 {strides = array<i32>} : memref<8x1xf32, #tpu.memory_space<vmem>>, vector<8x1xf32>,
    } else {
    }
    %c1_i32 = arith.constant 1 : i32
    %8 = arith.cmpi eq, %arg0, %c1_i32 : i32
    %9 = arith.extui %8 : i1 to i32
    %c0_i32_4 = arith.constant 0 : i32
    %10 = arith.cmpi ne, %9, %c0_i32_4 : i32
    scf.if %10 {
      %11 = arith.index_cast %arg1 : i32 to index
      %c0 = arith.constant 0 : index
      %c0_5 = arith.constant 0 : index
      %12 = vector.load %arg30[%11, %c0, %c0_5] : memref<1x8x128xf32, #tpu.memory_space<vmem>>, vector<1x8x128xf32>
      %13 = vector.shape_cast %12 : vector<1x8x128xf32> to vector<8x128xf32>
      %c0_6 = arith.constant 0 : index
      %c0_7 = arith.constant 0 : index
      %14 = vector.load %arg28[%c0_6, %c0_7] : memref<8x1xf32, #tpu.memory_space<vmem>>, vector<8x1xf32>
      %15 = vector.broadcast %14 : vector<8x1xf32> to vector<8x128xf32>
      %16 = arith.subf %13, %15 : vector<8x128xf32>
      %17 = math.exp %16 : vector<8x128xf32>
      %c0_8 = arith.constant 0 : index
      %c0_9 = arith.constant 0 : index
      %18 = vector.load %arg29[%c0_8, %c0_9] : memref<8x1xf32, #tpu.memory_space<vmem>>, vector<8x1xf32>
      %19 = tpu.reciprocal %18 {approx = true} : vector<8x1xf32> -> vector<8x1xf32>
      %20 = vector.broadcast %19 : vector<8x1xf32> to vector<8x128xf32>
      %21 = arith.mulf %17, %20 : vector<8x128xf32>
      %c0_10 = arith.constant 0 : index
      %c0_11 = arith.constant 0 : index
      %22 = vector.load %arg4[%c0_10, %c0_11] : memref<8x32xi32, #tpu.memory_space<vmem>>, vector<8x32xi32>
      %c0_12 = arith.constant 0 : index
      %c0_13 = arith.constant 0 : index
      %23 = vector.load %arg27[%c0_12, %c0_13] : memref<8x32xf32, #tpu.memory_space<vmem>>, vector<8x32xf32>
      %24 = tpu.iota {dimensions = array<i32: 1>} : vector<8x128xi32>
      %c128_i32 = arith.constant 128 : i32
      %25 = arith.muli %arg1, %c128_i32 : i32
      %26 = vector.broadcast %25 : i32 to vector<8x128xi32>
      %27 = arith.addi %24, %26 : vector<8x128xi32>
      %cst = arith.constant 0.000000e+00 : f32
      %28 = vector.broadcast %cst : f32 to vector<8x128xf32>
      %29 = vector.extract_strided_slice %22 {offsets = [0, 0], sizes = [8, 1], strides = [1, 1]} : vector<8x32xi32> to vector<8x1xi32>
      %30 = vector.broadcast %29 : vector<8x1xi32> to vector<8x128xi32>
      %31 = arith.cmpi eq, %27, %30 : vector<8x128xi32>
      %32 = vector.extract_strided_slice %23 {offsets = [0, 0], sizes = [8, 1], strides = [1, 1]} : vector<8x32xf32> to vector<8x1xf32>
      %cst_14 = arith.constant 0.000000e+00 : f32
      %33 = vector.shape_cast %32 : vector<8x1xf32> to vector<8x1xf32>
      %34 = vector.broadcast %33 : vector<8x1xf32> to vector<8x128xf32>
      %35 = vector.broadcast %cst_14 : f32 to vector<8x128xf32>
      %36 = arith.select %31, %34, %35 : vector<8x128xi1>, vector<8x128xf32>
      %37 = arith.addf %28, %36 : vector<8x128xf32>
      %38 = vector.extract_strided_slice %22 {offsets = [0, 1], sizes = [8, 1], strides = [1, 1]} : vector<8x32xi32> to vector<8x1xi32>
      %39 = vector.broadcast %38 : vector<8x1xi32> to vector<8x128xi32>
      %40 = arith.cmpi eq, %27, %39 : vector<8x128xi32>
      %41 = vector.extract_strided_slice %23 {offsets = [0, 1], sizes = [8, 1], strides = [1, 1]} : vector<8x32xf32> to vector<8x1xf32>
      %cst_15 = arith.constant 0.000000e+00 : f32
      %42 = vector.shape_cast %41 : vector<8x1xf32> to vector<8x1xf32>
      %43 = vector.broadcast %42 : vector<8x1xf32> to vector<8x128xf32>
      %44 = vector.broadcast %cst_15 : f32 to vector<8x128xf32>
      %45 = arith.select %40, %43, %44 : vector<8x128xi1>, vector<8x128xf32>
      %46 = arith.addf %37, %45 : vector<8x128xf32>
      %47 = vector.extract_strided_slice %22 {offsets = [0, 2], sizes = [8, 1], strides = [1, 1]} : vector<8x32xi32> to vector<8x1xi32>
      %48 = vector.broadcast %47 : vector<8x1xi32> to vector<8x128xi32>
      %49 = arith.cmpi eq, %27, %48 : vector<8x128xi32>
      %50 = vector.extract_strided_slice %23 {offsets = [0, 2], sizes = [8, 1], strides = [1, 1]} : vector<8x32xf32> to vector<8x1xf32>
      %cst_16 = arith.constant 0.000000e+00 : f32
      %51 = vector.shape_cast %50 : vector<8x1xf32> to vector<8x1xf32>
      %52 = vector.broadcast %51 : vector<8x1xf32> to vector<8x128xf32>
      %53 = vector.broadcast %cst_16 : f32 to vector<8x128xf32>
      %54 = arith.select %49, %52, %53 : vector<8x128xi1>, vector<8x128xf32>
      %55 = arith.addf %46, %54 : vector<8x128xf32>
      %56 = vector.extract_strided_slice %22 {offsets = [0, 3], sizes = [8, 1], strides = [1, 1]} : vector<8x32xi32> to vector<8x1xi32>
      %57 = vector.broadcast %56 : vector<8x1xi32> to vector<8x128xi32>
      %58 = arith.cmpi eq, %27, %57 : vector<8x128xi32>
      %59 = vector.extract_strided_slice %23 {offsets = [0, 3], sizes = [8, 1], strides = [1, 1]} : vector<8x32xf32> to vector<8x1xf32>
      %cst_17 = arith.constant 0.000000e+00 : f32
      %60 = vector.shape_cast %59 : vector<8x1xf32> to vector<8x1xf32>
      %61 = vector.broadcast %60 : vector<8x1xf32> to vector<8x128xf32>
      %62 = vector.broadcast %cst_17 : f32 to vector<8x128xf32>
      %63 = arith.select %58, %61, %62 : vector<8x128xi1>, vector<8x128xf32>
      %64 = arith.addf %55, %63 : vector<8x128xf32>
      %65 = vector.extract_strided_slice %22 {offsets = [0, 4], sizes = [8, 1], strides = [1, 1]} : vector<8x32xi32> to vector<8x1xi32>
      %66 = vector.broadcast %65 : vector<8x1xi32> to vector<8x128xi32>
      %67 = arith.cmpi eq, %27, %66 : vector<8x128xi32>
      %68 = vector.extract_strided_slice %23 {offsets = [0, 4], sizes = [8, 1], strides = [1, 1]} : vector<8x32xf32> to vector<8x1xf32>
      %cst_18 = arith.constant 0.000000e+00 : f32
      %69 = vector.shape_cast %68 : vector<8x1xf32> to vector<8x1xf32>
      %70 = vector.broadcast %69 : vector<8x1xf32> to vector<8x128xf32>
      %71 = vector.broadcast %cst_18 : f32 to vector<8x128xf32>
      %72 = arith.select %67, %70, %71 : vector<8x128xi1>, vector<8x128xf32>
      %73 = arith.addf %64, %72 : vector<8x128xf32>
      %74 = vector.extract_strided_slice %22 {offsets = [0, 5], sizes = [8, 1], strides = [1, 1]} : vector<8x32xi32> to vector<8x1xi32>
      %75 = vector.broadcast %74 : vector<8x1xi32> to vector<8x128xi32>
      %76 = arith.cmpi eq, %27, %75 : vector<8x128xi32>
      %77 = vector.extract_strided_slice %23 {offsets = [0, 5], sizes = [8, 1], strides = [1, 1]} : vector<8x32xf32> to vector<8x1xf32>
      %cst_19 = arith.constant 0.000000e+00 : f32
      %78 = vector.shape_cast %77 : vector<8x1xf32> to vector<8x1xf32>
      %79 = vector.broadcast %78 : vector<8x1xf32> to vector<8x128xf32>
      %80 = vector.broadcast %cst_19 : f32 to vector<8x128xf32>
      %81 = arith.select %76, %79, %80 : vector<8x128xi1>, vector<8x128xf32>
      %82 = arith.addf %73, %81 : vector<8x128xf32>
      %83 = vector.extract_strided_slice %22 {offsets = [0, 6], sizes = [8, 1], strides = [1, 1]} : vector<8x32xi32> to vector<8x1xi32>
      %84 = vector.broadcast %83 : vector<8x1xi32> to vector<8x128xi32>
      %85 = arith.cmpi eq, %27, %84 : vector<8x128xi32>
      %86 = vector.extract_strided_slice %23 {offsets = [0, 6], sizes = [8, 1], strides = [1, 1]} : vector<8x32xf32> to vector<8x1xf32>
      %cst_20 = arith.constant 0.000000e+00 : f32
      %87 = vector.shape_cast %86 : vector<8x1xf32> to vector<8x1xf32>
      %88 = vector.broadcast %87 : vector<8x1xf32> to vector<8x128xf32>
      %89 = vector.broadcast %cst_20 : f32 to vector<8x128xf32>
      %90 = arith.select %85, %88, %89 : vector<8x128xi1>, vector<8x128xf32>
      %91 = arith.addf %82, %90 : vector<8x128xf32>
      %92 = vector.extract_strided_slice %22 {offsets = [0, 7], sizes = [8, 1], strides = [1, 1]} : vector<8x32xi32> to vector<8x1xi32>
      %93 = vector.broadcast %92 : vector<8x1xi32> to vector<8x128xi32>
      %94 = arith.cmpi eq, %27, %93 : vector<8x128xi32>
      %95 = vector.extract_strided_slice %23 {offsets = [0, 7], sizes = [8, 1], strides = [1, 1]} : vector<8x32xf32> to vector<8x1xf32>
      %cst_21 = arith.constant 0.000000e+00 : f32
      %96 = vector.shape_cast %95 : vector<8x1xf32> to vector<8x1xf32>
      %97 = vector.broadcast %96 : vector<8x1xf32> to vector<8x128xf32>
      %98 = vector.broadcast %cst_21 : f32 to vector<8x128xf32>
      %99 = arith.select %94, %97, %98 : vector<8x128xi1>, vector<8x128xf32>
      %100 = arith.addf %91, %99 : vector<8x128xf32>
      %101 = vector.extract_strided_slice %22 {offsets = [0, 8], sizes = [8, 1], strides = [1, 1]} : vector<8x32xi32> to vector<8x1xi32>
      %102 = vector.broadcast %101 : vector<8x1xi32> to vector<8x128xi32>
      %103 = arith.cmpi eq, %27, %102 : vector<8x128xi32>
      %104 = vector.extract_strided_slice %23 {offsets = [0, 8], sizes = [8, 1], strides = [1, 1]} : vector<8x32xf32> to vector<8x1xf32>
      %cst_22 = arith.constant 0.000000e+00 : f32
      %105 = vector.shape_cast %104 : vector<8x1xf32> to vector<8x1xf32>
      %106 = vector.broadcast %105 : vector<8x1xf32> to vector<8x128xf32>
      %107 = vector.broadcast %cst_22 : f32 to vector<8x128xf32>
      %108 = arith.select %103, %106, %107 : vector<8x128xi1>, vector<8x128xf32>
      %109 = arith.addf %100, %108 : vector<8x128xf32>
      %110 = vector.extract_strided_slice %22 {offsets = [0, 9], sizes = [8, 1], strides = [1, 1]} : vector<8x32xi32> to vector<8x1xi32>
      %111 = vector.broadcast %110 : vector<8x1xi32> to vector<8x128xi32>
      %112 = arith.cmpi eq, %27, %111 : vector<8x128xi32>
      %113 = vector.extract_strided_slice %23 {offsets = [0, 9], sizes = [8, 1], strides = [1, 1]} : vector<8x32xf32> to vector<8x1xf32>
      %cst_23 = arith.constant 0.000000e+00 : f32
      %114 = vector.shape_cast %113 : vector<8x1xf32> to vector<8x1xf32>
      %115 = vector.broadcast %114 : vector<8x1xf32> to vector<8x128xf32>
      %116 = vector.broadcast %cst_23 : f32 to vector<8x128xf32>
      %117 = arith.select %112, %115, %116 : vector<8x128xi1>, vector<8x128xf32>
      %118 = arith.addf %109, %117 : vector<8x128xf32>
      %119 = vector.extract_strided_slice %22 {offsets = [0, 10], sizes = [8, 1], strides = [1, 1]} : vector<8x32xi32> to vector<8x1xi32>
      %120 = vector.broadcast %119 : vector<8x1xi32> to vector<8x128xi32>
      %121 = arith.cmpi eq, %27, %120 : vector<8x128xi32>
      %122 = vector.extract_strided_slice %23 {offsets = [0, 10], sizes = [8, 1], strides = [1, 1]} : vector<8x32xf32> to vector<8x1xf32>
      %cst_24 = arith.constant 0.000000e+00 : f32
      %123 = vector.shape_cast %122 : vector<8x1xf32> to vector<8x1xf32>
      %124 = vector.broadcast %123 : vector<8x1xf32> to vector<8x128xf32>
      %125 = vector.broadcast %cst_24 : f32 to vector<8x128xf32>
      %126 = arith.select %121, %124, %125 : vector<8x128xi1>, vector<8x128xf32>
      %127 = arith.addf %118, %126 : vector<8x128xf32>
      %128 = vector.extract_strided_slice %22 {offsets = [0, 11], sizes = [8, 1], strides = [1, 1]} : vector<8x32xi32> to vector<8x1xi32>
      %129 = vector.broadcast %128 : vector<8x1xi32> to vector<8x128xi32>
      %130 = arith.cmpi eq, %27, %129 : vector<8x128xi32>
      %131 = vector.extract_strided_slice %23 {offsets = [0, 11], sizes = [8, 1], strides = [1, 1]} : vector<8x32xf32> to vector<8x1xf32>
      %cst_25 = arith.constant 0.000000e+00 : f32
      %132 = vector.shape_cast %131 : vector<8x1xf32> to vector<8x1xf32>
      %133 = vector.broadcast %132 : vector<8x1xf32> to vector<8x128xf32>
      %134 = vector.broadcast %cst_25 : f32 to vector<8x128xf32>
      %135 = arith.select %130, %133, %134 : vector<8x128xi1>, vector<8x128xf32>
      %136 = arith.addf %127, %135 : vector<8x128xf32>
      %137 = vector.extract_strided_slice %22 {offsets = [0, 12], sizes = [8, 1], strides = [1, 1]} : vector<8x32xi32> to vector<8x1xi32>
      %138 = vector.broadcast %137 : vector<8x1xi32> to vector<8x128xi32>
      %139 = arith.cmpi eq, %27, %138 : vector<8x128xi32>
      %140 = vector.extract_strided_slice %23 {offsets = [0, 12], sizes = [8, 1], strides = [1, 1]} : vector<8x32xf32> to vector<8x1xf32>
      %cst_26 = arith.constant 0.000000e+00 : f32
      %141 = vector.shape_cast %140 : vector<8x1xf32> to vector<8x1xf32>
      %142 = vector.broadcast %141 : vector<8x1xf32> to vector<8x128xf32>
      %143 = vector.broadcast %cst_26 : f32 to vector<8x128xf32>
      %144 = arith.select %139, %142, %143 : vector<8x128xi1>, vector<8x128xf32>
      %145 = arith.addf %136, %144 : vector<8x128xf32>
      %146 = vector.extract_strided_slice %22 {offsets = [0, 13], sizes = [8, 1], strides = [1, 1]} : vector<8x32xi32> to vector<8x1xi32>
      %147 = vector.broadcast %146 : vector<8x1xi32> to vector<8x128xi32>
      %148 = arith.cmpi eq, %27, %147 : vector<8x128xi32>
      %149 = vector.extract_strided_slice %23 {offsets = [0, 13], sizes = [8, 1], strides = [1, 1]} : vector<8x32xf32> to vector<8x1xf32>
      %cst_27 = arith.constant 0.000000e+00 : f32
      %150 = vector.shape_cast %149 : vector<8x1xf32> to vector<8x1xf32>
      %151 = vector.broadcast %150 : vector<8x1xf32> to vector<8x128xf32>
      %152 = vector.broadcast %cst_27 : f32 to vector<8x128xf32>
      %153 = arith.select %148, %151, %152 : vector<8x128xi1>, vector<8x128xf32>
      %154 = arith.addf %145, %153 : vector<8x128xf32>
      %155 = vector.extract_strided_slice %22 {offsets = [0, 14], sizes = [8, 1], strides = [1, 1]} : vector<8x32xi32> to vector<8x1xi32>
      %156 = vector.broadcast %155 : vector<8x1xi32> to vector<8x128xi32>
      %157 = arith.cmpi eq, %27, %156 : vector<8x128xi32>
      %158 = vector.extract_strided_slice %23 {offsets = [0, 14], sizes = [8, 1], strides = [1, 1]} : vector<8x32xf32> to vector<8x1xf32>
      %cst_28 = arith.constant 0.000000e+00 : f32
      %159 = vector.shape_cast %158 : vector<8x1xf32> to vector<8x1xf32>
      %160 = vector.broadcast %159 : vector<8x1xf32> to vector<8x128xf32>
      %161 = vector.broadcast %cst_28 : f32 to vector<8x128xf32>
      %162 = arith.select %157, %160, %161 : vector<8x128xi1>, vector<8x128xf32>
      %163 = arith.addf %154, %162 : vector<8x128xf32>
      %164 = vector.extract_strided_slice %22 {offsets = [0, 15], sizes = [8, 1], strides = [1, 1]} : vector<8x32xi32> to vector<8x1xi32>
      %165 = vector.broadcast %164 : vector<8x1xi32> to vector<8x128xi32>
      %166 = arith.cmpi eq, %27, %165 : vector<8x128xi32>
      %167 = vector.extract_strided_slice %23 {offsets = [0, 15], sizes = [8, 1], strides = [1, 1]} : vector<8x32xf32> to vector<8x1xf32>
      %cst_29 = arith.constant 0.000000e+00 : f32
      %168 = vector.shape_cast %167 : vector<8x1xf32> to vector<8x1xf32>
      %169 = vector.broadcast %168 : vector<8x1xf32> to vector<8x128xf32>
      %170 = vector.broadcast %cst_29 : f32 to vector<8x128xf32>
      %171 = arith.select %166, %169, %170 : vector<8x128xi1>, vector<8x128xf32>
      %172 = arith.addf %163, %171 : vector<8x128xf32>
      %173 = vector.extract_strided_slice %22 {offsets = [0, 16], sizes = [8, 1], strides = [1, 1]} : vector<8x32xi32> to vector<8x1xi32>
      %174 = vector.broadcast %173 : vector<8x1xi32> to vector<8x128xi32>
      %175 = arith.cmpi eq, %27, %174 : vector<8x128xi32>
      %176 = vector.extract_strided_slice %23 {offsets = [0, 16], sizes = [8, 1], strides = [1, 1]} : vector<8x32xf32> to vector<8x1xf32>
      %cst_30 = arith.constant 0.000000e+00 : f32
      %177 = vector.shape_cast %176 : vector<8x1xf32> to vector<8x1xf32>
      %178 = vector.broadcast %177 : vector<8x1xf32> to vector<8x128xf32>
      %179 = vector.broadcast %cst_30 : f32 to vector<8x128xf32>
      %180 = arith.select %175, %178, %179 : vector<8x128xi1>, vector<8x128xf32>
      %181 = arith.addf %172, %180 : vector<8x128xf32>
      %182 = vector.extract_strided_slice %22 {offsets = [0, 17], sizes = [8, 1], strides = [1, 1]} : vector<8x32xi32> to vector<8x1xi32>
      %183 = vector.broadcast %182 : vector<8x1xi32> to vector<8x128xi32>
      %184 = arith.cmpi eq, %27, %183 : vector<8x128xi32>
      %185 = vector.extract_strided_slice %23 {offsets = [0, 17], sizes = [8, 1], strides = [1, 1]} : vector<8x32xf32> to vector<8x1xf32>
      %cst_31 = arith.constant 0.000000e+00 : f32
      %186 = vector.shape_cast %185 : vector<8x1xf32> to vector<8x1xf32>
      %187 = vector.broadcast %186 : vector<8x1xf32> to vector<8x128xf32>
      %188 = vector.broadcast %cst_31 : f32 to vector<8x128xf32>
      %189 = arith.select %184, %187, %188 : vector<8x128xi1>, vector<8x128xf32>
      %190 = arith.addf %181, %189 : vector<8x128xf32>
      %191 = vector.extract_strided_slice %22 {offsets = [0, 18], sizes = [8, 1], strides = [1, 1]} : vector<8x32xi32> to vector<8x1xi32>
      %192 = vector.broadcast %191 : vector<8x1xi32> to vector<8x128xi32>
      %193 = arith.cmpi eq, %27, %192 : vector<8x128xi32>
      %194 = vector.extract_strided_slice %23 {offsets = [0, 18], sizes = [8, 1], strides = [1, 1]} : vector<8x32xf32> to vector<8x1xf32>
      %cst_32 = arith.constant 0.000000e+00 : f32
      %195 = vector.shape_cast %194 : vector<8x1xf32> to vector<8x1xf32>
      %196 = vector.broadcast %195 : vector<8x1xf32> to vector<8x128xf32>
      %197 = vector.broadcast %cst_32 : f32 to vector<8x128xf32>
      %198 = arith.select %193, %196, %197 : vector<8x128xi1>, vector<8x128xf32>
      %199 = arith.addf %190, %198 : vector<8x128xf32>
      %200 = vector.extract_strided_slice %22 {offsets = [0, 19], sizes = [8, 1], strides = [1, 1]} : vector<8x32xi32> to vector<8x1xi32>
      %201 = vector.broadcast %200 : vector<8x1xi32> to vector<8x128xi32>
      %202 = arith.cmpi eq, %27, %201 : vector<8x128xi32>
      %203 = vector.extract_strided_slice %23 {offsets = [0, 19], sizes = [8, 1], strides = [1, 1]} : vector<8x32xf32> to vector<8x1xf32>
      %cst_33 = arith.constant 0.000000e+00 : f32
      %204 = vector.shape_cast %203 : vector<8x1xf32> to vector<8x1xf32>
      %205 = vector.broadcast %204 : vector<8x1xf32> to vector<8x128xf32>
      %206 = vector.broadcast %cst_33 : f32 to vector<8x128xf32>
      %207 = arith.select %202, %205, %206 : vector<8x128xi1>, vector<8x128xf32>
      %208 = arith.addf %199, %207 : vector<8x128xf32>
      %209 = vector.extract_strided_slice %22 {offsets = [0, 20], sizes = [8, 1], strides = [1, 1]} : vector<8x32xi32> to vector<8x1xi32>
      %210 = vector.broadcast %209 : vector<8x1xi32> to vector<8x128xi32>
      %211 = arith.cmpi eq, %27, %210 : vector<8x128xi32>
      %212 = vector.extract_strided_slice %23 {offsets = [0, 20], sizes = [8, 1], strides = [1, 1]} : vector<8x32xf32> to vector<8x1xf32>
      %cst_34 = arith.constant 0.000000e+00 : f32
      %213 = vector.shape_cast %212 : vector<8x1xf32> to vector<8x1xf32>
      %214 = vector.broadcast %213 : vector<8x1xf32> to vector<8x128xf32>
      %215 = vector.broadcast %cst_34 : f32 to vector<8x128xf32>
      %216 = arith.select %211, %214, %215 : vector<8x128xi1>, vector<8x128xf32>
      %217 = arith.addf %208, %216 : vector<8x128xf32>
      %218 = vector.extract_strided_slice %22 {offsets = [0, 21], sizes = [8, 1], strides = [1, 1]} : vector<8x32xi32> to vector<8x1xi32>
      %219 = vector.broadcast %218 : vector<8x1xi32> to vector<8x128xi32>
      %220 = arith.cmpi eq, %27, %219 : vector<8x128xi32>
      %221 = vector.extract_strided_slice %23 {offsets = [0, 21], sizes = [8, 1], strides = [1, 1]} : vector<8x32xf32> to vector<8x1xf32>
      %cst_35 = arith.constant 0.000000e+00 : f32
      %222 = vector.shape_cast %221 : vector<8x1xf32> to vector<8x1xf32>
      %223 = vector.broadcast %222 : vector<8x1xf32> to vector<8x128xf32>
      %224 = vector.broadcast %cst_35 : f32 to vector<8x128xf32>
      %225 = arith.select %220, %223, %224 : vector<8x128xi1>, vector<8x128xf32>
      %226 = arith.addf %217, %225 : vector<8x128xf32>
      %227 = vector.extract_strided_slice %22 {offsets = [0, 22], sizes = [8, 1], strides = [1, 1]} : vector<8x32xi32> to vector<8x1xi32>
      %228 = vector.broadcast %227 : vector<8x1xi32> to vector<8x128xi32>
      %229 = arith.cmpi eq, %27, %228 : vector<8x128xi32>
      %230 = vector.extract_strided_slice %23 {offsets = [0, 22], sizes = [8, 1], strides = [1, 1]} : vector<8x32xf32> to vector<8x1xf32>
      %cst_36 = arith.constant 0.000000e+00 : f32
      %231 = vector.shape_cast %230 : vector<8x1xf32> to vector<8x1xf32>
      %232 = vector.broadcast %231 : vector<8x1xf32> to vector<8x128xf32>
      %233 = vector.broadcast %cst_36 : f32 to vector<8x128xf32>
      %234 = arith.select %229, %232, %233 : vector<8x128xi1>, vector<8x128xf32>
      %235 = arith.addf %226, %234 : vector<8x128xf32>
      %236 = vector.extract_strided_slice %22 {offsets = [0, 23], sizes = [8, 1], strides = [1, 1]} : vector<8x32xi32> to vector<8x1xi32>
      %237 = vector.broadcast %236 : vector<8x1xi32> to vector<8x128xi32>
      %238 = arith.cmpi eq, %27, %237 : vector<8x128xi32>
      %239 = vector.extract_strided_slice %23 {offsets = [0, 23], sizes = [8, 1], strides = [1, 1]} : vector<8x32xf32> to vector<8x1xf32>
      %cst_37 = arith.constant 0.000000e+00 : f32
      %240 = vector.shape_cast %239 : vector<8x1xf32> to vector<8x1xf32>
      %241 = vector.broadcast %240 : vector<8x1xf32> to vector<8x128xf32>
      %242 = vector.broadcast %cst_37 : f32 to vector<8x128xf32>
      %243 = arith.select %238, %241, %242 : vector<8x128xi1>, vector<8x128xf32>
      %244 = arith.addf %235, %243 : vector<8x128xf32>
      %245 = vector.extract_strided_slice %22 {offsets = [0, 24], sizes = [8, 1], strides = [1, 1]} : vector<8x32xi32> to vector<8x1xi32>
      %246 = vector.broadcast %245 : vector<8x1xi32> to vector<8x128xi32>
      %247 = arith.cmpi eq, %27, %246 : vector<8x128xi32>
      %248 = vector.extract_strided_slice %23 {offsets = [0, 24], sizes = [8, 1], strides = [1, 1]} : vector<8x32xf32> to vector<8x1xf32>
      %cst_38 = arith.constant 0.000000e+00 : f32
      %249 = vector.shape_cast %248 : vector<8x1xf32> to vector<8x1xf32>
      %250 = vector.broadcast %249 : vector<8x1xf32> to vector<8x128xf32>
      %251 = vector.broadcast %cst_38 : f32 to vector<8x128xf32>
      %252 = arith.select %247, %250, %251 : vector<8x128xi1>, vector<8x128xf32>
      %253 = arith.addf %244, %252 : vector<8x128xf32>
      %254 = vector.extract_strided_slice %22 {offsets = [0, 25], sizes = [8, 1], strides = [1, 1]} : vector<8x32xi32> to vector<8x1xi32>
      %255 = vector.broadcast %254 : vector<8x1xi32> to vector<8x128xi32>
      %256 = arith.cmpi eq, %27, %255 : vector<8x128xi32>
      %257 = vector.extract_strided_slice %23 {offsets = [0, 25], sizes = [8, 1], strides = [1, 1]} : vector<8x32xf32> to vector<8x1xf32>
      %cst_39 = arith.constant 0.000000e+00 : f32
      %258 = vector.shape_cast %257 : vector<8x1xf32> to vector<8x1xf32>
      %259 = vector.broadcast %258 : vector<8x1xf32> to vector<8x128xf32>
      %260 = vector.broadcast %cst_39 : f32 to vector<8x128xf32>
      %261 = arith.select %256, %259, %260 : vector<8x128xi1>, vector<8x128xf32>
      %262 = arith.addf %253, %261 : vector<8x128xf32>
      %263 = vector.extract_strided_slice %22 {offsets = [0, 26], sizes = [8, 1], strides = [1, 1]} : vector<8x32xi32> to vector<8x1xi32>
      %264 = vector.broadcast %263 : vector<8x1xi32> to vector<8x128xi32>
      %265 = arith.cmpi eq, %27, %264 : vector<8x128xi32>
      %266 = vector.extract_strided_slice %23 {offsets = [0, 26], sizes = [8, 1], strides = [1, 1]} : vector<8x32xf32> to vector<8x1xf32>
      %cst_40 = arith.constant 0.000000e+00 : f32
      %267 = vector.shape_cast %266 : vector<8x1xf32> to vector<8x1xf32>
      %268 = vector.broadcast %267 : vector<8x1xf32> to vector<8x128xf32>
      %269 = vector.broadcast %cst_40 : f32 to vector<8x128xf32>
      %270 = arith.select %265, %268, %269 : vector<8x128xi1>, vector<8x128xf32>
      %271 = arith.addf %262, %270 : vector<8x128xf32>
      %272 = vector.extract_strided_slice %22 {offsets = [0, 27], sizes = [8, 1], strides = [1, 1]} : vector<8x32xi32> to vector<8x1xi32>
      %273 = vector.broadcast %272 : vector<8x1xi32> to vector<8x128xi32>
      %274 = arith.cmpi eq, %27, %273 : vector<8x128xi32>
      %275 = vector.extract_strided_slice %23 {offsets = [0, 27], sizes = [8, 1], strides = [1, 1]} : vector<8x32xf32> to vector<8x1xf32>
      %cst_41 = arith.constant 0.000000e+00 : f32
      %276 = vector.shape_cast %275 : vector<8x1xf32> to vector<8x1xf32>
      %277 = vector.broadcast %276 : vector<8x1xf32> to vector<8x128xf32>
      %278 = vector.broadcast %cst_41 : f32 to vector<8x128xf32>
      %279 = arith.select %274, %277, %278 : vector<8x128xi1>, vector<8x128xf32>
      %280 = arith.addf %271, %279 : vector<8x128xf32>
      %281 = vector.extract_strided_slice %22 {offsets = [0, 28], sizes = [8, 1], strides = [1, 1]} : vector<8x32xi32> to vector<8x1xi32>
      %282 = vector.broadcast %281 : vector<8x1xi32> to vector<8x128xi32>
      %283 = arith.cmpi eq, %27, %282 : vector<8x128xi32>
      %284 = vector.extract_strided_slice %23 {offsets = [0, 28], sizes = [8, 1], strides = [1, 1]} : vector<8x32xf32> to vector<8x1xf32>
      %cst_42 = arith.constant 0.000000e+00 : f32
      %285 = vector.shape_cast %284 : vector<8x1xf32> to vector<8x1xf32>
      %286 = vector.broadcast %285 : vector<8x1xf32> to vector<8x128xf32>
      %287 = vector.broadcast %cst_42 : f32 to vector<8x128xf32>
      %288 = arith.select %283, %286, %287 : vector<8x128xi1>, vector<8x128xf32>
      %289 = arith.addf %280, %288 : vector<8x128xf32>
      %290 = vector.extract_strided_slice %22 {offsets = [0, 29], sizes = [8, 1], strides = [1, 1]} : vector<8x32xi32> to vector<8x1xi32>
      %291 = vector.broadcast %290 : vector<8x1xi32> to vector<8x128xi32>
      %292 = arith.cmpi eq, %27, %291 : vector<8x128xi32>
      %293 = vector.extract_strided_slice %23 {offsets = [0, 29], sizes = [8, 1], strides = [1, 1]} : vector<8x32xf32> to vector<8x1xf32>
      %cst_43 = arith.constant 0.000000e+00 : f32
      %294 = vector.shape_cast %293 : vector<8x1xf32> to vector<8x1xf32>
      %295 = vector.broadcast %294 : vector<8x1xf32> to vector<8x128xf32>
      %296 = vector.broadcast %cst_43 : f32 to vector<8x128xf32>
      %297 = arith.select %292, %295, %296 : vector<8x128xi1>, vector<8x128xf32>
      %298 = arith.addf %289, %297 : vector<8x128xf32>
      %299 = vector.extract_strided_slice %22 {offsets = [0, 30], sizes = [8, 1], strides = [1, 1]} : vector<8x32xi32> to vector<8x1xi32>
      %300 = vector.broadcast %299 : vector<8x1xi32> to vector<8x128xi32>
      %301 = arith.cmpi eq, %27, %300 : vector<8x128xi32>
      %302 = vector.extract_strided_slice %23 {offsets = [0, 30], sizes = [8, 1], strides = [1, 1]} : vector<8x32xf32> to vector<8x1xf32>
      %cst_44 = arith.constant 0.000000e+00 : f32
      %303 = vector.shape_cast %302 : vector<8x1xf32> to vector<8x1xf32>
      %304 = vector.broadcast %303 : vector<8x1xf32> to vector<8x128xf32>
      %305 = vector.broadcast %cst_44 : f32 to vector<8x128xf32>
      %306 = arith.select %301, %304, %305 : vector<8x128xi1>, vector<8x128xf32>
      %307 = arith.addf %298, %306 : vector<8x128xf32>
      %308 = vector.extract_strided_slice %22 {offsets = [0, 31], sizes = [8, 1], strides = [1, 1]} : vector<8x32xi32> to vector<8x1xi32>
      %309 = vector.broadcast %308 : vector<8x1xi32> to vector<8x128xi32>
      %310 = arith.cmpi eq, %27, %309 : vector<8x128xi32>
      %311 = vector.extract_strided_slice %23 {offsets = [0, 31], sizes = [8, 1], strides = [1, 1]} : vector<8x32xf32> to vector<8x1xf32>
      %cst_45 = arith.constant 0.000000e+00 : f32
      %312 = vector.shape_cast %311 : vector<8x1xf32> to vector<8x1xf32>
      %313 = vector.broadcast %312 : vector<8x1xf32> to vector<8x128xf32>
      %314 = vector.broadcast %cst_45 : f32 to vector<8x128xf32>
      %315 = arith.select %310, %313, %314 : vector<8x128xi1>, vector<8x128xf32>
      %316 = arith.addf %307, %315 : vector<8x128xf32>
      %c0_46 = arith.constant 0 : index
      %c0_47 = arith.constant 0 : index
      %317 = vector.load %arg26[%c0_46, %c0_47] : memref<8x2xf32, #tpu.memory_space<vmem>>, vector<8x2xf32>
      %318 = vector.extract_strided_slice %317 {offsets = [0, 0], sizes = [8, 1], strides = [1, 1]} : vector<8x2xf32> to vector<8x1xf32>
      %319 = vector.broadcast %318 : vector<8x1xf32> to vector<8x128xf32>
      %320 = arith.mulf %319, %21 : vector<8x128xf32>
      %321 = vector.extract_strided_slice %317 {offsets = [0, 1], sizes = [8, 1], strides = [1, 1]} : vector<8x2xf32> to vector<8x1xf32>
      %322 = vector.broadcast %321 : vector<8x1xf32> to vector<8x128xf32>
      %323 = arith.mulf %322, %316 : vector<8x128xf32>
      %324 = arith.addf %320, %323 : vector<8x128xf32>
      %c0_48 = arith.constant 0 : index
      %c0_49 = arith.constant 0 : index
      %325 = vector.load %arg23[%c0_48, %c0_49] : memref<8x128xf32, #tpu.memory_space<vmem>>, vector<8x128xf32>
      tpu.vector_store %arg23[%c0_48, %c0_49], %324 {strides = array<i32>} : memref<8x128xf32, #tpu.memory_space<vmem>>, vector<8x128xf32>,
    } else {
    }
    return
  }
  func.func @transform_0(%arg0: i32, %arg1: i32) -> (i32, i32) {
    %c0_i32 = arith.constant 0 : i32
    %c0_i32_0 = arith.constant 0 : i32
    %c0_i32_1 = arith.constant 0 : i32
    return %c0_i32, %c0_i32_0 : i32, i32
  }
  func.func @transform_1(%arg0: i32, %arg1: i32) -> (i32, i32) {
    %c0_i32 = arith.constant 0 : i32
    %c0_i32_0 = arith.constant 0 : i32
    %c0_i32_1 = arith.constant 0 : i32
    return %c0_i32, %c0_i32_0 : i32, i32
  }
  func.func @transform_2(%arg0: i32, %arg1: i32) -> (i32, i32) {
    %c0_i32 = arith.constant 0 : i32
    %c0_i32_0 = arith.constant 0 : i32
    %c0_i32_1 = arith.constant 0 : i32
    return %c0_i32, %c0_i32_0 : i32, i32
  }
  func.func @transform_3(%arg0: i32, %arg1: i32) -> (i32, i32, i32) {
    %c0_i32 = arith.constant 0 : i32
    %c0_i32_0 = arith.constant 0 : i32
    %c0_i32_1 = arith.constant 0 : i32
    %c0_i32_2 = arith.constant 0 : i32
    return %c0_i32, %c0_i32_0, %c0_i32_1 : i32, i32, i32
  }
  func.func @transform_4(%arg0: i32, %arg1: i32) -> (i32, i32) {
    %c0_i32 = arith.constant 0 : i32
    %c0_i32_0 = arith.constant 0 : i32
    %c0_i32_1 = arith.constant 0 : i32
    return %c0_i32, %c0_i32_0 : i32, i32
  }
  func.func @transform_5(%arg0: i32, %arg1: i32) -> (i32, i32) {
    %c0_i32 = arith.constant 0 : i32
    %c0_i32_0 = arith.constant 0 : i32
    %c0_i32_1 = arith.constant 0 : i32
    return %c0_i32, %c0_i32_0 : i32, i32
  }
  func.func @transform_6(%arg0: i32, %arg1: i32) -> (i32, i32) {
    %c0_i32 = arith.constant 0 : i32
    %c0_i32_0 = arith.constant 0 : i32
    %c0_i32_1 = arith.constant 0 : i32
    return %c0_i32, %c0_i32_0 : i32, i32
  }
  func.func @transform_7(%arg0: i32, %arg1: i32) -> (i32, i32) {
    %c0_i32 = arith.constant 0 : i32
    %c0_i32_0 = arith.constant 0 : i32
    %c0_i32_1 = arith.constant 0 : i32
    return %c0_i32, %c0_i32_0 : i32, i32
  }
  func.func @transform_8(%arg0: i32, %arg1: i32) -> (i32, i32) {
    %c0_i32 = arith.constant 0 : i32
    %c0_i32_0 = arith.constant 0 : i32
    %c0_i32_1 = arith.constant 0 : i32
    return %c0_i32, %c0_i32_0 : i32, i32
  }
  func.func @transform_9(%arg0: i32, %arg1: i32) -> (i32, i32) {
    %c0_i32 = arith.constant 0 : i32
    %c0_i32_0 = arith.constant 0 : i32
    %c0_i32_1 = arith.constant 0 : i32
    return %c0_i32, %c0_i32_0 : i32, i32
  }
  func.func @transform_10(%arg0: i32, %arg1: i32) -> (i32, i32) {
    %c0_i32 = arith.constant 0 : i32
    %c0_i32_0 = arith.constant 0 : i32
    %c0_i32_1 = arith.constant 0 : i32
    return %c0_i32, %c0_i32_0 : i32, i32
  }
  func.func @transform_11(%arg0: i32, %arg1: i32) -> (i32, i32) {
    %c0_i32 = arith.constant 0 : i32
    %c0_i32_0 = arith.constant 0 : i32
    %c0_i32_1 = arith.constant 0 : i32
    return %c0_i32, %c0_i32_0 : i32, i32
  }
  func.func @transform_12(%arg0: i32, %arg1: i32) -> (i32, i32) {
    %c0_i32 = arith.constant 0 : i32
    %c0_i32_0 = arith.constant 0 : i32
    %c0_i32_1 = arith.constant 0 : i32
    return %c0_i32, %c0_i32_0 : i32, i32
  }
  func.func @transform_13(%arg0: i32, %arg1: i32) -> (i32, i32) {
    %c0_i32 = arith.constant 0 : i32
    %c0_i32_0 = arith.constant 0 : i32
    %c0_i32_1 = arith.constant 0 : i32
    return %c0_i32, %c0_i32_0 : i32, i32
  }
  func.func @transform_14(%arg0: i32, %arg1: i32) -> (i32, i32) {
    %c0_i32 = arith.constant 0 : i32
    %c0_i32_0 = arith.constant 0 : i32
    %c0_i32_1 = arith.constant 0 : i32
    return %c0_i32, %c0_i32_0 : i32, i32
  }
  func.func @transform_15(%arg0: i32, %arg1: i32) -> (i32, i32) {
    %c0_i32 = arith.constant 0 : i32
    %c0_i32_0 = arith.constant 0 : i32
    %c0_i32_1 = arith.constant 0 : i32
    return %c0_i32, %c0_i32_0 : i32, i32
  }
  func.func @transform_16(%arg0: i32, %arg1: i32) -> (i32, i32) {
    %c0_i32 = arith.constant 0 : i32
    %c0_i32_0 = arith.constant 0 : i32
    %c0_i32_1 = arith.constant 0 : i32
    return %c0_i32, %c0_i32_0 : i32, i32
  }
  func.func @transform_17(%arg0: i32, %arg1: i32) -> (i32, i32) {
    %c1_i32 = arith.constant 1 : i32
    %0 = arith.subi %c1_i32, %arg0 : i32
    %1 = arith.muli %arg1, %0 : i32
    %c0_i32 = arith.constant 0 : i32
    %2 = arith.muli %arg0, %c0_i32 : i32
    %3 = arith.addi %1, %2 : i32
    %c0_i32_0 = arith.constant 0 : i32
    %c0_i32_1 = arith.constant 0 : i32
    return %c0_i32_0, %3 : i32, i32
  }
  func.func @transform_18(%arg0: i32, %arg1: i32) -> (i32, i32) {
    %c1_i32 = arith.constant 1 : i32
    %0 = arith.subi %c1_i32, %arg0 : i32
    %1 = arith.muli %arg1, %0 : i32
    %c0_i32 = arith.constant 0 : i32
    %2 = arith.muli %arg0, %c0_i32 : i32
    %3 = arith.addi %1, %2 : i32
    %c0_i32_0 = arith.constant 0 : i32
    %c0_i32_1 = arith.constant 0 : i32
    return %c0_i32_0, %3 : i32, i32
  }
  func.func @transform_19(%arg0: i32, %arg1: i32) -> (i32, i32) {
    %c0_i32 = arith.constant 0 : i32
    %c0_i32_0 = arith.constant 0 : i32
    %c0_i32_1 = arith.constant 0 : i32
    return %c0_i32, %c0_i32_0 : i32, i32
  }
  func.func @transform_20(%arg0: i32, %arg1: i32) -> (i32, i32) {
    %c0_i32 = arith.constant 0 : i32
    %c0_i32_0 = arith.constant 0 : i32
    %c0_i32_1 = arith.constant 0 : i32
    return %c0_i32, %c0_i32_0 : i32, i32
  }
  func.func @transform_21(%arg0: i32, %arg1: i32) -> (i32, i32) {
    %0 = arith.muli %arg1, %arg0 : i32
    %c0_i32 = arith.constant 0 : i32
    %c0_i32_0 = arith.constant 0 : i32
    return %c0_i32, %0 : i32, i32
  }
  func.func @transform_22(%arg0: i32, %arg1: i32) -> (i32, i32) {
    %c0_i32 = arith.constant 0 : i32
    %c0_i32_0 = arith.constant 0 : i32
    %c0_i32_1 = arith.constant 0 : i32
    return %c0_i32, %c0_i32_0 : i32, i32
  }
}

</mosaic_0001>

<bundles_post_ra>
// kernel: tpu_custom_call.1
= control target key start
LH: loop header
LB: loop body
LE: loop exit
PB: predicated region body
PF: predicated region fallthrough
CT: control target
= control target key end

     0   :  { %s7480_s0 = inlined_call_operand.hbm [shape: f32[8,128], index: 0, kind: input, shape index: {}]   ;;  %s7481_s1 = inlined_call_operand.hbm [shape: f32[8,128], index: 1, kind: input, shape index: {}]   ;;  %s7482_s2 = inlined_call_operand.hbm [shape: s32[8,32], index: 2, kind: input, shape index: {}]   ;;  %s7483_s3 = inlined_call_operand.hbm [shape: f32[8,32,128], index: 3, kind: input, shape index: {}]   ;;  %s7484_s4 = inlined_call_operand.hbm [shape: f32[8,32], index: 4, kind: input, shape index: {}]   ;;  %s7485_s5 = inlined_call_operand.hbm [shape: f32[128,640], index: 5, kind: input, shape index: {}]   ;;  %s7486_s6 = inlined_call_operand.hbm [shape: f32[128,640], index: 6, kind: input, shape index: {}]   ;;  %s7487_s7 = inlined_call_operand.hbm [shape: f32[1,640], index: 7, kind: input, shape index: {}]   ;;  %s7488_s8 = inlined_call_operand.vmem [shape: f32[128,128], index: 8, kind: input, shape index: {}]   ;;  %s7489_s9 = inlined_call_operand.hbm [shape: f32[128,128], index: 9, kind: input, shape index: {}]   ;;  %s7490_s10 = inlined_call_operand.vmem [shape: f32[1,128], index: 10, kind: input, shape index: {}]   ;;  %s7491_s11 = inlined_call_operand.hbm [shape: f32[128,640], index: 11, kind: input, shape index: {}]   ;;  %s7492_s12 = inlined_call_operand.hbm [shape: f32[128,640], index: 12, kind: input, shape index: {}]   ;;  %s7493_s13 = inlined_call_operand.hbm [shape: f32[1,640], index: 13, kind: input, shape index: {}]   ;;  %s7494_s14 = inlined_call_operand.hbm [shape: f32[128,128], index: 14, kind: input, shape index: {}]   ;;  %s7495_s15 = inlined_call_operand.hbm [shape: f32[128,128], index: 15, kind: input, shape index: {}]   ;;  %s7496_s16 = inlined_call_operand.vmem [shape: f32[1,128], index: 16, kind: input, shape index: {}]   ;;  %s7497_s17 = inlined_call_operand.vmem [shape: bf16[128,128], index: 17, kind: input, shape index: {}]   ;;  %s7498_s18 = inlined_call_operand.vmem [shape: f32[1,128], index: 18, kind: input, shape index: {}]   ;;  %s7499_s19 = inlined_call_operand.vmem [shape: f32[128,2], index: 19, kind: input, shape index: {}]   ;;  %s7500_s20 = inlined_call_operand.vmem [shape: f32[1,2], index: 20, kind: input, shape index: {}]   ;;  %s7501_s21 = inlined_call_operand.hbm [shape: f32[8,128], index: 21, kind: output, shape index: {0}]   ;;  %s7502_s22 = inlined_call_operand.hbm [shape: f32[8,128], index: 22, kind: output, shape index: {1}]  }
   0x1   :  { %7553 = sst [smem:[#allocation60_spill]] %s7480_s0 }
   0x2   :  { %7554 = sst [smem:[#allocation61_spill]] %s7481_s1 }
   0x3   :  { %7555 = sst [smem:[#allocation62_spill]] %s7482_s2 }
   0x4   :  { %7556 = sst [smem:[#allocation63_spill]] %s7483_s3 }
   0x5   :  { %7557 = sst [smem:[#allocation64_spill]] %s7484_s4 }
   0x6   :  { %7558 = sst [smem:[#allocation65_spill]] %s7485_s5 }
   0x7   :  { %7559 = sst [smem:[#allocation66_spill]] %s7486_s6 }
   0x8   :  { %7560 = sst [smem:[#allocation67_spill]] %s7487_s7 }
   0x9   :  { %7561 = sst [smem:[#allocation68_spill]] %s7490_s10 }
   0xa   :  { %7562 = sst [smem:[#allocation69_spill]] %s7491_s11 }
   0xb   :  { %7563 = sst [smem:[#allocation70_spill]] %s7493_s13 }
   0xc   :  { %7564 = sst [smem:[#allocation71_spill]] %s7496_s16 }
   0xd   :  { %7565 = sst [smem:[#allocation72_spill]] %s7497_s17 }
   0xe   :  { %7566 = sst [smem:[#allocation73_spill]] %s7498_s18 }
   0xf   :  { %7567 = sst [smem:[#allocation74_spill]] %s7499_s19 }
  0x10   :  { %7568 = sst [smem:[#allocation75_spill]] %s7500_s20 }
  0x11   :  { %7569 = sst [smem:[#allocation76_spill]] %s7501_s21 }
  0x12   :  { %7570 = sst [smem:[#allocation77_spill]] %s7502_s22 }
  0x13   :  { %28 = vsyncpa [#allocation9], 0 }
  0x14   :  { %29 = vsyncpa [#allocation12], 0 }
  0x15   :  { %30 = vsyncpa [#allocation15], 0 }
  0x16   :  { %31 = vsyncpa [#allocation18], 0 }
  0x17   :  { %32 = vsyncpa [#allocation21], 0 }
  0x18   :  { %33 = vsyncpa [#allocation24], 0 }
  0x19   :  { %34 = vsyncpa [#allocation27], 0 }
  0x1a   :  { %35 = vsyncpa [#allocation30], 0 }
  0x1b   :  { %36 = vsyncpa [#allocation10], 0 }
  0x1c   :  { %38 = vsyncpa [#allocation10 + $0x1], 0 }
  0x1d   :  { %39 = vsyncpa [#allocation33], 0  ;;  %s6297_s3 = smov 0   ;;  %s6299_s28 = smov 0  }
  0x1e   :  { %s6301_s29 = smov 0  }
  0x1f LB: > { %7571 = sst [smem:[#allocation44_spill]] %s6120_s29  ;;  %s6122_s30 = smov [#allocation11]   ;;  %s6120_s29 = sphi %s6301_s29, %s45_s29   ;;  %s6116_s28 = sphi %s6299_s28, %s7638_s28   ;;  %s6112_s3 = sphi %s6297_s3, %s7637_s3  }
  0x20   : > { %s594_s4 = sshll.u32 %s6122_s30, 4  ;;  %s7510_s0 = sadd.s32 4294967295, %s6120_s29   ;;  %s595_s4 = int_to_ptr.vmem [resolvable:$true] %s594_s4 }
  0x21   : > { %p4233_p0 = scmp.ge.s32.totalorder %s6120_s29, 1  ;;  %p570_p1 = scmp.lt.s32.totalorder %s6120_s29, 3 }
  0x22   : > { %p6318_p2 = scmp.eq.s32.totalorder %s7510_s0, 0  ;;  %s6123_s24 = smov [#allocation14]  }
  0x23   : > { %p6322_p3 = pnand %p4233_p0, %p570_p1  ;;  %s615_s6 = sshll.u32 %s6123_s24, 4  ;;  %s6328_s6 = int_to_ptr.vmem [resolvable:$true] %s615_s6 }
  0x24   : > { %s7572_s1 = scalar_select %p6318_p2, 1, 0 }
  0x25   : > { %s7573_s5 = scalar_select %p6322_p3, 1, 0 }
  0x26   : > { %p5333_p4 = pneg %p6322_p3  ;;  %s6124_s26 = smov [#allocation17]  }
  0x27   : > { %s639_s2 = sshll.u32 %s6124_s26, 4  ;;  %s7575_s23 = sld [smem:[#allocation61_spill]]  ;;  %s6336_s2 = int_to_ptr.vmem [resolvable:$true] %s639_s2 }
  0x28   : > { %p6332_p5 = pnand %p6318_p2, %p5333_p4 }
  0x2a   : > { %p6346_p7 = pneg %p6332_p5 }
  0x2d   : > { %s5614_s0 = scalar_lea.hbm %s7575_s23, 128 }
  0x2e   : > { %p5615_p6 = scmp.ne.s32.totalorder %s7575_s23, %s5614_s0  ;;  %p5621_p10 = scmp.lt.u32.totalorder %s5614_s0, %s7575_s23 }
  0x30   : > { %p5617_p8 = pnand %p6346_p7, %p5615_p6 }
  0x32   : > { %p5618_p9 = pneg %p5617_p8 }
  0x34   : > { %p5623_p11 = pnand %p5621_p10, %p5618_p9 }
  0x36   : > { %5626 = shalt.err (!%p5623_p11)
}
  0x37   : > { %s5627_s27 = scalar_lea.vmem %s595_s4, 128  ;;  %p5635_p1 = scmp.lt.s32.totalorder %s595_s4, %s595_s4 }
  0x38   : > { %p5628_p12 = scmp.ne.s32.totalorder %s595_s4, %s5627_s27  ;;  %p5636_p4 = scmp.lt.s32.totalorder %s5627_s27, %s5627_s27 }
  0x3a   : > { %p5630_p13 = pnand %p5628_p12, %p6346_p7  ;;  %p5637_p2 = por %p5636_p4, %p5635_p1 }
  0x3c   : > { %p5631_p0 = pneg %p5630_p13 }
  0x3e   : > { %p5638_p3 = pnand %p5637_p2, %p5631_p0 }
  0x40   : > { %5641 = shalt.err (!%p5638_p3)
}
  0x41   : > { %5339 = dma.hbm_to_vmem [thread:$0]  (!%p6332_p5), %s7575_s23, 128, %s595_s4, [#allocation12]  }
  0x42   : > { %s7577_s30 = sld [smem:[#allocation63_spill]] }
  0x48   : > { %s5642_s26 = scalar_lea.hbm %s7577_s30, 4096 }
  0x49   : > { %p5643_p6 = scmp.ne.s32.totalorder %s7577_s30, %s5642_s26  ;;  %p5649_p2 = scmp.lt.u32.totalorder %s5642_s26, %s7577_s30 }
  0x4b   : > { %p5645_p8 = pnand %p5643_p6, %p6346_p7 }
  0x4d   : > { %p5646_p9 = pneg %p5645_p8 }
  0x4f   : > { %p5651_p3 = pnand %p5649_p2, %p5646_p9 }
  0x51   : > { %5654 = shalt.err (!%p5651_p3)
}
  0x52   : > { %s5655_s4 = scalar_lea.vmem %s6328_s6, 4096  ;;  %p5663_p13 = scmp.lt.s32.totalorder %s6328_s6, %s6328_s6 }
  0x53   : > { %p5656_p10 = scmp.ne.s32.totalorder %s6328_s6, %s5655_s4  ;;  %p5664_p0 = scmp.lt.s32.totalorder %s5655_s4, %s5655_s4 }
  0x55   : > { %p5658_p11 = pnand %p5656_p10, %p6346_p7  ;;  %p5665_p1 = por %p5664_p0, %p5663_p13 }
  0x57   : > { %p5659_p12 = pneg %p5658_p11 }
  0x59   : > { %p5666_p4 = pnand %p5665_p1, %p5659_p12 }
  0x5b   : > { %5669 = shalt.err (!%p5666_p4)
}
  0x5c   : > { %s7520_s17 = smov 128   ;;  %s7522_s18 = smov 8  }
  0x5d   : > { %5345 = dma.hbm_to_vmem [thread:$0]  (!%p6332_p5), %s7577_s30, 4096, %s6328_s6, [#allocation15], %s7520_s17, %s7520_s17, %s7522_s18  }
  0x5e   : > { %s7578_s0 = sld [smem:[#allocation65_spill]] }
  0x64   : > { %s5670_s26 = scalar_lea.hbm %s7578_s0, 10240 }
  0x65   : > { %p5671_p6 = scmp.ne.s32.totalorder %s7578_s0, %s5670_s26  ;;  %p5677_p2 = scmp.lt.u32.totalorder %s5670_s26, %s7578_s0 }
  0x67   : > { %p5673_p8 = pnand %p5671_p6, %p6346_p7 }
  0x69   : > { %p5674_p9 = pneg %p5673_p8 }
  0x6b   : > { %p5679_p3 = pnand %p5677_p2, %p5674_p9 }
  0x6d   : > { %5682 = shalt.err (!%p5679_p3)
}
  0x6e   : > { %s5683_s6 = scalar_lea.vmem %s6336_s2, 10240  ;;  %p5691_p13 = scmp.lt.s32.totalorder %s6336_s2, %s6336_s2 }
  0x6f   : > { %p5684_p10 = scmp.ne.s32.totalorder %s6336_s2, %s5683_s6  ;;  %p5692_p0 = scmp.lt.s32.totalorder %s5683_s6, %s5683_s6 }
  0x71   : > { %p5686_p11 = pnand %p5684_p10, %p6346_p7  ;;  %p5693_p1 = por %p5692_p0, %p5691_p13 }
  0x73   : > { %p5687_p12 = pneg %p5686_p11 }
  0x75   : > { %p5694_p4 = pnand %p5693_p1, %p5687_p12 }
  0x77   : > { %5697 = shalt.err (!%p5694_p4)
}
  0x78   : > { %s7526_s20 = smov 640   ;;  %s7528_s16 = smov 40  }
  0x79   : > { %5351 = dma.hbm_to_vmem [thread:$0]  (!%p6332_p5), %s7578_s0, 10240, %s6336_s2, [#allocation18], %s7526_s20, %s7526_s20, %s7528_s16  }
  0x7a   : > { %s6129_s22 = smov [#allocation20]   ;;  %s6130_s26 = smov [#allocation23]  }
  0x7b   : > { %s666_s29 = sshll.u32 %s6129_s22, 4  ;;  %s695_s27 = sshll.u32 %s6130_s26, 4  ;;  %s667_s29 = int_to_ptr.vmem [resolvable:$true] %s666_s29  ;;  %s696_s27 = int_to_ptr.vmem [resolvable:$true] %s695_s27 }
  0x7c   : > { %s7579_s7 = sld [smem:[#allocation67_spill]] }
  0x82   : > { %s5698_s17 = scalar_lea.hbm %s7579_s7, 80 }
  0x83   : > { %p5699_p6 = scmp.ne.s32.totalorder %s7579_s7, %s5698_s17  ;;  %p5705_p2 = scmp.lt.u32.totalorder %s5698_s17, %s7579_s7 }
  0x85   : > { %p5701_p8 = pnand %p5699_p6, %p6346_p7 }
  0x87   : > { %p5702_p9 = pneg %p5701_p8 }
  0x89   : > { %p5707_p3 = pnand %p5705_p2, %p5702_p9 }
  0x8b   : > { %5710 = shalt.err (!%p5707_p3)
}
  0x8c   : > { %s5711_s2 = scalar_lea.vmem %s667_s29, 80  ;;  %s5718_s23 = scalar_lea.vmem %s667_s29, 96 }
  0x8d   : > { %p5712_p10 = scmp.ne.s32.totalorder %s667_s29, %s5711_s2  ;;  %p5719_p13 = scmp.lt.s32.totalorder %s667_s29, %s667_s29 }
  0x8e   : > { %p5720_p0 = scmp.lt.s32.totalorder %s5718_s23, %s5711_s2 }
  0x8f   : > { %p5714_p11 = pnand %p5712_p10, %p6346_p7 }
  0x90   : > { %p5721_p1 = por %p5720_p0, %p5719_p13 }
  0x91   : > { %p5715_p12 = pneg %p5714_p11 }
  0x93   : > { %p5722_p4 = pnand %p5721_p1, %p5715_p12 }
  0x95   : > { %5725 = shalt.err (!%p5722_p4)
}
  0x96   : > { %5357 = dma.hbm_to_vmem [thread:$0]  (!%p6332_p5), %s7579_s7, 80, %s667_s29, [#allocation21]  }
  0x97   : > { %s7580_s11 = sld [smem:[#allocation69_spill]] }
  0x9d   : > { %s5726_s17 = scalar_lea.hbm %s7580_s11, 10240 }
  0x9e   : > { %p5727_p6 = scmp.ne.s32.totalorder %s7580_s11, %s5726_s17  ;;  %p5733_p2 = scmp.lt.u32.totalorder %s5726_s17, %s7580_s11 }
  0xa0   : > { %p5729_p8 = pnand %p5727_p6, %p6346_p7 }
  0xa2   : > { %p5730_p9 = pneg %p5729_p8 }
  0xa4   : > { %p5735_p3 = pnand %p5733_p2, %p5730_p9 }
  0xa6   : > { %5738 = shalt.err (!%p5735_p3)
}
  0xa7   : > { %s5739_s6 = scalar_lea.vmem %s696_s27, 10240  ;;  %p5747_p13 = scmp.lt.s32.totalorder %s696_s27, %s696_s27 }
  0xa8   : > { %p5740_p10 = scmp.ne.s32.totalorder %s696_s27, %s5739_s6  ;;  %p5748_p0 = scmp.lt.s32.totalorder %s5739_s6, %s5739_s6 }
  0xaa   : > { %p5742_p11 = pnand %p5740_p10, %p6346_p7  ;;  %p5749_p1 = por %p5748_p0, %p5747_p13 }
  0xac   : > { %p5743_p12 = pneg %p5742_p11 }
  0xae   : > { %p5750_p4 = pnand %p5749_p1, %p5743_p12 }
  0xb0   : > { %5753 = shalt.err (!%p5750_p4)
}
  0xb1   : > { %5363 = dma.hbm_to_vmem [thread:$0]  (!%p6332_p5), %s7580_s11, 10240, %s696_s27, [#allocation24], %s7526_s20, %s7526_s20, %s7528_s16  }
  0xb2   : > { %s6131_s23 = smov [#allocation26]   ;;  %s7581_s13 = sld [smem:[#allocation70_spill]] }
  0xb3   : > { %s722_s30 = sshll.u32 %s6131_s23, 4  ;;  %s723_s30 = int_to_ptr.vmem [resolvable:$true] %s722_s30 }
  0xb8   : > { %s5754_s19 = scalar_lea.hbm %s7581_s13, 80 }
  0xb9   : > { %p5755_p6 = scmp.ne.s32.totalorder %s7581_s13, %s5754_s19  ;;  %p5761_p2 = scmp.lt.u32.totalorder %s5754_s19, %s7581_s13 }
  0xbb   : > { %p5757_p8 = pnand %p5755_p6, %p6346_p7 }
  0xbd   : > { %p5758_p9 = pneg %p5757_p8 }
  0xbf   : > { %p5763_p3 = pnand %p5761_p2, %p5758_p9 }
  0xc1   : > { %5766 = shalt.err (!%p5763_p3)
}
  0xc2   : > { %s5767_s27 = scalar_lea.vmem %s723_s30, 80  ;;  %s5774_s4 = scalar_lea.vmem %s723_s30, 96 }
  0xc3   : > { %p5768_p10 = scmp.ne.s32.totalorder %s723_s30, %s5767_s27  ;;  %p5775_p13 = scmp.lt.s32.totalorder %s723_s30, %s723_s30 }
  0xc4   : > { %p5776_p0 = scmp.lt.s32.totalorder %s5774_s4, %s5767_s27 }
  0xc5   : > { %p5770_p11 = pnand %p5768_p10, %p6346_p7 }
  0xc6   : > { %p5777_p1 = por %p5776_p0, %p5775_p13 }
  0xc7   : > { %p5771_p12 = pneg %p5770_p11 }
  0xc9   : > { %p5778_p4 = pnand %p5777_p1, %p5771_p12 }
  0xcb   : > { %5781 = shalt.err (!%p5778_p4)
}
  0xcc   : > { %5369 = dma.hbm_to_vmem [thread:$0]  (!%p6332_p5), %s7581_s13, 80, %s723_s30, [#allocation27]  }
  0xcd   : > { %s57_s2 = sadd.s32 1, %s6116_s28  ;;  %s6132_s23 = smov [#allocation8]  }
  0xce   : > { %p59_p6 = scmp.ge.s32.totalorder %s57_s2, 2  ;;  %s583_s18 = sshll.u32 %s6132_s23, 4  ;;  %s584_s18 = int_to_ptr.vmem [resolvable:$true] %s583_s18 }
  0xcf   : > { %s7582_s17 = sld [smem:[#allocation60_spill]] }
  0xd0   : > { %s7640_s2 = smov (%p59_p6, %s57_s2), 0 }
  0xd5   : > { %s5782_s21 = scalar_lea.hbm %s7582_s17, 128 }
  0xd6   : > { %p5783_p8 = scmp.ne.s32.totalorder %s7582_s17, %s5782_s21  ;;  %p5789_p3 = scmp.lt.u32.totalorder %s5782_s21, %s7582_s17 }
  0xd8   : > { %p5785_p9 = pnand %p5783_p8, %p6346_p7 }
  0xda   : > { %p5786_p2 = pneg %p5785_p9 }
  0xdc   : > { %p5791_p10 = pnand %p5789_p3, %p5786_p2 }
  0xde   : > { %5794 = shalt.err (!%p5791_p10)
}
  0xdf   : > { %s5795_s4 = scalar_lea.vmem %s584_s18, 128  ;;  %p5803_p0 = scmp.lt.s32.totalorder %s584_s18, %s584_s18 }
  0xe0   : > { %p5796_p11 = scmp.ne.s32.totalorder %s584_s18, %s5795_s4  ;;  %p5804_p1 = scmp.lt.s32.totalorder %s5795_s4, %s5795_s4 }
  0xe2   : > { %p5798_p12 = pnand %p5796_p11, %p6346_p7  ;;  %p5805_p4 = por %p5804_p1, %p5803_p0 }
  0xe4   : > { %p5799_p13 = pneg %p5798_p12 }
  0xe6   : > { %p5806_p6 = pnand %p5805_p4, %p5799_p13 }
  0xe8   : > { %5809 = shalt.err (!%p5806_p6)
}
  0xe9   : > { %5336 = dma.hbm_to_vmem [thread:$0]  (!%p6332_p5), %s7582_s17, 128, %s584_s18, [#allocation9]  }
  0xea   : > { %s6133_s23 = smov [#allocation13]   ;;  %s6134_s19 = smov [#allocation16]  }
  0xeb   : > { %s605_s10 = sshll.u32 %s6133_s23, 4  ;;  %s629_s21 = sshll.u32 %s6134_s19, 4  ;;  %s606_s10 = int_to_ptr.vmem [resolvable:$true] %s605_s10  ;;  %s630_s21 = int_to_ptr.vmem [resolvable:$true] %s629_s21 }
  0xec   : > { %s7583_s27 = sld [smem:[#allocation62_spill]] }
  0xf2   : > { %s5810_s30 = scalar_lea.hbm %s7583_s27, 128 }
  0xf3   : > { %p5811_p8 = scmp.ne.s32.totalorder %s7583_s27, %s5810_s30  ;;  %p5817_p3 = scmp.lt.u32.totalorder %s5810_s30, %s7583_s27 }
  0xf5   : > { %p5813_p9 = pnand %p5811_p8, %p6346_p7 }
  0xf7   : > { %p5814_p2 = pneg %p5813_p9 }
  0xf9   : > { %p5819_p10 = pnand %p5817_p3, %p5814_p2 }
  0xfb   : > { %5822 = shalt.err (!%p5819_p10)
}
  0xfc   : > { %s5823_s18 = scalar_lea.vmem %s606_s10, 128  ;;  %p5831_p0 = scmp.lt.s32.totalorder %s606_s10, %s606_s10 }
  0xfd   : > { %p5824_p11 = scmp.ne.s32.totalorder %s606_s10, %s5823_s18  ;;  %p5832_p1 = scmp.lt.s32.totalorder %s5823_s18, %s5823_s18 }
  0xff   : > { %p5826_p12 = pnand %p5824_p11, %p6346_p7  ;;  %p5833_p4 = por %p5832_p1, %p5831_p0 }
 0x101   : > { %p5827_p13 = pneg %p5826_p12 }
 0x103   : > { %p5834_p6 = pnand %p5833_p4, %p5827_p13 }
 0x105   : > { %5837 = shalt.err (!%p5834_p6)
}
 0x106   : > { %5342 = dma.hbm_to_vmem [thread:$0]  (!%p6332_p5), %s7583_s27, 128, %s606_s10, [#allocation12]  }
 0x107   : > { %s7584_s19 = sld [smem:[#allocation64_spill]] }
 0x10d   : > { %s5838_s22 = scalar_lea.hbm %s7584_s19, 128 }
 0x10e   : > { %p5839_p8 = scmp.ne.s32.totalorder %s7584_s19, %s5838_s22  ;;  %p5845_p3 = scmp.lt.u32.totalorder %s5838_s22, %s7584_s19 }
 0x110   : > { %p5841_p9 = pnand %p5839_p8, %p6346_p7 }
 0x112   : > { %p5842_p2 = pneg %p5841_p9 }
 0x114   : > { %p5847_p10 = pnand %p5845_p3, %p5842_p2 }
 0x116   : > { %5850 = shalt.err (!%p5847_p10)
}
 0x117   : > { %s5851_s18 = scalar_lea.vmem %s630_s21, 128  ;;  %p5859_p0 = scmp.lt.s32.totalorder %s630_s21, %s630_s21 }
 0x118   : > { %p5852_p11 = scmp.ne.s32.totalorder %s630_s21, %s5851_s18  ;;  %p5860_p1 = scmp.lt.s32.totalorder %s5851_s18, %s5851_s18 }
 0x11a   : > { %p5854_p12 = pnand %p5852_p11, %p6346_p7  ;;  %p5861_p4 = por %p5860_p1, %p5859_p0 }
 0x11c   : > { %p5855_p13 = pneg %p5854_p12 }
 0x11e   : > { %p5862_p6 = pnand %p5861_p4, %p5855_p13 }
 0x120   : > { %5865 = shalt.err (!%p5862_p6)
}
 0x121   : > { %5348 = dma.hbm_to_vmem [thread:$0]  (!%p6332_p5), %s7584_s19, 128, %s630_s21, [#allocation15]  }
 0x122   : > { %s6135_s29 = smov [#allocation19]   ;;  %s6136_s23 = smov [#allocation22]  }
 0x123   : > { %s652_s16 = sshll.u32 %s6135_s29, 4  ;;  %s679_s22 = sshll.u32 %s6136_s23, 4  ;;  %s653_s16 = int_to_ptr.vmem [resolvable:$true] %s652_s16  ;;  %s680_s22 = int_to_ptr.vmem [resolvable:$true] %s679_s22 }
 0x124   : > { %s7585_s4 = sld [smem:[#allocation66_spill]] }
 0x12a   : > { %s5866_s6 = scalar_lea.hbm %s7585_s4, 10240 }
 0x12b   : > { %p5867_p8 = scmp.ne.s32.totalorder %s7585_s4, %s5866_s6  ;;  %p5873_p3 = scmp.lt.u32.totalorder %s5866_s6, %s7585_s4 }
 0x12d   : > { %p5869_p9 = pnand %p5867_p8, %p6346_p7 }
 0x12f   : > { %p5870_p2 = pneg %p5869_p9 }
 0x131   : > { %p5875_p10 = pnand %p5873_p3, %p5870_p2 }
 0x133   : > { %5878 = shalt.err (!%p5875_p10)
}
 0x134   : > { %s5879_s21 = scalar_lea.vmem %s653_s16, 10240  ;;  %p5887_p0 = scmp.lt.s32.totalorder %s653_s16, %s653_s16 }
 0x135   : > { %p5880_p11 = scmp.ne.s32.totalorder %s653_s16, %s5879_s21  ;;  %p5888_p1 = scmp.lt.s32.totalorder %s5879_s21, %s5879_s21 }
 0x137   : > { %p5882_p12 = pnand %p5880_p11, %p6346_p7  ;;  %p5889_p4 = por %p5888_p1, %p5887_p0 }
 0x139   : > { %p5883_p13 = pneg %p5882_p12 }
 0x13b   : > { %p5890_p6 = pnand %p5889_p4, %p5883_p13 }
 0x13d   : > { %5893 = shalt.err (!%p5890_p6)
}
 0x13e   : > { %s7586_s0 = smov 40   ;;  %s7587_s20 = smov 640  }
 0x13f   : > { %5354 = dma.hbm_to_vmem [thread:$0]  (!%p6332_p5), %s7585_s4, 10240, %s653_s16, [#allocation18], %s7587_s20, %s7587_s20, %s7586_s0  }
 0x140   : > { %s5894_s30 = scalar_lea.hbm %s7489_s9, 2048 }
 0x141   : > { %p5895_p8 = scmp.ne.s32.totalorder %s7489_s9, %s5894_s30  ;;  %p5901_p3 = scmp.lt.u32.totalorder %s5894_s30, %s7489_s9 }
 0x143   : > { %p5897_p9 = pnand %p5895_p8, %p6346_p7 }
 0x145   : > { %p5898_p2 = pneg %p5897_p9 }
 0x147   : > { %p5903_p10 = pnand %p5901_p3, %p5898_p2 }
 0x149   : > { %5906 = shalt.err (!%p5903_p10)
}
 0x14a   : > { %s5907_s7 = scalar_lea.vmem %s680_s22, 2048  ;;  %p5915_p0 = scmp.lt.s32.totalorder %s680_s22, %s680_s22 }
 0x14b   : > { %p5908_p11 = scmp.ne.s32.totalorder %s680_s22, %s5907_s7  ;;  %p5916_p1 = scmp.lt.s32.totalorder %s5907_s7, %s5907_s7 }
 0x14d   : > { %p5910_p12 = pnand %p5908_p11, %p6346_p7  ;;  %p5917_p4 = por %p5916_p1, %p5915_p0 }
 0x14f   : > { %p5911_p13 = pneg %p5910_p12 }
 0x151   : > { %p5918_p6 = pnand %p5917_p4, %p5911_p13 }
 0x153   : > { %5921 = shalt.err (!%p5918_p6)
}
 0x154   : > { %s7588_s16 = smov 8   ;;  %s7589_s29 = smov 128  }
 0x155   : > { %5360 = dma.hbm_to_vmem [thread:$0]  (!%p6332_p5), %s7489_s9, 2048, %s680_s22, [#allocation21], %s7589_s29, %s7589_s29, %s7588_s16  }
 0x156   : > { %s6137_s30 = smov [#allocation25]   ;;  %s6138_s18 = smov [#allocation28]  }
 0x157   : > { %s708_s6 = sshll.u32 %s6137_s30, 4  ;;  %s732_s10 = sshll.u32 %s6138_s18, 4  ;;  %s709_s6 = int_to_ptr.vmem [resolvable:$true] %s708_s6  ;;  %s733_s10 = int_to_ptr.vmem [resolvable:$true] %s732_s10 }
 0x158   : > { %s5922_s4 = scalar_lea.hbm %s7492_s12, 10240 }
 0x159   : > { %p5923_p8 = scmp.ne.s32.totalorder %s7492_s12, %s5922_s4  ;;  %p5929_p3 = scmp.lt.u32.totalorder %s5922_s4, %s7492_s12 }
 0x15b   : > { %p5925_p9 = pnand %p5923_p8, %p6346_p7 }
 0x15d   : > { %p5926_p2 = pneg %p5925_p9 }
 0x15f   : > { %p5931_p10 = pnand %p5929_p3, %p5926_p2 }
 0x161   : > { %5934 = shalt.err (!%p5931_p10)
}
 0x162   : > { %s5935_s22 = scalar_lea.vmem %s709_s6, 10240  ;;  %p5943_p0 = scmp.lt.s32.totalorder %s709_s6, %s709_s6 }
 0x163   : > { %p5936_p11 = scmp.ne.s32.totalorder %s709_s6, %s5935_s22  ;;  %p5944_p1 = scmp.lt.s32.totalorder %s5935_s22, %s5935_s22 }
 0x165   : > { %p5938_p12 = pnand %p5936_p11, %p6346_p7  ;;  %p5945_p4 = por %p5944_p1, %p5943_p0 }
 0x167   : > { %p5939_p13 = pneg %p5938_p12 }
 0x169   : > { %p5946_p6 = pnand %p5945_p4, %p5939_p13 }
 0x16b   : > { %5949 = shalt.err (!%p5946_p6)
}
 0x16c   : > { %5366 = dma.hbm_to_vmem [thread:$0]  (!%p6332_p5), %s7492_s12, 10240, %s709_s6, [#allocation24], %s7587_s20, %s7587_s20, %s7586_s0  }
 0x16d   : > { %s5950_s26 = scalar_lea.hbm %s7494_s14, 2048 }
 0x16e   : > { %p5951_p8 = scmp.ne.s32.totalorder %s7494_s14, %s5950_s26  ;;  %p5957_p3 = scmp.lt.u32.totalorder %s5950_s26, %s7494_s14 }
 0x170   : > { %p5953_p9 = pnand %p5951_p8, %p6346_p7 }
 0x172   : > { %p5954_p2 = pneg %p5953_p9 }
 0x174   : > { %p5959_p10 = pnand %p5957_p3, %p5954_p2 }
 0x176   : > { %5962 = shalt.err (!%p5959_p10)
}
 0x177   : > { %s5963_s23 = scalar_lea.vmem %s733_s10, 2048  ;;  %p5971_p0 = scmp.lt.s32.totalorder %s733_s10, %s733_s10 }
 0x178   : > { %p5964_p11 = scmp.ne.s32.totalorder %s733_s10, %s5963_s23  ;;  %p5972_p1 = scmp.lt.s32.totalorder %s5963_s23, %s5963_s23 }
 0x17a   : > { %p5966_p12 = pnand %p5964_p11, %p6346_p7  ;;  %p5973_p4 = por %p5972_p1, %p5971_p0 }
 0x17c   : > { %p5967_p13 = pneg %p5966_p12 }
 0x17e   : > { %p5974_p6 = pnand %p5973_p4, %p5967_p13 }
 0x180   : > { %5977 = shalt.err (!%p5974_p6)
}
 0x181   : > { %5372 = dma.hbm_to_vmem [thread:$0]  (!%p6332_p5), %s7494_s14, 2048, %s733_s10, [#allocation27], %s7589_s29, %s7589_s29, %s7588_s16  }
 0x182   : > { %s6139_s6 = smov [#allocation29]   ;;  %s5978_s17 = scalar_lea.hbm %s7495_s15, 2048 }
 0x183   : > { %s745_s22 = sshll.u32 %s6139_s6, 4  ;;  %p5979_p8 = scmp.ne.s32.totalorder %s7495_s15, %s5978_s17  ;;  %s746_s22 = int_to_ptr.vmem [resolvable:$true] %s745_s22 }
 0x184   : > { %p5985_p3 = scmp.lt.u32.totalorder %s5978_s17, %s7495_s15 }
 0x185   : > { %p5981_p9 = pnand %p5979_p8, %p6346_p7 }
 0x187   : > { %p5982_p2 = pneg %p5981_p9 }
 0x189   : > { %p5987_p10 = pnand %p5985_p3, %p5982_p2 }
 0x18b   : > { %5990 = shalt.err (!%p5987_p10)
}
 0x18c   : > { %s5991_s10 = scalar_lea.vmem %s746_s22, 2048  ;;  %p5999_p0 = scmp.lt.s32.totalorder %s746_s22, %s746_s22 }
 0x18d   : > { %p5992_p11 = scmp.ne.s32.totalorder %s746_s22, %s5991_s10  ;;  %p6000_p1 = scmp.lt.s32.totalorder %s5991_s10, %s5991_s10 }
 0x18f   : > { %p5994_p12 = pnand %p5992_p11, %p6346_p7  ;;  %p6001_p4 = por %p6000_p1, %p5999_p0 }
 0x191   : > { %p5995_p13 = pneg %p5994_p12 }
 0x193   : > { %p6002_p6 = pnand %p6001_p4, %p5995_p13 }
 0x195   : > { %6005 = shalt.err (!%p6002_p6)
}
 0x196   : > { %5375 = dma.hbm_to_vmem [thread:$0]  (!%p6332_p5), %s7495_s15, 2048, %s746_s22, [#allocation30], %s7589_s29, %s7589_s29, %s7588_s16  }
 0x197   : > { %p7590_p8 = scmp.ne.s32.totalorder %s7573_s5, 0 }
 0x198   : > { %p7591_p7 = scmp.ne.s32.totalorder (!%p7590_p8), %s7572_s1, 0 }
 0x199   : > { %791 = sbr.rel (%p7590_p8) target bundleno = 3912 (0xf48), region = 104 }
 0x1a0   : > { %6071 = dma.done.wait (%p7591_p7), [#allocation9], 128  }
 0x1a1   : > { %6073 = vsyncadd (%p7591_p7), [#allocation9], 4294967168 }
 0x1a2   : > { %6075 = dma.done.wait (%p7591_p7), [#allocation12], 256  }
 0x1a3   : > { %6077 = vsyncadd (%p7591_p7), [#allocation12], 4294967040 }
 0x1a4   : > { %6079 = dma.done.wait (%p7591_p7), [#allocation15], 4224  }
 0x1a5   : > { %6081 = vsyncadd (%p7591_p7), [#allocation15], 4294963072 }
 0x1a6   : > { %6083 = dma.done.wait (%p7591_p7), [#allocation18], 20480  }
 0x1a7   : > { %6085 = vsyncadd (%p7591_p7), [#allocation18], 4294946816 }
 0x1a8   : > { %6087 = dma.done.wait (%p7591_p7), [#allocation21], 2128  }
 0x1a9   : > { %6089 = vsyncadd (%p7591_p7), [#allocation21], 4294965168 }
 0x1aa   : > { %6091 = dma.done.wait (%p7591_p7), [#allocation24], 20480  }
 0x1ab   : > { %6093 = vsyncadd (%p7591_p7), [#allocation24], 4294946816 }
 0x1ac   : > { %6095 = dma.done.wait (%p7591_p7), [#allocation27], 2128  }
 0x1ad   : > { %6097 = vsyncadd (%p7591_p7), [#allocation27], 4294965168 }
 0x1ae   : > { %6099 = dma.done.wait (%p7591_p7), [#allocation30], 2048  }
 0x1af   : > { %6101 = vsyncadd (%p7591_p7), [#allocation30], 4294965248  ;;  %p928_p5 = scmp.eq.s32.totalorder %s6112_s3, 0 }
 0x1b1   : > { %933 = sbr.rel (!%p928_p5) target bundleno = 2825 (0xb09), region = 164 }
 0x1b8   : > { %v1050_v0 = vld [vmem:[#allocation19 + $0x8] sm:$0xff]  ;;  %v1055_v1 = vld [vmem:[#allocation19 + $0x30] sm:$0xff]  ;;  %v1052_v2 = vld [vmem:[#allocation19 + $0x18] sm:$0xff]  ;;  %vm3467_vm0 = vcmask 7168   ;;  %v7533_v7 = vmov 0.0   ;;  %vm6143_vm1 = vmmov 0  }
 0x1b9   : > { %v4789_v3 = vpack.c.bf16 %v1055_v1, %v1050_v0  ;;  %v1057_v4 = vld [vmem:[#allocation19 + $0x40] sm:$0xff]  ;;  %v1054_v6 = vld [vmem:[#allocation19 + $0x28] sm:$0xff]  ;;  %1227 = vmatprep.mubr.f32.mxu0 %v7533_v7  ;;  %3469 = vst.msk [vmem:[#allocation6] sm:$0xff] %vm3467_vm0, %v7533_v7  ;;  %1298 = vmatprep.mubr.f32.mxu1 %v7533_v7  ;;  %v1051_v10 = vld [vmem:[#allocation19 + $0x10] sm:$0xff]  ;;  %v6141_v13 = vmov -1e+30  }
 0x1ba   : > { %v1049_v5 = vld [vmem:[#allocation19] sm:$0xff]  ;;  %v4821_v8 = vpack.c.bf16 %v1057_v4, %v1052_v2  ;;  %v1056_v11 = vld [vmem:[#allocation19 + $0x38] sm:$0xff]  ;;  %3468 = vst.msk [vmem:[#allocation5] sm:$0xff] %vm3467_vm0, %v6141_v13  ;;  %v1062_v16 = vld [vmem:[#allocation19 + $0x68] sm:$0xff]  ;;  %s7592_s17 = sld [smem:[#allocation68_spill]]  ;;  %vm2031_vm2 = vcmask 130112  }
 0x1bb   : > { %v4791_v9 = vpack.c.bf16 %v1054_v6, %v1049_v5  ;;  %v1060_v12 = vld [vmem:[#allocation19 + $0x58] sm:$0xff]  ;;  %4790 = vmatprep.subr.bf16.mxu0 %v4789_v3  ;;  %v4823_v14 = vpack.c.bf16 %v1056_v11, %v1051_v10  ;;  %v1065_v15 = vld [vmem:[#allocation19 + $0x80] sm:$0xff]  ;;  %v1067_v17 = vld [vmem:[#allocation19 + $0x90] sm:$0xff]  ;;  %vm2038_vm3 = vcmask 195712   ;;  %vm2045_vm4 = vcmask 261312   ;;  %s7625_s30 = sld [smem:[#allocation74_spill]] }
 0x1bc   : > { %4822 = vmatprep.subr.bf16.mxu1 %v4821_v8  ;;  %v4793_v18 = vpack.c.bf16 %v1065_v15, %v1060_v12  ;;  %v4825_v19 = vpack.c.bf16 %v1067_v17, %v1062_v16  ;;  %v1059_v20 = vld [vmem:[#allocation19 + $0x50] sm:$0xff]  ;;  %v1064_v21 = vld [vmem:[#allocation19 + $0x78] sm:$0xff]  ;;  %v1061_v22 = vld [vmem:[#allocation19 + $0x60] sm:$0xff]  ;;  %vm2180_vm5 = vcmask 1041409   ;;  %vm2182_vm6 = vcmask 1042434   ;;  %s7626_s20 = sld [smem:[#allocation71_spill]] }
 0x1bd   : > { %4792 = vmatpush1.bf16.msra.mxu0 %v4791_v9  ;;  %4824 = vmatpush1.bf16.msra.mxu1 %v4823_v14  ;;  %v4795_v23 = vpack.c.bf16 %v1064_v21, %v1059_v20  ;;  %v1066_v24 = vld [vmem:[#allocation19 + $0x88] sm:$0xff]  ;;  %v1075_v26 = vld [vmem:[#allocation19 + $0xd0] sm:$0xff]  ;;  %v1072_v29 = vld [vmem:[#allocation19 + $0xb8] sm:$0xff]  ;;  %vm2184_vm7 = vcmask 1043459   ;;  %vm2186_vm8 = vcmask 1044484   ;;  %vm2188_vm9 = vcmask 1045509  }
 0x1be   : > { %v1070_v25 = vld [vmem:[#allocation19 + $0xa8] sm:$0xff]  ;;  %4794 = vmatprep.subr.bf16.mxu0 %v4793_v18  ;;  %4826 = vmatprep.subr.bf16.mxu1 %v4825_v19  ;;  %v4827_v27 = vpack.c.bf16 %v1066_v24, %v1061_v22  ;;  %v1077_v30 = vld [vmem:[#allocation19 + $0xe0] sm:$0xff]  ;;  %v1071_v34 = vld [vmem:[#allocation19 + $0xb0] sm:$0xff]  ;;  %vm2190_vm10 = vcmask 1046534   ;;  %vm2192_vm11 = vcmask 1047559   ;;  %vm2196_vm13 = vcmask 261120  }
 0x1bf   : > { %v4797_v28 = vpack.c.bf16 %v1075_v26, %v1070_v25  ;;  %v1069_v31 = vld [vmem:[#allocation19 + $0xa0] sm:$0xff]  ;;  %v4829_v32 = vpack.c.bf16 %v1077_v30, %v1072_v29  ;;  %v1074_v33 = vld [vmem:[#allocation19 + $0xc8] sm:$0xff]  ;;  %v1076_v35 = vld [vmem:[#allocation19 + $0xd8] sm:$0xff]  ;;  %s7627_s11 = sld [smem:[#allocation75_spill]]  ;;  %vm3454_vm14 = vcmask 15360  }
 0x1c0   : > { %v4799_v36 = vpack.c.bf16 %v1074_v33, %v1069_v31  ;;  %v1080_v37 = vld [vmem:[#allocation19 + $0xf8] sm:$0xff]  ;;  %v1085_v38 = vld [vmem:[#allocation19 + $0x120] sm:$0xff]  ;;  %v1082_v39 = vld [vmem:[#allocation19 + $0x108] sm:$0xff]  ;;  %v4831_v40 = vpack.c.bf16 %v1076_v35, %v1071_v34 }
 0x1c1   : > { %4796 = vmatpush1.bf16.msra.mxu0 %v4795_v23  ;;  %4828 = vmatpush1.bf16.msra.mxu1 %v4827_v27  ;;  %v4801_v41 = vpack.c.bf16 %v1085_v38, %v1080_v37  ;;  %v1087_v42 = vld [vmem:[#allocation19 + $0x130] sm:$0xff]  ;;  %v1084_v44 = vld [vmem:[#allocation19 + $0x118] sm:$0xff]  ;;  %v1081_v46 = vld [vmem:[#allocation19 + $0x100] sm:$0xff] }
 0x1c2   : > { %4798 = vmatprep.subr.bf16.mxu0 %v4797_v28  ;;  %v1079_v43 = vld [vmem:[#allocation19 + $0xf0] sm:$0xff]  ;;  %4830 = vmatprep.subr.bf16.mxu1 %v4829_v32  ;;  %v4833_v45 = vpack.c.bf16 %v1087_v42, %v1082_v39  ;;  %v1086_v47 = vld [vmem:[#allocation19 + $0x128] sm:$0xff]  ;;  %v1092_v50 = vld [vmem:[#allocation19 + $0x158] sm:$0xff] }
 0x1c3   : > { %v1090_v48 = vld [vmem:[#allocation19 + $0x148] sm:$0xff]  ;;  %v1095_v49 = vld [vmem:[#allocation19 + $0x170] sm:$0xff]  ;;  %v1097_v51 = vld [vmem:[#allocation19 + $0x180] sm:$0xff]  ;;  %v4803_v52 = vpack.c.bf16 %v1084_v44, %v1079_v43  ;;  %v4835_v53 = vpack.c.bf16 %v1086_v47, %v1081_v46  ;;  %v7535_v46 = vmov 0.0|0.0  }
 0x1c4   : > { %v4805_v54 = vpack.c.bf16 %v1095_v49, %v1090_v48  ;;  %v1089_v55 = vld [vmem:[#allocation19 + $0x140] sm:$0xff]  ;;  %v1094_v56 = vld [vmem:[#allocation19 + $0x168] sm:$0xff]  ;;  %v1091_v57 = vld [vmem:[#allocation19 + $0x150] sm:$0xff]  ;;  %v4837_v58 = vpack.c.bf16 %v1097_v51, %v1092_v50 }
 0x1c5   : > { %4800 = vmatpush1.bf16.msra.mxu0 %v4799_v36  ;;  %4832 = vmatpush1.bf16.msra.mxu1 %v4831_v40  ;;  %v1096_v59 = vld [vmem:[#allocation19 + $0x178] sm:$0xff]  ;;  %v1105_v61 = vld [vmem:[#allocation19 + $0x1c0] sm:$0xff]  ;;  %v1102_v62 = vld [vmem:[#allocation19 + $0x1a8] sm:$0xff]  ;;  %v4807_v0 = vpack.c.bf16 %v1094_v56, %v1089_v55 }
 0x1c6   : > { %4802 = vmatprep.subr.bf16.mxu0 %v4801_v41  ;;  %4834 = vmatprep.subr.bf16.mxu1 %v4833_v45  ;;  %v1100_v60 = vld [vmem:[#allocation19 + $0x198] sm:$0xff]  ;;  %v1107_v63 = vld [vmem:[#allocation19 + $0x1d0] sm:$0xff]  ;;  %v4839_v1 = vpack.c.bf16 %v1096_v59, %v1091_v57  ;;  %v1101_v5 = vld [vmem:[#allocation19 + $0x1a0] sm:$0xff] }
 0x1c7   : > { %v4809_v2 = vpack.c.bf16 %v1105_v61, %v1100_v60  ;;  %v1099_v3 = vld [vmem:[#allocation19 + $0x190] sm:$0xff]  ;;  %v1104_v4 = vld [vmem:[#allocation19 + $0x1b8] sm:$0xff]  ;;  %v4841_v6 = vpack.c.bf16 %v1107_v63, %v1102_v62  ;;  %v1106_v8 = vld [vmem:[#allocation19 + $0x1c8] sm:$0xff] }
 0x1c8   : > { %v1110_v9 = vld [vmem:[#allocation19 + $0x1e8] sm:$0xff]  ;;  %v1115_v10 = vld [vmem:[#allocation19 + $0x210] sm:$0xff]  ;;  %v1112_v11 = vld [vmem:[#allocation19 + $0x1f8] sm:$0xff]  ;;  %v4811_v13 = vpack.c.bf16 %v1104_v4, %v1099_v3  ;;  %v4843_v14 = vpack.c.bf16 %v1106_v8, %v1101_v5 }
 0x1c9   : > { %4804 = vmatpush1.bf16.msra.mxu0 %v4803_v52  ;;  %4836 = vmatpush1.bf16.msra.mxu1 %v4835_v53  ;;  %v1117_v12 = vld [vmem:[#allocation19 + $0x220] sm:$0xff]  ;;  %v4813_v15 = vpack.c.bf16 %v1115_v10, %v1110_v9  ;;  %v1114_v17 = vld [vmem:[#allocation19 + $0x208] sm:$0xff]  ;;  %v1111_v18 = vld [vmem:[#allocation19 + $0x1f0] sm:$0xff] }
 0x1ca   : > { %4806 = vmatprep.subr.bf16.mxu0 %v4805_v54  ;;  %4838 = vmatprep.subr.bf16.mxu1 %v4837_v58  ;;  %v1109_v16 = vld [vmem:[#allocation19 + $0x1e0] sm:$0xff]  ;;  %v4845_v19 = vpack.c.bf16 %v1117_v12, %v1112_v11  ;;  %v1116_v20 = vld [vmem:[#allocation19 + $0x218] sm:$0xff]  ;;  %v1122_v23 = vld [vmem:[#allocation19 + $0x248] sm:$0xff] }
 0x1cb   : > { %v1120_v21 = vld [vmem:[#allocation19 + $0x238] sm:$0xff]  ;;  %v1125_v22 = vld [vmem:[#allocation19 + $0x260] sm:$0xff]  ;;  %v1127_v24 = vld [vmem:[#allocation19 + $0x270] sm:$0xff]  ;;  %v4815_v25 = vpack.c.bf16 %v1114_v17, %v1109_v16  ;;  %v4847_v26 = vpack.c.bf16 %v1116_v20, %v1111_v18 }
 0x1cc   : > { %v4817_v27 = vpack.c.bf16 %v1125_v22, %v1120_v21  ;;  %v1119_v28 = vld [vmem:[#allocation19 + $0x230] sm:$0xff]  ;;  %v1124_v29 = vld [vmem:[#allocation19 + $0x258] sm:$0xff]  ;;  %v4849_v30 = vpack.c.bf16 %v1127_v24, %v1122_v23  ;;  %v1121_v31 = vld [vmem:[#allocation19 + $0x240] sm:$0xff] }
 0x1cd   : > { %4808 = vmatpush1.bf16.msra.mxu0 %v4807_v0  ;;  %4840 = vmatpush1.bf16.msra.mxu1 %v4839_v1  ;;  %v1126_v32 = vld [vmem:[#allocation19 + $0x268] sm:$0xff]  ;;  %v972_v33 = vld [vmem:[#allocation17 + $0x18] sm:$0xff]  ;;  %v977_v34 = vld [vmem:[#allocation17 + $0x40] sm:$0xff]  ;;  %v4819_v35 = vpack.c.bf16 %v1124_v29, %v1119_v28 }
 0x1ce   : > { %4810 = vmatprep.subr.bf16.mxu0 %v4809_v2  ;;  %4842 = vmatprep.subr.bf16.mxu1 %v4841_v6  ;;  %v4851_v36 = vpack.c.bf16 %v1126_v32, %v1121_v31  ;;  %v1053_v37 = vld [vmem:[#allocation19 + $0x20] sm:$0xff]  ;;  %v1058_v38 = vld [vmem:[#allocation19 + $0x48] sm:$0xff]  ;;  %v4909_v39 = vpack.c.bf16 %v977_v34, %v972_v33  ;;  %v971_v40 = vld [vmem:[#allocation17 + $0x10] sm:$0xff] }
 0x1cf   : > { %v976_v41 = vld [vmem:[#allocation17 + $0x38] sm:$0xff]  ;;  %v982_v42 = vld [vmem:[#allocation17 + $0x68] sm:$0xff]  ;;  %v987_v43 = vld [vmem:[#allocation17 + $0x90] sm:$0xff]  ;;  %v4854_v45 = vpack.c.bf16 %v1058_v38, %v1053_v37 }
 0x1d0   : > { %v6671_v44 = vld [vmem:[#allocation8] sm:$0xff]  ;;  %v4911_v47 = vpack.c.bf16 %v976_v41, %v971_v40  ;;  %v1063_v48 = vld [vmem:[#allocation19 + $0x70] sm:$0xff]  ;;  %v1068_v49 = vld [vmem:[#allocation19 + $0x98] sm:$0xff]  ;;  %v4913_v50 = vpack.c.bf16 %v987_v43, %v982_v42 }
 0x1d1   : > { %4812 = vmatpush1.bf16.msra.mxu0 %v4811_v13  ;;  %4844 = vmatpush1.bf16.msra.mxu1 %v4843_v14  ;;  %v981_v51 = vld [vmem:[#allocation17 + $0x60] sm:$0xff]  ;;  %v986_v52 = vld [vmem:[#allocation17 + $0x88] sm:$0xff]  ;;  %v992_v53 = vld [vmem:[#allocation17 + $0xb8] sm:$0xff]  ;;  %v4857_v55 = vpack.c.bf16 %v1068_v49, %v1063_v48 }
 0x1d2   : > { %4814 = vmatprep.subr.bf16.mxu0 %v4813_v15  ;;  %4846 = vmatprep.subr.bf16.mxu1 %v4845_v19  ;;  %v997_v54 = vld [vmem:[#allocation17 + $0xe0] sm:$0xff]  ;;  %v4915_v56 = vpack.c.bf16 %v986_v52, %v981_v51  ;;  %v1078_v58 = vld [vmem:[#allocation19 + $0xe8] sm:$0xff]  ;;  %v991_v60 = vld [vmem:[#allocation17 + $0xb0] sm:$0xff] }
 0x1d3   : > { %v1073_v57 = vld [vmem:[#allocation19 + $0xc0] sm:$0xff]  ;;  %v4917_v59 = vpack.c.bf16 %v997_v54, %v992_v53  ;;  %v996_v61 = vld [vmem:[#allocation17 + $0xd8] sm:$0xff]  ;;  %v1002_v62 = vld [vmem:[#allocation17 + $0x108] sm:$0xff] }
 0x1d4   : > { %v1007_v63 = vld [vmem:[#allocation17 + $0x130] sm:$0xff]  ;;  %v4860_v0 = vpack.c.bf16 %v1078_v58, %v1073_v57  ;;  %v4919_v1 = vpack.c.bf16 %v996_v61, %v991_v60  ;;  %v1088_v3 = vld [vmem:[#allocation19 + $0x138] sm:$0xff]  ;;  %v1001_v5 = vld [vmem:[#allocation17 + $0x100] sm:$0xff] }
 0x1d5   : > { %4816 = vmatpush1.bf16.msra.mxu0 %v4815_v25  ;;  %4848 = vmatpush1.bf16.msra.mxu1 %v4847_v26  ;;  %v1083_v2 = vld [vmem:[#allocation19 + $0x110] sm:$0xff]  ;;  %v4921_v4 = vpack.c.bf16 %v1007_v63, %v1002_v62  ;;  %v1006_v6 = vld [vmem:[#allocation17 + $0x128] sm:$0xff]  ;;  %v1012_v8 = vld [vmem:[#allocation17 + $0x158] sm:$0xff] }
 0x1d6   : > { %4818 = vmatprep.subr.bf16.mxu0 %v4817_v27  ;;  %4850 = vmatprep.subr.bf16.mxu1 %v4849_v30  ;;  %v1017_v9 = vld [vmem:[#allocation17 + $0x180] sm:$0xff]  ;;  %v4863_v10 = vpack.c.bf16 %v1088_v3, %v1083_v2  ;;  %v4923_v11 = vpack.c.bf16 %v1006_v6, %v1001_v5  ;;  %v1098_v13 = vld [vmem:[#allocation19 + $0x188] sm:$0xff]  ;;  %v1011_v15 = vld [vmem:[#allocation17 + $0x150] sm:$0xff] }
 0x1d7   : > { %v1093_v12 = vld [vmem:[#allocation19 + $0x160] sm:$0xff]  ;;  %v4925_v14 = vpack.c.bf16 %v1017_v9, %v1012_v8  ;;  %v1016_v16 = vld [vmem:[#allocation17 + $0x178] sm:$0xff]  ;;  %v1022_v17 = vld [vmem:[#allocation17 + $0x1a8] sm:$0xff] }
 0x1d8   : > { %v1027_v18 = vld [vmem:[#allocation17 + $0x1d0] sm:$0xff]  ;;  %v4866_v19 = vpack.c.bf16 %v1098_v13, %v1093_v12  ;;  %v4927_v20 = vpack.c.bf16 %v1016_v16, %v1011_v15  ;;  %v1108_v22 = vld [vmem:[#allocation19 + $0x1d8] sm:$0xff]  ;;  %v1021_v24 = vld [vmem:[#allocation17 + $0x1a0] sm:$0xff] }
 0x1d9   : > { %4820 = vmatpush1.bf16.msra.mxu0 %v4819_v35  ;;  %4852 = vmatpush1.bf16.msra.mxu1 %v4851_v36  ;;  %v1103_v21 = vld [vmem:[#allocation19 + $0x1b0] sm:$0xff]  ;;  %v4929_v23 = vpack.c.bf16 %v1027_v18, %v1022_v17  ;;  %v1026_v25 = vld [vmem:[#allocation17 + $0x1c8] sm:$0xff]  ;;  %v1032_v26 = vld [vmem:[#allocation17 + $0x1f8] sm:$0xff] }
 0x1da   : > { %4853 = vmatprep.subr.bf16.mxu0 %v7535_v46  ;;  %4910 = vmatprep.subr.bf16.mxu1 %v4909_v39  ;;  %v1037_v27 = vld [vmem:[#allocation17 + $0x220] sm:$0xff]  ;;  %v4869_v28 = vpack.c.bf16 %v1108_v22, %v1103_v21  ;;  %v4931_v29 = vpack.c.bf16 %v1026_v25, %v1021_v24  ;;  %v1118_v31 = vld [vmem:[#allocation19 + $0x228] sm:$0xff]  ;;  %v1031_v33 = vld [vmem:[#allocation17 + $0x1f0] sm:$0xff] }
 0x1db   : > { %v1113_v30 = vld [vmem:[#allocation19 + $0x200] sm:$0xff]  ;;  %v4933_v32 = vpack.c.bf16 %v1037_v27, %v1032_v26  ;;  %v1036_v34 = vld [vmem:[#allocation17 + $0x218] sm:$0xff]  ;;  %v1042_v35 = vld [vmem:[#allocation17 + $0x248] sm:$0xff] }
 0x1dc   : > { %1228 = vmatmul.mubr.f32.vlgmr.msra.gmra.mrb[0].mxu0 %v6671_v44  ;;  %1299 = vmatmul.mubr.f32.vlgmr.msra.gmra.mrb[0].mxu1 %v6671_v44  ;;  %v1047_v36 = vld [vmem:[#allocation17 + $0x270] sm:$0xff]  ;;  %v4872_v37 = vpack.c.bf16 %v1118_v31, %v1113_v30  ;;  %v4935_v38 = vpack.c.bf16 %v1036_v34, %v1031_v33  ;;  %v1128_v40 = vld [vmem:[#allocation19 + $0x278] sm:$0xff]  ;;  %v1041_v41 = vld [vmem:[#allocation17 + $0x240] sm:$0xff] }
 0x1dd   : > { %4855 = vmatpush3.bf16.msra.mxu0 %v4854_v45  ;;  %4912 = vmatpush1.bf16.msra.mxu1 %v4911_v47  ;;  %v1123_v39 = vld [vmem:[#allocation19 + $0x250] sm:$0xff]  ;;  %v4937_v42 = vpack.c.bf16 %v1047_v36, %v1042_v35  ;;  %v1046_v43 = vld [vmem:[#allocation17 + $0x268] sm:$0xff]  ;;  %v969_v51 = vld [vmem:[#allocation17] sm:$0xff] }
 0x1de   : > { %4856 = vmatprep.subr.bf16.mxu0 %v7535_v46  ;;  %4914 = vmatprep.subr.bf16.mxu1 %v4913_v50  ;;  %v970_v45 = vld [vmem:[#allocation17 + $0x8] sm:$0xff]  ;;  %v975_v47 = vld [vmem:[#allocation17 + $0x30] sm:$0xff]  ;;  %v4875_v48 = vpack.c.bf16 %v1128_v40, %v1123_v39  ;;  %v4939_v49 = vpack.c.bf16 %v1046_v43, %v1041_v41  ;;  %v973_v53 = vld [vmem:[#allocation17 + $0x20] sm:$0xff] }
 0x1df   : > { %4486 = vmatprep.mubr.msk.f32.mxu0 %vm6143_vm1, %v7533_v7  ;;  %1510 = vmatprep.mubr.f32.mxu1 %v7533_v7  ;;  %v4877_v50 = vpack.c.bf16 %v975_v47, %v970_v45  ;;  %v974_v52 = vld [vmem:[#allocation17 + $0x28] sm:$0xff]  ;;  %v979_v61 = vld [vmem:[#allocation17 + $0x50] sm:$0xff]  ;;  %v984_v62 = vld [vmem:[#allocation17 + $0x78] sm:$0xff] }
 0x1e0   : > { %v978_v54 = vld [vmem:[#allocation17 + $0x48] sm:$0xff]  ;;  %v4879_v57 = vpack.c.bf16 %v974_v52, %v969_v51  ;;  %v983_v63 = vld [vmem:[#allocation17 + $0x70] sm:$0xff]  ;;  %v4883_v3 = vpack.c.bf16 %v984_v62, %v979_v61  ;;  %v989_v6 = vld [vmem:[#allocation17 + $0xa0] sm:$0xff] }
 0x1e1   : > { %4858 = vmatpush3.bf16.msra.mxu0 %v4857_v55  ;;  %4916 = vmatpush1.bf16.msra.mxu1 %v4915_v56  ;;  %v980_v55 = vld [vmem:[#allocation17 + $0x58] sm:$0xff]  ;;  %v985_v56 = vld [vmem:[#allocation17 + $0x80] sm:$0xff]  ;;  %v6686_v58 = vld [vmem:[#allocation11] sm:$0xff] }
 0x1e2   : > { %4859 = vmatprep.subr.bf16.mxu0 %v7535_v46  ;;  %4918 = vmatprep.subr.bf16.mxu1 %v4917_v59  ;;  %v4942_v59 = vpack.c.bf16 %v978_v54, %v973_v53  ;;  %v4881_v60 = vpack.c.bf16 %v985_v56, %v980_v55  ;;  %v995_v2 = vld [vmem:[#allocation17 + $0xd0] sm:$0xff]  ;;  %v994_v8 = vld [vmem:[#allocation17 + $0xc8] sm:$0xff]  ;;  %v993_v9 = vld [vmem:[#allocation17 + $0xc0] sm:$0xff] }
 0x1e3   : > { %v1005_v12 = vld [vmem:[#allocation17 + $0x120] sm:$0xff]  ;;  %v4887_v13 = vpack.c.bf16 %v994_v8, %v989_v6  ;;  %v999_v16 = vld [vmem:[#allocation17 + $0xf0] sm:$0xff]  ;;  %v1004_v17 = vld [vmem:[#allocation17 + $0x118] sm:$0xff] }
 0x1e4   : > { %v1003_v18 = vld [vmem:[#allocation17 + $0x110] sm:$0xff]  ;;  %v4891_v22 = vpack.c.bf16 %v1004_v17, %v999_v16  ;;  %v1009_v25 = vld [vmem:[#allocation17 + $0x140] sm:$0xff]  ;;  %v1014_v26 = vld [vmem:[#allocation17 + $0x168] sm:$0xff] }
 0x1e5   : > { %4861 = vmatpush3.bf16.msra.mxu0 %v4860_v0  ;;  %4920 = vmatpush1.bf16.msra.mxu1 %v4919_v1  ;;  %v988_v0 = vld [vmem:[#allocation17 + $0x98] sm:$0xff]  ;;  %v990_v1 = vld [vmem:[#allocation17 + $0xa8] sm:$0xff]  ;;  %v1015_v21 = vld [vmem:[#allocation17 + $0x170] sm:$0xff]  ;;  %v4895_v31 = vpack.c.bf16 %v1014_v26, %v1009_v25 }
 0x1e6   : > { %4862 = vmatprep.subr.bf16.mxu0 %v7535_v46  ;;  %4922 = vmatprep.subr.bf16.mxu1 %v4921_v4  ;;  %v4945_v4 = vpack.c.bf16 %v988_v0, %v983_v63  ;;  %v4885_v5 = vpack.c.bf16 %v995_v2, %v990_v1  ;;  %v1013_v27 = vld [vmem:[#allocation17 + $0x160] sm:$0xff]  ;;  %v1019_v34 = vld [vmem:[#allocation17 + $0x190] sm:$0xff]  ;;  %v1024_v35 = vld [vmem:[#allocation17 + $0x1b8] sm:$0xff] }
 0x1e7   : > { %v1025_v30 = vld [vmem:[#allocation17 + $0x1c0] sm:$0xff]  ;;  %v1023_v36 = vld [vmem:[#allocation17 + $0x1b0] sm:$0xff]  ;;  %v4899_v40 = vpack.c.bf16 %v1024_v35, %v1019_v34  ;;  %v1034_v45 = vld [vmem:[#allocation17 + $0x208] sm:$0xff] }
 0x1e8   : > { %v1035_v39 = vld [vmem:[#allocation17 + $0x210] sm:$0xff]  ;;  %v1029_v43 = vld [vmem:[#allocation17 + $0x1e0] sm:$0xff]  ;;  %v1044_v55 = vld [vmem:[#allocation17 + $0x258] sm:$0xff] }
 0x1e9   : > { %4864 = vmatpush3.bf16.msra.mxu0 %v4863_v10  ;;  %4924 = vmatpush1.bf16.msra.mxu1 %v4923_v11  ;;  %v998_v10 = vld [vmem:[#allocation17 + $0xe8] sm:$0xff]  ;;  %v1000_v11 = vld [vmem:[#allocation17 + $0xf8] sm:$0xff]  ;;  %v1033_v47 = vld [vmem:[#allocation17 + $0x200] sm:$0xff]  ;;  %v4903_v51 = vpack.c.bf16 %v1034_v45, %v1029_v43 }
 0x1ea   : > { %4865 = vmatprep.subr.bf16.mxu0 %v7535_v46  ;;  %4926 = vmatprep.subr.bf16.mxu1 %v4925_v14  ;;  %v4948_v14 = vpack.c.bf16 %v998_v10, %v993_v9  ;;  %v4889_v15 = vpack.c.bf16 %v1005_v12, %v1000_v11  ;;  %v1039_v54 = vld [vmem:[#allocation17 + $0x230] sm:$0xff]  ;;  %v1131_v62 = vld [vmem:[%s7488_s8 + $0x8] sm:$0xff]  ;;  %v1146_v0 = vld [vmem:[#allocation22] sm:$0xff] }
 0x1eb   : > { %v1043_v56 = vld [vmem:[#allocation17 + $0x250] sm:$0xff]  ;;  %v1149_v8 = vld [vmem:[#allocation22 + $0x18] sm:$0xff]  ;;  %v1137_v17 = vld [vmem:[%s7488_s8 + $0x38] sm:$0xff] }
 0x1ec   : > { %v1130_v61 = vld [vmem:[%s7488_s8] sm:$0xff]  ;;  %v1135_v11 = vld [vmem:[%s7488_s8 + $0x28] sm:$0xff]  ;;  %v1136_v16 = vld [vmem:[%s7488_s8 + $0x30] sm:$0xff] }
 0x1ed   : > { %4867 = vmatpush3.bf16.msra.mxu0 %v4866_v19  ;;  %4928 = vmatpush1.bf16.msra.mxu1 %v4927_v20  ;;  %v1008_v19 = vld [vmem:[#allocation17 + $0x138] sm:$0xff]  ;;  %v1010_v20 = vld [vmem:[#allocation17 + $0x148] sm:$0xff]  ;;  %v4990_v63 = vpack.c.bf16 %v1131_v62, %v1130_v61  ;;  %v1134_v10 = vld [vmem:[%s7488_s8 + $0x20] sm:$0xff] }
 0x1ee   : > { %4868 = vmatprep.subr.bf16.mxu0 %v7535_v46  ;;  %4930 = vmatprep.subr.bf16.mxu1 %v4929_v23  ;;  %v4951_v23 = vpack.c.bf16 %v1008_v19, %v1003_v18  ;;  %v4893_v24 = vpack.c.bf16 %v1015_v21, %v1010_v20  ;;  %v1147_v1 = vld [vmem:[#allocation22 + $0x8] sm:$0xff]  ;;  %v1148_v6 = vld [vmem:[#allocation22 + $0x10] sm:$0xff]  ;;  %v4996_v12 = vpack.c.bf16 %v1135_v11, %v1134_v10  ;;  %v1153_v20 = vld [vmem:[#allocation22 + $0x38] sm:$0xff] }
 0x1ef   : > { %v4966_v2 = vpack.c.bf16 %v1147_v1, %v1146_v0  ;;  %v4969_v9 = vpack.c.bf16 %v1149_v8, %v1148_v6  ;;  %v4999_v18 = vpack.c.bf16 %v1137_v17, %v1136_v16  ;;  %v1152_v19 = vld [vmem:[#allocation22 + $0x30] sm:$0xff]  ;;  %v1154_v25 = vld [vmem:[#allocation22 + $0x40] sm:$0xff]  ;;  %v1155_v26 = vld [vmem:[#allocation22 + $0x48] sm:$0xff] }
 0x1f0   : > { %v4975_v21 = vpack.c.bf16 %v1153_v20, %v1152_v19  ;;  %v1142_v34 = vld [vmem:[%s7488_s8 + $0x60] sm:$0xff]  ;;  %v1143_v35 = vld [vmem:[%s7488_s8 + $0x68] sm:$0xff] }
 0x1f1   : > { %4870 = vmatpush3.bf16.msra.mxu0 %v4869_v28  ;;  %4932 = vmatpush1.bf16.msra.mxu1 %v4931_v29  ;;  %v1018_v28 = vld [vmem:[#allocation17 + $0x188] sm:$0xff]  ;;  %v1020_v29 = vld [vmem:[#allocation17 + $0x198] sm:$0xff] }
 0x1f2   : > { %4871 = vmatprep.subr.bf16.mxu0 %v7535_v46  ;;  %4934 = vmatprep.subr.bf16.mxu1 %v4933_v32  ;;  %v4954_v32 = vpack.c.bf16 %v1018_v28, %v1013_v27  ;;  %v4897_v33 = vpack.c.bf16 %v1025_v30, %v1020_v29  ;;  %v4978_v27 = vpack.c.bf16 %v1155_v26, %v1154_v25  ;;  %v1140_v28 = vld [vmem:[%s7488_s8 + $0x50] sm:$0xff]  ;;  %v1141_v29 = vld [vmem:[%s7488_s8 + $0x58] sm:$0xff] }
 0x1f3   : > { %v5005_v30 = vpack.c.bf16 %v1141_v29, %v1140_v28  ;;  %v1161_v45 = vld [vmem:[#allocation22 + $0x78] sm:$0xff] }
 0x1f5   : > { %4873 = vmatpush3.bf16.msra.mxu0 %v4872_v37  ;;  %4936 = vmatpush1.bf16.msra.mxu1 %v4935_v38  ;;  %v1028_v37 = vld [vmem:[#allocation17 + $0x1d8] sm:$0xff]  ;;  %v1030_v38 = vld [vmem:[#allocation17 + $0x1e8] sm:$0xff] }
 0x1f6   : > { %4874 = vmatprep.subr.bf16.mxu0 %v7535_v46  ;;  %4938 = vmatprep.subr.bf16.mxu1 %v4937_v42  ;;  %v4957_v41 = vpack.c.bf16 %v1028_v37, %v1023_v36  ;;  %v4901_v42 = vpack.c.bf16 %v1035_v39, %v1030_v38  ;;  %v5008_v36 = vpack.c.bf16 %v1143_v35, %v1142_v34  ;;  %v1158_v37 = vld [vmem:[#allocation22 + $0x60] sm:$0xff]  ;;  %v1159_v38 = vld [vmem:[#allocation22 + $0x68] sm:$0xff] }
 0x1f7   : > { %v4984_v39 = vpack.c.bf16 %v1159_v38, %v1158_v37 }
 0x1f9   : > { %4876 = vmatpush3.bf16.msra.mxu0 %v4875_v48  ;;  %4940 = vmatpush1.bf16.msra.mxu1 %v4939_v49  ;;  %v1038_v48 = vld [vmem:[#allocation17 + $0x228] sm:$0xff]  ;;  %v1040_v49 = vld [vmem:[#allocation17 + $0x238] sm:$0xff] }
 0x1fa   : > { %4878 = vmatprep.subr.bf16.mxu0 %v4877_v50  ;;  %4941 = vmatprep.subr.bf16.mxu1 %v7535_v46  ;;  %v1045_v50 = vld [vmem:[#allocation17 + $0x260] sm:$0xff]  ;;  %v4960_v52 = vpack.c.bf16 %v1038_v48, %v1033_v47  ;;  %v1588_v48 = vlaneseq }
 0x1fb   : > { %v4905_v53 = vpack.c.bf16 %v1045_v50, %v1040_v49 }
 0x1fc   : > { %4487 = vmatmul.mubr.f32.vlgmr.msra.gmra.mrb[2].mxu0 %v6671_v44  ;;  %1511 = vmatmul.mubr.f32.vlgmr.msra.gmra.mrb[0].mxu1 %v6686_v58  ;;  %v6772_v49 = vshrl.u32 %v1588_v48, 7 }
 0x1fd   : > { %4880 = vmatpush1.bf16.msra.mxu0 %v4879_v57  ;;  %4943 = vmatpush3.bf16.msra.mxu1 %v4942_v59  ;;  %v1048_v57 = vld [vmem:[#allocation17 + $0x278] sm:$0xff]  ;;  %v4907_v59 = vpack.c.bf16 %v1044_v55, %v1039_v54 }
 0x1fe   : > { %4882 = vmatprep.subr.bf16.mxu0 %v4881_v60  ;;  %4944 = vmatprep.subr.bf16.mxu1 %v7535_v46  ;;  %v4963_v60 = vpack.c.bf16 %v1048_v57, %v1043_v56  ;;  %v6775_v50 = vsub.s32 2, %v6772_v49  ;;  %v6786_v0 = vsub.s32 1, %v6772_v49  ;;  %v6789_v1 = vsub.s32 4, %v6772_v49 }
 0x1ff   : > { %1439 = vmatprep.mubr.f32.mxu0 %v7533_v7  ;;  %4521 = vmatprep.mubr.msk.f32.mxu1 %vm6143_vm1, %v7533_v7 }
 0x201   : > { %4884 = vmatpush1.bf16.msra.mxu0 %v4883_v3  ;;  %4946 = vmatpush3.bf16.msra.mxu1 %v4945_v4  ;;  %v1132_v3 = vld [vmem:[%s7488_s8 + $0x10] sm:$0xff]  ;;  %v1133_v4 = vld [vmem:[%s7488_s8 + $0x18] sm:$0xff] }
 0x202   : > { %4886 = vmatprep.subr.bf16.mxu0 %v4885_v5  ;;  %4947 = vmatprep.subr.bf16.mxu1 %v7535_v46  ;;  %v4993_v5 = vpack.c.bf16 %v1133_v4, %v1132_v3 }
 0x205   : > { %4888 = vmatpush1.bf16.msra.mxu0 %v4887_v13  ;;  %4949 = vmatpush3.bf16.msra.mxu1 %v4948_v14  ;;  %v1150_v13 = vld [vmem:[#allocation22 + $0x20] sm:$0xff]  ;;  %v1151_v14 = vld [vmem:[#allocation22 + $0x28] sm:$0xff] }
 0x206   : > { %4890 = vmatprep.subr.bf16.mxu0 %v4889_v15  ;;  %4950 = vmatprep.subr.bf16.mxu1 %v7535_v46  ;;  %v4972_v15 = vpack.c.bf16 %v1151_v14, %v1150_v13 }
 0x209   : > { %4892 = vmatpush1.bf16.msra.mxu0 %v4891_v22  ;;  %4952 = vmatpush3.bf16.msra.mxu1 %v4951_v23  ;;  %v1138_v22 = vld [vmem:[%s7488_s8 + $0x40] sm:$0xff]  ;;  %v1139_v23 = vld [vmem:[%s7488_s8 + $0x48] sm:$0xff] }
 0x20a   : > { %4894 = vmatprep.subr.bf16.mxu0 %v4893_v24  ;;  %4953 = vmatprep.subr.bf16.mxu1 %v7535_v46  ;;  %v5002_v24 = vpack.c.bf16 %v1139_v23, %v1138_v22 }
 0x20d   : > { %4896 = vmatpush1.bf16.msra.mxu0 %v4895_v31  ;;  %4955 = vmatpush3.bf16.msra.mxu1 %v4954_v32  ;;  %v1156_v31 = vld [vmem:[#allocation22 + $0x50] sm:$0xff]  ;;  %v1157_v32 = vld [vmem:[#allocation22 + $0x58] sm:$0xff] }
 0x20e   : > { %4898 = vmatprep.subr.bf16.mxu0 %v4897_v33  ;;  %4956 = vmatprep.subr.bf16.mxu1 %v7535_v46  ;;  %v4981_v33 = vpack.c.bf16 %v1157_v32, %v1156_v31 }
 0x211   : > { %4900 = vmatpush1.bf16.msra.mxu0 %v4899_v40  ;;  %4958 = vmatpush3.bf16.msra.mxu1 %v4957_v41  ;;  %v1144_v40 = vld [vmem:[%s7488_s8 + $0x70] sm:$0xff]  ;;  %v1145_v41 = vld [vmem:[%s7488_s8 + $0x78] sm:$0xff] }
 0x212   : > { %4902 = vmatprep.subr.bf16.mxu0 %v4901_v42  ;;  %4959 = vmatprep.subr.bf16.mxu1 %v7535_v46  ;;  %v1160_v42 = vld [vmem:[#allocation22 + $0x70] sm:$0xff]  ;;  %v5011_v43 = vpack.c.bf16 %v1145_v41, %v1144_v40  ;;  %v4269_v40 = vld [vmem:[%s7592_s17] ss:$0 sm:$0xff] }
 0x213   : > { %v4987_v47 = vpack.c.bf16 %v1161_v45, %v1160_v42 }
 0x215   : > { %4904 = vmatpush1.bf16.msra.mxu0 %v4903_v51  ;;  %4961 = vmatpush3.bf16.msra.mxu1 %v4960_v52  ;;  %v1129_v51 = vld [vmem:[#allocation20] sm:$0x1f]  ;;  %v6778_v52 = vsub.s32 3, %v6772_v49 }
 0x216   : > { %4906 = vmatprep.subr.bf16.mxu0 %v4905_v53  ;;  %4962 = vmatprep.subr.bf16.mxu1 %v7535_v46  ;;  %v1599_v53 = vrot.slane %v1129_v51, %v6775_v50  ;;  %v1595_v3 = vrot.slane %v1129_v51, %v6786_v0 }
 0x217   : > { %v1603_v54 = vrot.slane %v1129_v51, %v6778_v52 }
 0x219   : > { %4908 = vmatpush1.bf16.msra.mxu0 %v4907_v59  ;;  %4964 = vmatpush3.bf16.msra.mxu1 %v4963_v60 }
 0x21a   : > { %4965 = vmatprep.subr.bf16.mxu0 %v7535_v46  ;;  %4989 = vmatprep.subr.bf16.mxu1 %v7535_v46 }
 0x21c   : > { %1440 = vmatmul.mubr.f32.vlgmr.msra.gmra.mrb[0].mxu0 %v6686_v58  ;;  %4522 = vmatmul.mubr.f32.vlgmr.msra.gmra.mrb[2].mxu1 %v6686_v58 }
 0x21d   : > { %4556 = vmatprep.mubr.msk.f32.mxu0 %vm6143_vm1, %v7533_v7  ;;  %4591 = vmatprep.mubr.msk.f32.mxu1 %vm6143_vm1, %v7533_v7 }
 0x21e   : > { %4991 = vmatpush3.bf16.msra.mxu1 %v4990_v63  ;;  %4967 = vmatpush3.bf16.msra.mxu0 %v4966_v2  ;;  %v6783_v63 = vsub.s32 0, %v6772_v49 }
 0x21f   : > { %4992 = vmatprep.subr.bf16.mxu1 %v7535_v46  ;;  %4968 = vmatprep.subr.bf16.mxu0 %v7535_v46 }
 0x220   : > { %v1591_v2 = vrot.slane %v1129_v51, %v6783_v63 }
 0x222   : > { %4994 = vmatpush3.bf16.msra.mxu1 %v4993_v5  ;;  %4970 = vmatpush3.bf16.msra.mxu0 %v4969_v9  ;;  %v1607_v5 = vrot.slane %v1129_v51, %v6789_v1 }
 0x223   : > { %4995 = vmatprep.subr.bf16.mxu1 %v7535_v46  ;;  %4971 = vmatprep.subr.bf16.mxu0 %v7535_v46 }
 0x226   : > { %4997 = vmatpush3.bf16.msra.mxu1 %v4996_v12  ;;  %4973 = vmatpush3.bf16.msra.mxu0 %v4972_v15 }
 0x227   : > { %4998 = vmatprep.subr.bf16.mxu1 %v7535_v46  ;;  %4974 = vmatprep.subr.bf16.mxu0 %v7535_v46 }
 0x22a   : > { %5000 = vmatpush3.bf16.msra.mxu1 %v4999_v18  ;;  %4976 = vmatpush3.bf16.msra.mxu0 %v4975_v21 }
 0x22b   : > { %5001 = vmatprep.subr.bf16.mxu1 %v7535_v46  ;;  %4977 = vmatprep.subr.bf16.mxu0 %v7535_v46 }
 0x22e   : > { %5003 = vmatpush3.bf16.msra.mxu1 %v5002_v24  ;;  %4979 = vmatpush3.bf16.msra.mxu0 %v4978_v27 }
 0x22f   : > { %5004 = vmatprep.subr.bf16.mxu1 %v7535_v46  ;;  %4980 = vmatprep.subr.bf16.mxu0 %v7535_v46 }
 0x232   : > { %5006 = vmatpush3.bf16.msra.mxu1 %v5005_v30  ;;  %4982 = vmatpush3.bf16.msra.mxu0 %v4981_v33 }
 0x233   : > { %5007 = vmatprep.subr.bf16.mxu1 %v7535_v46  ;;  %4983 = vmatprep.subr.bf16.mxu0 %v7535_v46 }
 0x236   : > { %5009 = vmatpush3.bf16.msra.mxu1 %v5008_v36  ;;  %4985 = vmatpush3.bf16.msra.mxu0 %v4984_v39 }
 0x237   : > { %5010 = vmatprep.subr.bf16.mxu1 %v7535_v46  ;;  %4986 = vmatprep.subr.bf16.mxu0 %v7535_v46 }
 0x23a   : > { %5012 = vmatpush3.bf16.msra.mxu1 %v5011_v43  ;;  %4988 = vmatpush3.bf16.msra.mxu0 %v4987_v47 }
 0x2cf   : > { %v1371_v55 = vpop.f32.mrb[2].mxu0  ;;  %v1512_v57 = vpop.f32.mrb[0].mxu1 }
 0x2d0   : > { %v4488_v56 = vpop.f32.mrb[3].mxu0  ;;  %v1615_v59 = vadd.f32 %v1599_v53, %v1512_v57  ;;  %v1514_v60 = vpop.f32.mrb[1].mxu1 }
 0x2d1   : > { %v1616_v61 = vadd.f32 %v1603_v54, %v1514_v60 }
 0x2d3   : > { %v1630_v62 = vmax.f32 %v1615_v59, %v1616_v61 }
 0x2ef   : > { %v1441_v4 = vpop.f32.mrb[0].mxu0  ;;  %v1583_v8 = vpop.f32.mrb[2].mxu1 }
 0x2f0   : > { %v1613_v6 = vadd.f32 %v1591_v2, %v1441_v4  ;;  %v1443_v9 = vpop.f32.mrb[1].mxu0  ;;  %v1584_v10 = vadd.f32 %v1583_v8, %v1371_v55  ;;  %v4523_v12 = vpop.f32.mrb[3].mxu1  ;;  %v6811_v2 = vld [vmem:[#allocation14] sm:$0xff] }
 0x2f1   : > { %v1614_v11 = vadd.f32 %v1595_v3, %v1443_v9  ;;  %v6819_v9 = vld [vmem:[#allocation14 + $0x8] sm:$0xff] }
 0x2f2   : > { %v4267_v13 = vmul.f32 -1.442695, %v1613_v6  ;;  %v1617_v14 = vadd.f32 %v1607_v5, %v1584_v10  ;;  %v6815_v5 = vld [vmem:[#allocation14 + $0x20] sm:$0xff] }
 0x2f3   : > { %v4268_v15 = vmul.f32 -1.442695, %v1614_v11  ;;  %v6822_v11 = vld [vmem:[#allocation14 + $0x28] sm:$0xff] }
 0x2f4   : > { %5497 = vpow2.f32 %v4267_v13  ;;  %v1631_v16 = vmax.f32 %v1630_v62, %v1617_v14  ;;  %v6825_v13 = vld [vmem:[#allocation14 + $0x10] sm:$0xff] }
 0x2f5   : > { %5499 = vpow2.f32 %v4268_v15 }
 0x2f6   : > { %v1632_v17 = vsub.f32 %v1615_v59, %v1631_v16  ;;  %v1635_v18 = vsub.f32 %v1616_v61, %v1631_v16  ;;  %v1638_v19 = vsub.f32 %v1617_v14, %v1631_v16  ;;  %v6828_v16 = vld [vmem:[#allocation14 + $0x30] sm:$0xff] }
 0x2f8   : > { %v1633_v20 = vmul.f32 1.442695, %v1632_v17  ;;  %v1636_v21 = vmul.f32 1.442695, %v1635_v18  ;;  %v1639_v22 = vmul.f32 1.442695, %v1638_v19 }
 0x2f9   : > { %v6833_v19 = vld [vmem:[#allocation14 + $0x18] sm:$0xff] }
 0x2fa   : > { %5501 = vpow2.f32 %v1633_v20 }
 0x2fb   : > { %5503 = vpow2.f32 %v1636_v21 }
 0x2fc   : > { %5505 = vpow2.f32 %v1639_v22  ;;  %v6837_v22 = vld [vmem:[#allocation14 + $0x48] sm:$0xff] }
 0x2fe   : > { %v5498_v23 = vpop.eup %5497 }
 0x2ff   : > { %v5500_v24 = vpop.eup %5499  ;;  %v1621_v25 = vadd.f32 1.0, %v5498_v23 }
 0x300   : > { %v1627_v26 = vadd.f32 1.0, %v5500_v24 }
 0x301   : > { %5507 = vrcp.f32 %v1621_v25  ;;  %v6841_v25 = vld [vmem:[#allocation14 + $0x40] sm:$0xff] }
 0x302   : > { %5509 = vrcp.f32 %v1627_v26 }
 0x304   : > { %v5502_v27 = vpop.eup %5501 }
 0x305   : > { %v5504_v28 = vpop.eup %5503  ;;  %v1795_v29 = vmul.f32 %v5502_v27, %v6686_v58 }
 0x306   : > { %v1641_v30 = vadd.f32 %v5504_v28, %v5502_v27  ;;  %v1796_v31 = vmul.f32 %v5504_v28, %v6671_v44  ;;  %v5506_v32 = vpop.eup %5505  ;;  %v6844_v27 = vld [vmem:[#allocation14 + $0x38] sm:$0xff] }
 0x308   : > { %v1642_v33 = vadd.f32 %v5506_v32, %v1641_v30  ;;  %v1797_v34 = vadd.f32 %v1796_v31, %v1795_v29  ;;  %v6848_v30 = vld [vmem:[#allocation14 + $0x50] sm:$0xff] }
 0x30b   : > { %v5508_v35 = vpop.eup %5507 }
 0x30c   : > { %v5510_v36 = vpop.eup %5509  ;;  %v1645_v37 = vmul.f32 %v5508_v35, %v6686_v58  ;;  %v6144_v58 = vmov 1966171168   ;;  %v6855_v35 = vld [vmem:[#allocation14 + $0x88] sm:$0xff] }
 0x30d   : > { %v1646_v38 = vmul.f32 %v5510_v36, %v6671_v44  ;;  %v1804_v44 = vunpack.c.l.s4 %v6144_v58  ;;  %v6868_v58 = vld [vmem:[#allocation14 + $0x68] sm:$0xff] }
 0x30e   : > { %4592 = vmatmul.mubr.f32.vlgmr.msra.gmra.mrb[4].mxu1 %v1645_v37  ;;  %v6858_v37 = vld [vmem:[#allocation14 + $0x80] sm:$0xff] }
 0x30f   : > { %4557 = vmatmul.mubr.f32.vlgmr.msra.gmra.mrb[4].mxu0 %v1646_v38  ;;  %2811 = vmatprep.mubr.f32.mxu1 %v7533_v7  ;;  %v1805_v51 = vunpack.c.0.s8 %v1804_v44 }
 0x310   : > { %2740 = vmatprep.mubr.f32.mxu0 %v7533_v7 }
 0x311   : > { %v6804_v56 = vsub.s32 %v1805_v51, %v6772_v49  ;;  %v6871_v51 = vld [vmem:[#allocation14 + $0x60] sm:$0xff] }
 0x3e1   : > { %v1783_v39 = vpop.f32.mrb[4].mxu1 }
 0x3e2   : > { %v1713_v41 = vpop.f32.mrb[4].mxu0  ;;  %v4593_v42 = vpop.f32.mrb[5].mxu1 }
 0x3e3   : > { %v1784_v43 = vadd.f32 %v1783_v39, %v1713_v41  ;;  %v4558_v45 = vpop.f32.mrb[5].mxu0  ;;  %v6864_v42 = vld [vmem:[#allocation14 + $0x98] sm:$0xff] }
 0x3e4   : > { %7594 = vst [vmem:[#allocation46_spill] sm:$0xff] %v6864_v42 }
 0x3e5   : > { %v1793_v47 = vadd.f32 %v4269_v40, %v1784_v43  ;;  %v6861_v40 = vld [vmem:[#allocation14 + $0x90] sm:$0xff] }
 0x3e7   : > { %5511 = vtanh.f32 %v1793_v47 }
 0x3e8   : > { %5513 = vrcp.f32 %v1642_v33 }
 0x3f1   : > { %v5512_v53 = vpop.eup %5511 }
 0x3f2   : > { %v1798_v54 = vmul.f32 %v5512_v53, %v5506_v32  ;;  %v5514_v57 = vpop.eup %5513  ;;  %v6851_v32 = vld [vmem:[#allocation14 + $0x58] sm:$0xff] }
 0x3f4   : > { %v1799_v55 = vadd.f32 %v1798_v54, %v1797_v34 }
 0x3f6   : > { %v6806_v59 = vmul.f32 %v5514_v57, %v1799_v55  ;;  %v6875_v55 = vld [vmem:[#allocation14 + $0x70] sm:$0xff] }
 0x3f8   : > { %7593 = vst [vmem:[#allocation45_spill] sm:$0xff] %v6806_v59  ;;  %v1809_v60 = vrot.slane %v6806_v59, %v6804_v56  ;;  %v1802_v18 = vcombine.high %v6806_v59, %v6806_v59 }
 0x3fa   : > { %v1825_v61 = vrot.slane %v1809_v60, %v6804_v56  ;;  %v1817_v62 = vcombine.high %v1809_v60, %v1809_v60  ;;  %v1816_v24 = vrot.slane %v1802_v18, %v6804_v56  ;;  %v6878_v60 = vld [vmem:[#allocation14 + $0x78] sm:$0xff]  ;;  %v6895_v18 = vld [vmem:[#allocation14 + $0xc8] sm:$0xff] }
 0x3fb   : > { %7595 = vst [vmem:[#allocation47_spill] sm:$0xff] %v6878_v60  ;;  %7600 = vst [vmem:[#allocation52_spill] sm:$0xff] %v6895_v18 }
 0x3fc   : > { %v1854_v3 = vrot.slane %v1825_v61, %v6783_v63  ;;  %v1839_v4 = vrot.slane %v1817_v62, %v6804_v56  ;;  %v1847_v15 = vcombine.high %v1825_v61, %v1825_v61  ;;  %v1832_v29 = vrot.slane %v1816_v24, %v6804_v56 }
 0x3fd   : > { %v1818_v47 = vcombine.high %v1816_v24, %v1816_v24 }
 0x3fe   : > { %v1891_v6 = vmul.f32 %v1854_v3, %v6811_v2  ;;  %v1858_v8 = vrot.slane %v1839_v4, %v6783_v63  ;;  %v1892_v12 = vmul.f32 %v1854_v3, %v6819_v9  ;;  %v1893_v17 = vmul.f32 %v1854_v3, %v6825_v13 }
 0x3ff   : > { %v1862_v21 = vrot.slane %v1847_v15, %v6783_v63  ;;  %v1894_v23 = vmul.f32 %v1854_v3, %v6833_v19  ;;  %v1870_v34 = vrot.slane %v1832_v29, %v6783_v63  ;;  %v1849_v39 = vcombine.high %v1839_v4, %v1839_v4  ;;  %v6882_v3 = vld [vmem:[#allocation14 + $0xa8] sm:$0xff]  ;;  %v6892_v15 = vld [vmem:[#allocation14 + $0xc0] sm:$0xff] }
 0x400   : > { %1923 = vadd.xlane.f32.xlu0 %v1891_v6  ;;  %v1895_v10 = vmul.f32 %v1858_v8, %v6815_v5  ;;  %v1896_v14 = vmul.f32 %v1858_v8, %v6822_v11  ;;  %v1897_v20 = vmul.f32 %v1858_v8, %v6828_v16  ;;  %v1898_v31 = vmul.f32 %v1858_v8, %v6844_v27  ;;  %v6885_v8 = vld [vmem:[#allocation14 + $0xa0] sm:$0xff] }
 0x401   : > { %v1900_v26 = vmul.f32 %v1862_v21, %v6837_v22  ;;  %v1899_v28 = vmul.f32 %v1862_v21, %v6841_v25  ;;  %v1901_v33 = vmul.f32 %v1862_v21, %v6848_v30  ;;  %v1902_v36 = vmul.f32 %v1862_v21, %v6851_v32  ;;  %7596 = vst [vmem:[#allocation48_spill] sm:$0xff] %v6882_v3  ;;  %v6898_v21 = vld [vmem:[#allocation14 + $0xb8] sm:$0xff] }
 0x402   : > { %1931 = vadd.xlane.f32.xlu1 %v1895_v10  ;;  %v1908_v38 = vmul.f32 %v1870_v34, %v6855_v35  ;;  %v1907_v41 = vmul.f32 %v1870_v34, %v6858_v37  ;;  %v1909_v43 = vmul.f32 %v1870_v34, %v6861_v40  ;;  %v1866_v45 = vrot.slane %v1849_v39, %v6783_v63  ;;  %v6888_v10 = vld [vmem:[#allocation14 + $0xb0] sm:$0xff] }
 0x403   : > { %v1910_v44 = vmul.f32 %v1870_v34, %v6864_v42  ;;  %v1846_v54 = vrot.slane %v1818_v47, %v6804_v56  ;;  %v1848_v6 = vcombine.high %v1832_v29, %v1832_v29  ;;  %7597 = vst [vmem:[#allocation49_spill] sm:$0xff] %v6885_v8  ;;  %7598 = vst [vmem:[#allocation50_spill] sm:$0xff] %v6888_v10  ;;  %v6904_v29 = vld [vmem:[#allocation14 + $0xd8] sm:$0xff]  ;;  %v6908_v34 = vld [vmem:[#allocation14 + $0xe8] sm:$0xff] }
 0x404   : > { %1925 = vadd.xlane.f32.xlu0 %v1892_v12  ;;  %v1904_v53 = vmul.f32 %v1866_v45, %v6868_v58  ;;  %v1903_v57 = vmul.f32 %v1866_v45, %v6871_v51  ;;  %v1905_v61 = vmul.f32 %v1866_v45, %v6875_v55  ;;  %v1906_v4 = vmul.f32 %v1866_v45, %v6878_v60  ;;  %v6917_v45 = vld [vmem:[#allocation14 + $0xf8] sm:$0xff] }
 0x405   : > { %v1874_v62 = vrot.slane %v1846_v54, %v6783_v63  ;;  %7599 = vst [vmem:[#allocation51_spill] sm:$0xff] %v6892_v15  ;;  %7601 = vst [vmem:[#allocation53_spill] sm:$0xff] %v6898_v21  ;;  %v1850_v24 = vcombine.high %v1846_v54, %v1846_v54 }
 0x406   : > { %1933 = vadd.xlane.f32.xlu1 %v1896_v14  ;;  %v1878_v14 = vrot.slane %v1848_v6, %v6783_v63  ;;  %7603 = vst [vmem:[#allocation55_spill] sm:$0xff] %v6904_v29  ;;  %7604 = vst [vmem:[#allocation56_spill] sm:$0xff] %v6908_v34 }
 0x407   : > { %v1912_v56 = vmul.f32 %v1874_v62, %v6882_v3  ;;  %v1911_v12 = vmul.f32 %v1874_v62, %v6885_v8  ;;  %7607 = vst [vmem:[#allocation59_spill] sm:$0xff] %v6917_v45 }
 0x408   : > { %1927 = vadd.xlane.f32.xlu0 %v1893_v17  ;;  %v1913_v17 = vmul.f32 %v1874_v62, %v6888_v10 }
 0x40a   : > { %1935 = vadd.xlane.f32.xlu1 %v1897_v20  ;;  %v1915_v20 = vmul.f32 %v1878_v14, %v6892_v15 }
 0x40c   : > { %1929 = vadd.xlane.f32.xlu0 %v1894_v23  ;;  %v1916_v23 = vmul.f32 %v1878_v14, %v6895_v18 }
 0x40e   : > { %1941 = vadd.xlane.f32.xlu1 %v1900_v26  ;;  %v6901_v26 = vld [vmem:[#allocation14 + $0xd0] sm:$0xff] }
 0x40f   : > { %7602 = vst [vmem:[#allocation54_spill] sm:$0xff] %v6901_v26 }
 0x410   : > { %1939 = vadd.xlane.f32.xlu0 %v1899_v28  ;;  %v1914_v28 = vmul.f32 %v1874_v62, %v6898_v21 }
 0x412   : > { %1937 = vadd.xlane.f32.xlu1 %v1898_v31  ;;  %v1917_v31 = vmul.f32 %v1878_v14, %v6901_v26 }
 0x414   : > { %1943 = vadd.xlane.f32.xlu0 %v1901_v33  ;;  %v1882_v33 = vrot.slane %v1850_v24, %v6783_v63 }
 0x416   : > { %1945 = vadd.xlane.f32.xlu1 %v1902_v36  ;;  %v1918_v36 = vmul.f32 %v1878_v14, %v6904_v29  ;;  %v1920_v39 = vmul.f32 %v1882_v33, %v6908_v34 }
 0x418   : > { %1957 = vadd.xlane.f32.xlu0 %v1908_v38  ;;  %v6911_v38 = vld [vmem:[#allocation14 + $0xe0] sm:$0xff] }
 0x419   : > { %7605 = vst [vmem:[#allocation57_spill] sm:$0xff] %v6911_v38 }
 0x41a   : > { %1955 = vadd.xlane.f32.xlu1 %v1907_v41  ;;  %v6914_v41 = vld [vmem:[#allocation14 + $0xf0] sm:$0xff] }
 0x41b   : > { %7606 = vst [vmem:[#allocation58_spill] sm:$0xff] %v6914_v41  ;;  %v1921_v47 = vmul.f32 %v1882_v33, %v6914_v41 }
 0x41c   : > { %1959 = vadd.xlane.f32.xlu0 %v1909_v43  ;;  %v1919_v43 = vmul.f32 %v1882_v33, %v6911_v38 }
 0x41e   : > { %1961 = vadd.xlane.f32.xlu1 %v1910_v44  ;;  %v1922_v44 = vmul.f32 %v1882_v33, %v6917_v45 }
 0x420   : > { %1949 = vadd.xlane.f32.xlu0 %v1904_v53 }
 0x422   : > { %1947 = vadd.xlane.f32.xlu1 %v1903_v57 }
 0x424   : > { %1951 = vadd.xlane.f32.xlu0 %v1905_v61 }
 0x426   : > { %1953 = vadd.xlane.f32.xlu1 %v1906_v4 }
 0x428   : > { %1965 = vadd.xlane.f32.xlu0 %v1912_v56 }
 0x42a   : > { %1963 = vadd.xlane.f32.xlu1 %v1911_v12 }
 0x42c   : > { %1967 = vadd.xlane.f32.xlu0 %v1913_v17 }
 0x42e   : > { %1971 = vadd.xlane.f32.xlu1 %v1915_v20 }
 0x430   : > { %1973 = vadd.xlane.f32.xlu0 %v1916_v23 }
 0x432   : > { %1969 = vadd.xlane.f32.xlu1 %v1914_v28 }
 0x434   : > { %1975 = vadd.xlane.f32.xlu0 %v1917_v31 }
 0x436   : > { %1977 = vadd.xlane.f32.xlu1 %v1918_v36 }
 0x438   : > { %1981 = vadd.xlane.f32.xlu0 %v1920_v39 }
 0x43a   : > { %1979 = vadd.xlane.f32.xlu1 %v1919_v43  ;;  %v2021_v43 = vand.u32 127, %v1588_v48 }
 0x43c   : > { %1983 = vadd.xlane.f32.xlu0 %v1921_v47  ;;  %v2033_v46 = vadd.s32 4294967280, %v2021_v43  ;;  %v2040_v59 = vadd.s32 4294967272, %v2021_v43  ;;  %v6938_v38 = vsub.s32 %v2021_v43, %v6772_v49 }
 0x43e   : > { %1985 = vadd.xlane.f32.xlu1 %v1922_v44  ;;  %v2026_v44 = vadd.s32 4294967288, %v2021_v43  ;;  %v6943_v34 = vsub.s32 %v2033_v46, %v6772_v49  ;;  %v6946_v48 = vsub.s32 %v2040_v59, %v6772_v49 }
 0x440   : > { %v6935_v41 = vsub.s32 %v2026_v44, %v6772_v49 }
 0x48d   : > { %v1924_v53 = vpop.xlane.xlu0 %1923 }
 0x48e   : > { %v2025_v21 = vrot.slane %v1924_v53, %v6938_v38 }
 0x48f   : > { %v1932_v54 = vpop.xlane.xlu1 %1931 }
 0x491   : > { %v1926_v57 = vpop.xlane.xlu0 %1925 }
 0x492   : > { %v2030_v15 = vrot.slane %v1926_v57, %v6935_v41 }
 0x493   : > { %v1934_v61 = vpop.xlane.xlu1 %1933 }
 0x494   : > { %v2054_v18 = vrot.slane %v1934_v61, %v6935_v41 }
 0x495   : > { %v1928_v62 = vpop.xlane.xlu0 %1927 }
 0x496   : > { %v2037_v59 = vrot.slane %v1928_v62, %v6943_v34 }
 0x497   : > { %v1936_v4 = vpop.xlane.xlu1 %1935 }
 0x498   : > { %v2059_v10 = vrot.slane %v1936_v4, %v6943_v34 }
 0x499   : > { %v6921_v6 = vpop.xlane.xlu0 %1929 }
 0x49b   : > { %v1942_v56 = vpop.xlane.xlu1 %1941 }
 0x49c   : > { %v2073_v8 = vrot.slane %v1942_v56, %v6935_v41 }
 0x49d   : > { %v1940_v12 = vpop.xlane.xlu0 %1939 }
 0x49e   : > { %v2069_v44 = vrot.slane %v1940_v12, %v6938_v38  ;;  %v2050_v12 = vrot.slane %v1932_v54, %v6938_v38 }
 0x49f   : > { %v1938_v14 = vpop.xlane.xlu1 %1937 }
 0x4a0   : > { %v2074_v3 = vsel %vm2031_vm2, %v2073_v8, %v2069_v44  ;;  %v2055_v56 = vsel %vm2031_vm2, %v2054_v18, %v2050_v12 }
 0x4a1   : > { %v1944_v17 = vpop.xlane.xlu0 %1943 }
 0x4a2   : > { %v2078_v46 = vrot.slane %v1944_v17, %v6943_v34  ;;  %v2032_v17 = vsel %vm2031_vm2, %v2030_v15, %v2025_v21  ;;  %v2060_v15 = vsel %vm2038_vm3, %v2059_v10, %v2055_v56 }
 0x4a3   : > { %v1946_v20 = vpop.xlane.xlu1 %1945  ;;  %v2039_v60 = vsel %vm2038_vm3, %v2037_v59, %v2032_v17 }
 0x4a4   : > { %v2083_v62 = vrot.slane %v1946_v20, %v6946_v48  ;;  %v2079_v54 = vsel %vm2038_vm3, %v2078_v46, %v2074_v3 }
 0x4a5   : > { %v6923_v23 = vpop.xlane.xlu0 %1957 }
 0x4a6   : > { %v2084_v44 = vsel %vm2045_vm4, %v2083_v62, %v2079_v54 }
 0x4a7   : > { %v6925_v24 = vpop.xlane.xlu1 %1955 }
 0x4a9   : > { %v6927_v28 = vpop.xlane.xlu0 %1959 }
 0x4aa   : > { %v2116_v10 = vrot.slane %v6927_v28, %v6943_v34 }
 0x4ab   : > { %v6929_v31 = vpop.xlane.xlu1 %1961 }
 0x4ad   : > { %v1950_v33 = vpop.xlane.xlu0 %1949 }
 0x4ae   : > { %v2092_v57 = vrot.slane %v1950_v33, %v6935_v41  ;;  %v2044_v33 = vrot.slane %v6921_v6, %v6946_v48  ;;  %v2111_v6 = vrot.slane %v6923_v23, %v6935_v41 }
 0x4af   : > { %v1948_v36 = vpop.xlane.xlu1 %1947 }
 0x4b0   : > { %v2088_v43 = vrot.slane %v1948_v36, %v6938_v38  ;;  %v2064_v36 = vrot.slane %v1938_v14, %v6946_v48  ;;  %v2107_v14 = vrot.slane %v6925_v24, %v6938_v38 }
 0x4b1   : > { %v1952_v39 = vpop.xlane.xlu0 %1951 }
 0x4b2   : > { %v2097_v53 = vrot.slane %v1952_v39, %v6943_v34  ;;  %v2093_v4 = vsel %vm2031_vm2, %v2092_v57, %v2088_v43  ;;  %v2065_v18 = vsel %vm2045_vm4, %v2064_v36, %v2060_v15  ;;  %v2112_v46 = vsel %vm2031_vm2, %v2111_v6, %v2107_v14  ;;  %v968_v15 = vld [vmem:[#allocation16] sm:$0xff] }
 0x4b3   : > { %v6932_v47 = vpop.xlane.xlu1 %1953  ;;  %vm1987_vm12 = vcmp.gt.f32.partialorder %v968_v15, 0.0 }
 0x4b4   : > { %v2102_v8 = vrot.slane %v6932_v47, %v6946_v48  ;;  %v2098_v3 = vsel %vm2038_vm3, %v2097_v53, %v2093_v4 }
 0x4b5   : > { %v1966_v7 = vpop.xlane.xlu0 %1965 }
 0x4b6   : > { %v2130_v43 = vrot.slane %v1966_v7, %v6935_v41  ;;  %v2103_v12 = vsel %vm2045_vm4, %v2102_v8, %v2098_v3 }
 0x4b7   : > { %v1964_v45 = vpop.xlane.xlu1 %1963 }
 0x4b8   : > { %v2126_v21 = vrot.slane %v1964_v45, %v6938_v38  ;;  %v2046_v45 = vsel %vm2045_vm4, %v2044_v33, %v2039_v60  ;;  %v2121_v60 = vrot.slane %v6929_v31, %v6946_v48 }
 0x4b9   : > { %v6940_v29 = vpop.xlane.xlu0 %1967  ;;  %v2181_v57 = vsel %vm2180_vm5, %v2065_v18, %v2046_v45 }
 0x4ba   : > { %v2135_v23 = vrot.slane %v6940_v29, %v6943_v34  ;;  %v2131_v28 = vsel %vm2031_vm2, %v2130_v43, %v2126_v21  ;;  %v2183_v36 = vsel %vm2182_vm6, %v2084_v44, %v2181_v57 }
 0x4bb   : > { %v1972_v26 = vpop.xlane.xlu1 %1971 }
 0x4bc   : > { %v2145_v59 = vrot.slane %v1972_v26, %v6938_v38  ;;  %v2117_v26 = vsel %vm2038_vm3, %v2116_v10, %v2112_v46  ;;  %v2136_v33 = vsel %vm2038_vm3, %v2135_v23, %v2131_v28 }
 0x4bd   : > { %v1974_v42 = vpop.xlane.xlu0 %1973  ;;  %v2122_v8 = vsel %vm2045_vm4, %v2121_v60, %v2117_v26  ;;  %v2306_v60 = vsub.s32 5, %v6772_v49  ;;  %v2344_v26 = vsub.s32 7, %v6772_v49 }
 0x4be   : > { %v2149_v20 = vrot.slane %v1974_v42, %v6935_v41 }
 0x4bf   : > { %v1970_v61 = vpop.xlane.xlu1 %1969 }
 0x4c0   : > { %v2140_v7 = vrot.slane %v1970_v61, %v6946_v48  ;;  %v2150_v53 = vsel %vm2031_vm2, %v2149_v20, %v2145_v59  ;;  %v2185_v61 = vsel %vm2184_vm7, %v2103_v12, %v2183_v36 }
 0x4c1   : > { %v1976_v39 = vpop.xlane.xlu0 %1975  ;;  %v2187_v6 = vsel %vm2186_vm8, %v2122_v8, %v2185_v61  ;;  %v2564_v8 = vld [vmem:[#allocation25 + $0x10] sm:$0xff] }
 0x4c2   : > { %v2154_v47 = vrot.slane %v1976_v39, %v6943_v34  ;;  %v2141_v31 = vsel %vm2045_vm4, %v2140_v7, %v2136_v33  ;;  %v2570_v33 = vld [vmem:[#allocation25 + $0x40] sm:$0xff] }
 0x4c3   : > { %v1978_v24 = vpop.xlane.xlu1 %1977  ;;  %v2189_v3 = vsel %vm2188_vm9, %v2141_v31, %v2187_v6  ;;  %v2567_v31 = vld [vmem:[#allocation25 + $0x28] sm:$0xff] }
 0x4c4   : > { %v2159_v29 = vrot.slane %v1978_v24, %v6946_v48  ;;  %v2155_v62 = vsel %vm2038_vm3, %v2154_v47, %v2150_v53 }
 0x4c5   : > { %v1982_v42 = vpop.xlane.xlu0 %1981 }
 0x4c6   : > { %v2168_v4 = vrot.slane %v1982_v42, %v6935_v41  ;;  %v2160_v41 = vsel %vm2045_vm4, %v2159_v29, %v2155_v62  ;;  %v2325_v29 = vsub.s32 6, %v6772_v49  ;;  %v2563_v62 = vld [vmem:[#allocation25 + $0x8] sm:$0xff]  ;;  %v2573_v49 = vld [vmem:[#allocation25 + $0x58] sm:$0xff] }
 0x4c7   : > { %v1980_v17 = vpop.xlane.xlu1 %1979  ;;  %v2191_v20 = vsel %vm2190_vm10, %v2160_v41, %v2189_v3  ;;  %v2569_v41 = vld [vmem:[#allocation25 + $0x38] sm:$0xff]  ;;  %v2580_v3 = vld [vmem:[#allocation25 + $0x90] sm:$0xff] }
 0x4c8   : > { %v2164_v56 = vrot.slane %v1980_v17, %v6938_v38 }
 0x4c9   : > { %v1984_v54 = vpop.xlane.xlu0 %1983 }
 0x4ca   : > { %v2169_v14 = vsel %vm2031_vm2, %v2168_v4, %v2164_v56  ;;  %v2173_v39 = vrot.slane %v1984_v54, %v6943_v34  ;;  %v2568_v4 = vld [vmem:[#allocation25 + $0x30] sm:$0xff]  ;;  %v2565_v56 = vld [vmem:[#allocation25 + $0x18] sm:$0xff]  ;;  %v2562_v54 = vld [vmem:[#allocation25] sm:$0xff] }
 0x4cb   : > { %v1986_v21 = vpop.xlane.xlu1 %1985  ;;  %v5013_v61 = vpack.c.bf16 %v2568_v4, %v2563_v62  ;;  %v5015_v15 = vpack.c.bf16 %v2567_v31, %v2562_v54  ;;  %v2595_v62 = vld [vmem:[#allocation25 + $0x108] sm:$0xff] }
 0x4cc   : > { %v2174_v38 = vsel %vm2038_vm3, %v2173_v39, %v2169_v14  ;;  %v2178_v18 = vrot.slane %v1986_v21, %v6946_v48  ;;  %v5045_v39 = vpack.c.bf16 %v2570_v33, %v2565_v56  ;;  %v5047_v21 = vpack.c.bf16 %v2569_v41, %v2564_v8  ;;  %v2600_v56 = vld [vmem:[#allocation25 + $0x130] sm:$0xff]  ;;  %v2597_v33 = vld [vmem:[#allocation25 + $0x118] sm:$0xff] }
 0x4cd   : > { %5014 = vmatprep.subr.bf16.mxu0 %v5013_v61  ;;  %v2592_v61 = vld [vmem:[#allocation25 + $0xf0] sm:$0xff]  ;;  %v5057_v54 = vpack.c.bf16 %v2600_v56, %v2595_v62  ;;  %v2627_v62 = vld [vmem:[#allocation25 + $0x208] sm:$0xff] }
 0x4ce   : > { %v2179_v34 = vsel %vm2045_vm4, %v2178_v18, %v2174_v38  ;;  %v2578_v38 = vld [vmem:[#allocation25 + $0x80] sm:$0xff]  ;;  %v2575_v18 = vld [vmem:[#allocation25 + $0x68] sm:$0xff]  ;;  %5046 = vmatprep.subr.bf16.mxu1 %v5045_v39  ;;  %5016 = vmatpush1.bf16.msra.mxu0 %v5015_v15  ;;  %v5027_v31 = vpack.c.bf16 %v2597_v33, %v2592_v61  ;;  %v2608_v41 = vld [vmem:[#allocation25 + $0x170] sm:$0xff] }
 0x4cf   : > { %v2193_v24 = vsel %vm2192_vm11, %v2179_v34, %v2191_v20  ;;  %v5017_v6 = vpack.c.bf16 %v2578_v38, %v2573_v49  ;;  %v2572_v34 = vld [vmem:[#allocation25 + $0x50] sm:$0xff]  ;;  %v2577_v20 = vld [vmem:[#allocation25 + $0x78] sm:$0xff]  ;;  %5048 = vmatpush1.bf16.msra.mxu1 %v5047_v21  ;;  %v2594_v39 = vld [vmem:[#allocation25 + $0x100] sm:$0xff] }
 0x4d0   : > { %v2195_v44 = vsel %vm1987_vm12, %v2193_v24, -1e+30  ;;  %v5049_v24 = vpack.c.bf16 %v2580_v3, %v2575_v18  ;;  %v2599_v15 = vld [vmem:[#allocation25 + $0x128] sm:$0xff]  ;;  %v2605_v21 = vld [vmem:[#allocation25 + $0x158] sm:$0xff]  ;;  %v2610_v38 = vld [vmem:[#allocation25 + $0x180] sm:$0xff] }
 0x4d1   : > { %v2197_v10 = vsel %vm2196_vm13, %v2195_v44, -inf  ;;  %5018 = vmatprep.subr.bf16.mxu0 %v5017_v6  ;;  %v5059_v8 = vpack.c.bf16 %v2599_v15, %v2594_v39  ;;  %v2602_v18 = vld [vmem:[#allocation25 + $0x140] sm:$0xff]  ;;  %v2607_v6 = vld [vmem:[#allocation25 + $0x168] sm:$0xff]  ;;  %v5061_v3 = vpack.c.bf16 %v2610_v38, %v2605_v21  ;;  %v2624_v61 = vld [vmem:[#allocation25 + $0x1f0] sm:$0xff] }
 0x4d2   : > { %2198 = vmax.xlane.f32.xlu0 %v2197_v10  ;;  %v2574_v10 = vld [vmem:[#allocation25 + $0x60] sm:$0xff]  ;;  %5050 = vmatprep.subr.bf16.mxu1 %v5049_v24  ;;  %v2609_v24 = vld [vmem:[#allocation25 + $0x178] sm:$0xff]  ;;  %v2635_v15 = vld [vmem:[#allocation25 + $0x248] sm:$0xff] }
 0x4d3   : > { %v2629_v33 = vld [vmem:[#allocation25 + $0x218] sm:$0xff]  ;;  %v2638_v39 = vld [vmem:[#allocation25 + $0x260] sm:$0xff] }
 0x4d4   : > { %v2637_v21 = vld [vmem:[#allocation25 + $0x258] sm:$0xff] }
 0x55f   : > { %v2199_v43 = vpop.xlane.xlu0 %2198 }
 0x560   : > { %v2200_v47 = vsub.f32 %v2195_v44, %v2199_v43  ;;  %v5019_v44 = vpack.c.bf16 %v2577_v20, %v2572_v34  ;;  %v2579_v43 = vld [vmem:[#allocation25 + $0x88] sm:$0xff]  ;;  %v5031_v34 = vpack.c.bf16 %v2607_v6, %v2602_v18  ;;  %v2604_v20 = vld [vmem:[#allocation25 + $0x150] sm:$0xff]  ;;  %v2485_v6 = vld [vmem:[#allocation23 + $0x18] sm:$0xff] }
 0x561   : > { %v2639_v18 = vld [vmem:[#allocation25 + $0x268] sm:$0xff] }
 0x562   : > { %v2201_v48 = vmul.f32 1.442695, %v2200_v47  ;;  %v5051_v47 = vpack.c.bf16 %v2579_v43, %v2574_v10  ;;  %5020 = vmatpush1.bf16.msra.mxu0 %v5019_v44  ;;  %v5063_v44 = vpack.c.bf16 %v2609_v24, %v2604_v20  ;;  %v2618_v10 = vld [vmem:[#allocation25 + $0x1c0] sm:$0xff]  ;;  %v2615_v43 = vld [vmem:[#allocation25 + $0x1a8] sm:$0xff]  ;;  %v7608_v24 = vmov 0.0|0.0  }
 0x564   : > { %5515 = vpow2.f32 %v2201_v48  ;;  %v2583_v48 = vld [vmem:[#allocation25 + $0xa8] sm:$0xff]  ;;  %5052 = vmatpush1.bf16.msra.mxu1 %v5051_v47 }
 0x56e   : > { %v5516_v45 = vpop.eup %5515 }
 0x56f   : > { %v2203_v46 = vsel %vm2196_vm13, %v5516_v45, 0.0 }
 0x570   : > { %2204 = vadd.xlane.f32.xlu1 %v2203_v46  ;;  %v2585_v46 = vld [vmem:[#allocation25 + $0xb8] sm:$0xff] }
 0x5fd   : > { %v2205_v23 = vpop.xlane.xlu1 %2204 }
 0x5fe   : > { %5517 = vrcp.f32 %v2205_v23 }
 0x608   : > { %v5518_v59 = vpop.eup %5517 }
 0x609   : > { %v2207_v42 = vmul.f32 %v5518_v59, %v5516_v45  ;;  %v2588_v45 = vld [vmem:[#allocation25 + $0xd0] sm:$0xff]  ;;  %v2590_v59 = vld [vmem:[#allocation25 + $0xe0] sm:$0xff] }
 0x60a   : > { %v5021_v23 = vpack.c.bf16 %v2588_v45, %v2583_v48  ;;  %v2620_v48 = vld [vmem:[#allocation25 + $0x1d0] sm:$0xff] }
 0x60b   : > { %2208 = vst.msk [vmem:[#allocation4] sm:$0xff] %vm2196_vm13, %v2207_v42  ;;  %v2212_v57 = vrot.slane %v2207_v42, %v6783_v63  ;;  %v2231_v12 = vrot.slane %v2207_v42, %v6786_v0  ;;  %v2250_v28 = vrot.slane %v2207_v42, %v6775_v50  ;;  %v2269_v7 = vrot.slane %v2207_v42, %v6778_v52  ;;  %v2612_v45 = vld [vmem:[#allocation25 + $0x190] sm:$0xff] }
 0x60c   : > { %v2288_v36 = vrot.slane %v2207_v42, %v6789_v1  ;;  %v2307_v53 = vrot.slane %v2207_v42, %v2306_v60  ;;  %v7028_v17 = vrot.slane %v2207_v42, %v2325_v29  ;;  %v7032_v14 = vrot.slane %v2207_v42, %v2344_v26  ;;  %v2582_v42 = vld [vmem:[#allocation25 + $0xa0] sm:$0xff]  ;;  %v2589_v60 = vld [vmem:[#allocation25 + $0xd8] sm:$0xff]  ;;  %5022 = vmatprep.subr.bf16.mxu0 %v5021_v23 }
 0x60d   : > { %2218 = vbcast.lane.b32.xlu1 %v2212_v57, 264  ;;  %2214 = vbcast.lane.b32.xlu0 %v2212_v57, 256  ;;  %v2598_v26 = vld [vmem:[#allocation25 + $0x120] sm:$0xff]  ;;  %v5065_v23 = vpack.c.bf16 %v2620_v48, %v2615_v43 }
 0x611   : > { %2233 = vbcast.lane.b32.xlu1 %v2231_v12, 256  ;;  %2252 = vbcast.lane.b32.xlu0 %v2250_v28, 256 }
 0x615   : > { %2237 = vbcast.lane.b32.xlu1 %v2231_v12, 264  ;;  %2222 = vbcast.lane.b32.xlu0 %v2212_v57, 272 }
 0x619   : > { %2256 = vbcast.lane.b32.xlu1 %v2250_v28, 264  ;;  %2271 = vbcast.lane.b32.xlu0 %v2269_v7, 256 }
 0x61d   : > { %2241 = vbcast.lane.b32.xlu1 %v2231_v12, 272  ;;  %2260 = vbcast.lane.b32.xlu0 %v2250_v28, 272 }
 0x621   : > { %2275 = vbcast.lane.b32.xlu1 %v2269_v7, 264  ;;  %2294 = vbcast.lane.b32.xlu0 %v2288_v36, 264 }
 0x625   : > { %2290 = vbcast.lane.b32.xlu1 %v2288_v36, 256  ;;  %2245 = vbcast.lane.b32.xlu0 %v2231_v12, 280  ;;  %v5053_v12 = vpack.c.bf16 %v2590_v59, %v2585_v46  ;;  %v2617_v46 = vld [vmem:[#allocation25 + $0x1b8] sm:$0xff] }
 0x626   : > { %v5035_v59 = vpack.c.bf16 %v2617_v46, %v2612_v45 }
 0x627   : > { %5054 = vmatprep.subr.bf16.mxu1 %v5053_v12 }
 0x629   : > { %2226 = vbcast.lane.b32.xlu1 %v2212_v57, 280  ;;  %2309 = vbcast.lane.b32.xlu0 %v2307_v53, 256  ;;  %v2587_v57 = vld [vmem:[#allocation25 + $0xc8] sm:$0xff] }
 0x62d   : > { %2279 = vbcast.lane.b32.xlu1 %v2269_v7, 272  ;;  %2264 = vbcast.lane.b32.xlu0 %v2250_v28, 280  ;;  %v5023_v28 = vpack.c.bf16 %v2587_v57, %v2582_v42  ;;  %v2614_v42 = vld [vmem:[#allocation25 + $0x1a0] sm:$0xff]  ;;  %v2619_v57 = vld [vmem:[#allocation25 + $0x1c8] sm:$0xff] }
 0x62e   : > { %v5067_v12 = vpack.c.bf16 %v2619_v57, %v2614_v42 }
 0x62f   : > { %5024 = vmatpush1.bf16.msra.mxu0 %v5023_v28  ;;  %v2623_v28 = vld [vmem:[#allocation25 + $0x1e8] sm:$0xff] }
 0x631   : > { %2313 = vbcast.lane.b32.xlu1 %v2307_v53, 264  ;;  %2328 = vbcast.lane.b32.xlu0 %v7028_v17, 256 }
 0x635   : > { %2298 = vbcast.lane.b32.xlu1 %v2288_v36, 272  ;;  %2283 = vbcast.lane.b32.xlu0 %v2269_v7, 280  ;;  %v2584_v7 = vld [vmem:[#allocation25 + $0xb0] sm:$0xff] }
 0x636   : > { %v5055_v29 = vpack.c.bf16 %v2589_v60, %v2584_v7  ;;  %v2628_v7 = vld [vmem:[#allocation25 + $0x210] sm:$0xff]  ;;  %v2625_v60 = vld [vmem:[#allocation25 + $0x1f8] sm:$0xff] }
 0x638   : > { %5056 = vmatpush1.bf16.msra.mxu1 %v5055_v29  ;;  %v5037_v29 = vpack.c.bf16 %v2628_v7, %v2623_v28 }
 0x639   : > { %2332 = vbcast.lane.b32.xlu1 %v7028_v17, 264  ;;  %2347 = vbcast.lane.b32.xlu0 %v7032_v14, 256 }
 0x63a   : > { %5058 = vmatprep.subr.bf16.mxu1 %v5057_v54  ;;  %v2633_v54 = vld [vmem:[#allocation25 + $0x238] sm:$0xff] }
 0x63c   : > { %5060 = vmatpush1.bf16.msra.mxu1 %v5059_v8  ;;  %v5041_v8 = vpack.c.bf16 %v2638_v39, %v2633_v54 }
 0x63d   : > { %2317 = vbcast.lane.b32.xlu1 %v2307_v53, 272  ;;  %2302 = vbcast.lane.b32.xlu0 %v2288_v36, 280  ;;  %v2593_v36 = vld [vmem:[#allocation25 + $0xf8] sm:$0xff] }
 0x63e   : > { %v5025_v4 = vpack.c.bf16 %v2598_v26, %v2593_v36  ;;  %5062 = vmatprep.subr.bf16.mxu1 %v5061_v3  ;;  %v2630_v36 = vld [vmem:[#allocation25 + $0x220] sm:$0xff] }
 0x63f   : > { %v2622_v26 = vld [vmem:[#allocation25 + $0x1e0] sm:$0xff] }
 0x640   : > { %5026 = vmatprep.subr.bf16.mxu0 %v5025_v4  ;;  %5064 = vmatpush1.bf16.msra.mxu1 %v5063_v44  ;;  %v5069_v4 = vpack.c.bf16 %v2630_v36, %v2625_v60  ;;  %v5039_v56 = vpack.c.bf16 %v2627_v62, %v2622_v26  ;;  %v2490_v3 = vld [vmem:[#allocation23 + $0x40] sm:$0xff] }
 0x641   : > { %2351 = vbcast.lane.b32.xlu1 %v7032_v14, 264  ;;  %2321 = vbcast.lane.b32.xlu0 %v2307_v53, 280  ;;  %v2603_v53 = vld [vmem:[#allocation25 + $0x148] sm:$0xff]  ;;  %v5133_v20 = vpack.c.bf16 %v2490_v3, %v2485_v6 }
 0x642   : > { %5028 = vmatpush1.bf16.msra.mxu0 %v5027_v31  ;;  %v5029_v49 = vpack.c.bf16 %v2608_v41, %v2603_v53  ;;  %5066 = vmatprep.subr.bf16.mxu1 %v5065_v23  ;;  %v5071_v31 = vpack.c.bf16 %v2629_v33, %v2624_v61  ;;  %v2632_v41 = vld [vmem:[#allocation25 + $0x230] sm:$0xff] }
 0x643   : > { %v5043_v38 = vpack.c.bf16 %v2637_v21, %v2632_v41  ;;  %v7609_v6 = vld [vmem:[#allocation47_spill] sm:$0xff] }
 0x644   : > { %5030 = vmatprep.subr.bf16.mxu0 %v5029_v49  ;;  %5068 = vmatpush1.bf16.msra.mxu1 %v5067_v12  ;;  %v2634_v49 = vld [vmem:[#allocation25 + $0x240] sm:$0xff] }
 0x645   : > { %2336 = vbcast.lane.b32.xlu1 %v7028_v17, 272  ;;  %2340 = vbcast.lane.b32.xlu0 %v7028_v17, 280  ;;  %v2613_v17 = vld [vmem:[#allocation25 + $0x198] sm:$0xff] }
 0x646   : > { %5032 = vmatpush1.bf16.msra.mxu0 %v5031_v34  ;;  %v5033_v47 = vpack.c.bf16 %v2618_v10, %v2613_v17  ;;  %5070 = vmatprep.subr.bf16.mxu1 %v5069_v4  ;;  %v5075_v34 = vpack.c.bf16 %v2639_v18, %v2634_v49 }
 0x648   : > { %5034 = vmatprep.subr.bf16.mxu0 %v5033_v47  ;;  %5072 = vmatpush1.bf16.msra.mxu1 %v5071_v31 }
 0x649   : > { %2355 = vbcast.lane.b32.xlu1 %v7032_v14, 272 }
 0x64a   : > { %5036 = vmatpush1.bf16.msra.mxu0 %v5035_v59 }
 0x64b   : > { %5038 = vmatprep.subr.bf16.mxu0 %v5037_v29 }
 0x64d   : > { %2359 = vbcast.lane.b32.xlu1 %v7032_v14, 280  ;;  %v2640_v14 = vld [vmem:[#allocation25 + $0x270] sm:$0xff] }
 0x64e   : > { %v5073_v53 = vpack.c.bf16 %v2640_v14, %v2635_v15  ;;  %5040 = vmatpush1.bf16.msra.mxu0 %v5039_v56 }
 0x64f   : > { %5042 = vmatprep.subr.bf16.mxu0 %v5041_v8 }
 0x650   : > { %5074 = vmatprep.subr.bf16.mxu1 %v5073_v53 }
 0x651   : > { %5076 = vmatpush1.bf16.msra.mxu1 %v5075_v34 }
 0x652   : > { %5044 = vmatpush1.bf16.msra.mxu0 %v5043_v38  ;;  %5134 = vmatprep.subr.bf16.mxu1 %v5133_v20 }
 0x653   : > { %5077 = vmatprep.subr.bf16.mxu0 %v7608_v24 }
 0x67f   : > { %v2219_v44 = vpop.permute.xlu1 %2218  ;;  %v2215_v17 = vpop.permute.xlu0 %2214 }
 0x680   : > { %v2362_v4 = vmul.f32 %v2219_v44, %v6819_v9  ;;  %v2361_v56 = vmul.f32 %v2215_v17, %v6811_v2  ;;  %v7610_v44 = vld [vmem:[#allocation48_spill] sm:$0xff] }
 0x682   : > { %v2393_v15 = vadd.f32 %v2362_v4, %v2361_v56  ;;  %v7614_v4 = vld [vmem:[#allocation52_spill] sm:$0xff] }
 0x683   : > { %v2234_v10 = vpop.permute.xlu1 %2233  ;;  %v2253_v43 = vpop.permute.xlu0 %2252 }
 0x684   : > { %v2365_v14 = vmul.f32 %v2234_v10, %v6815_v5  ;;  %v2369_v53 = vmul.f32 %v2253_v43, %v6841_v25 }
 0x687   : > { %v2238_v47 = vpop.permute.xlu1 %2237  ;;  %v2223_v48 = vpop.permute.xlu0 %2222 }
 0x688   : > { %v2366_v61 = vmul.f32 %v2238_v47, %v6822_v11  ;;  %v2363_v33 = vmul.f32 %v2223_v48, %v6825_v13 }
 0x68a   : > { %v2402_v11 = vadd.f32 %v2366_v61, %v2365_v14  ;;  %v2394_v49 = vadd.f32 %v2393_v15, %v2363_v33  ;;  %v7615_v61 = vld [vmem:[#allocation53_spill] sm:$0xff] }
 0x68b   : > { %v2257_v45 = vpop.permute.xlu1 %2256  ;;  %v2272_v46 = vpop.permute.xlu0 %2271 }
 0x68c   : > { %v2370_v54 = vmul.f32 %v2257_v45, %v6837_v22  ;;  %v2373_v13 = vmul.f32 %v2272_v46, %v6871_v51 }
 0x68e   : > { %v2411_v38 = vadd.f32 %v2370_v54, %v2369_v53 }
 0x68f   : > { %v2242_v23 = vpop.permute.xlu1 %2241  ;;  %v2261_v59 = vpop.permute.xlu0 %2260 }
 0x690   : > { %v2367_v41 = vmul.f32 %v2242_v23, %v6828_v16  ;;  %v2371_v9 = vmul.f32 %v2261_v59, %v6848_v30 }
 0x692   : > { %v2403_v51 = vadd.f32 %v2402_v11, %v2367_v41  ;;  %v2412_v34 = vadd.f32 %v2411_v38, %v2371_v9 }
 0x693   : > { %v2276_v42 = vpop.permute.xlu1 %2275  ;;  %v2295_v57 = vpop.permute.xlu0 %2294 }
 0x694   : > { %v2374_v8 = vmul.f32 %v2276_v42, %v6868_v58  ;;  %v2378_v30 = vmul.f32 %v2295_v57, %v6855_v35  ;;  %v7612_v35 = vld [vmem:[#allocation50_spill] sm:$0xff] }
 0x696   : > { %v2420_v16 = vadd.f32 %v2374_v8, %v2373_v13 }
 0x697   : > { %v2291_v12 = vpop.permute.xlu1 %2290  ;;  %v2246_v28 = vpop.permute.xlu0 %2245 }
 0x698   : > { %v2377_v22 = vmul.f32 %v2291_v12, %v6858_v37  ;;  %v2368_v5 = vmul.f32 %v2246_v28, %v6844_v27  ;;  %v7611_v27 = vld [vmem:[#allocation49_spill] sm:$0xff] }
 0x69a   : > { %v2429_v20 = vadd.f32 %v2378_v30, %v2377_v22  ;;  %v2404_v10 = vadd.f32 %v2403_v51, %v2368_v5  ;;  %v7617_v22 = vld [vmem:[#allocation54_spill] sm:$0xff]  ;;  %v7618_v5 = vld [vmem:[#allocation56_spill] sm:$0xff]  ;;  %v7619_v30 = vld [vmem:[#allocation55_spill] sm:$0xff] }
 0x69b   : > { %v2227_v7 = vpop.permute.xlu1 %2226  ;;  %v2310_v60 = vpop.permute.xlu0 %2309 }
 0x69c   : > { %v2364_v2 = vmul.f32 %v2227_v7, %v6833_v19  ;;  %v2381_v43 = vmul.f32 %v2310_v60, %v7611_v27  ;;  %v2405_v28 = vrot.slane %v2404_v10, 4 }
 0x69e   : > { %v2395_v37 = vadd.f32 %v2394_v49, %v2364_v2  ;;  %v2406_v8 = vadd.f32 %v2405_v28, %v2404_v10 }
 0x69f   : > { %v2280_v29 = vpop.permute.xlu1 %2279  ;;  %v2265_v36 = vpop.permute.xlu0 %2264 }
 0x6a0   : > { %v2375_v21 = vmul.f32 %v2280_v29, %v6875_v55  ;;  %v2372_v58 = vmul.f32 %v2265_v36, %v6851_v32  ;;  %v2396_v42 = vrot.slane %v2395_v37, 4 }
 0x6a2   : > { %v2421_v55 = vadd.f32 %v2420_v16, %v2375_v21  ;;  %v2413_v32 = vadd.f32 %v2412_v34, %v2372_v58  ;;  %v2397_v54 = vadd.f32 %v2396_v42, %v2395_v37  ;;  %v7620_v34 = vld [vmem:[#allocation57_spill] sm:$0xff] }
 0x6a3   : > { %v2314_v26 = vpop.permute.xlu1 %2313  ;;  %v2329_v62 = vpop.permute.xlu0 %2328 }
 0x6a4   : > { %v2382_v17 = vmul.f32 %v2314_v26, %v7610_v44  ;;  %v2414_v7 = vrot.slane %v2413_v32, 4  ;;  %v2398_v49 = vrot.slane %v2397_v54, 2 }
 0x6a6   : > { %v2438_v57 = vadd.f32 %v2382_v17, %v2381_v43  ;;  %v2415_v53 = vadd.f32 %v2414_v7, %v2413_v32  ;;  %v2399_v10 = vadd.f32 %v2398_v49, %v2397_v54  ;;  %v2489_v49 = vld [vmem:[#allocation23 + $0x38] sm:$0xff] }
 0x6a7   : > { %v2299_v31 = vpop.permute.xlu1 %2298  ;;  %v2284_v39 = vpop.permute.xlu0 %2283 }
 0x6a8   : > { %v2379_v19 = vmul.f32 %v2299_v31, %v6861_v40  ;;  %v2376_v3 = vmul.f32 %v2284_v39, %v7609_v6  ;;  %v7613_v40 = vld [vmem:[#allocation46_spill] sm:$0xff]  ;;  %v7616_v39 = vld [vmem:[#allocation51_spill] sm:$0xff]  ;;  %v2407_v6 = vrot.slane %v2406_v8, 2 }
 0x6a9   : > { %v2385_v15 = vmul.f32 %v2329_v62, %v7616_v39  ;;  %v2416_v62 = vrot.slane %v2415_v53, 2 }
 0x6aa   : > { %v2430_v45 = vadd.f32 %v2429_v20, %v2379_v19  ;;  %v2422_v46 = vadd.f32 %v2421_v55, %v2376_v3  ;;  %v7621_v55 = vld [vmem:[#allocation58_spill] sm:$0xff] }
 0x6ab   : > { %v2333_v25 = vpop.permute.xlu1 %2332  ;;  %v2348_v18 = vpop.permute.xlu0 %2347 }
 0x6ac   : > { %v2423_v26 = vrot.slane %v2422_v46, 4  ;;  %v2386_v56 = vmul.f32 %v2333_v25, %v7614_v4  ;;  %v2389_v37 = vmul.f32 %v2348_v18, %v7620_v34 }
 0x6ae   : > { %v2424_v2 = vadd.f32 %v2423_v26, %v2422_v46  ;;  %v2447_v11 = vadd.f32 %v2386_v56, %v2385_v15 }
 0x6af   : > { %v2318_v47 = vpop.permute.xlu1 %2317  ;;  %v2303_v48 = vpop.permute.xlu0 %2302 }
 0x6b0   : > { %v2383_v23 = vmul.f32 %v2318_v47, %v7612_v35  ;;  %v2380_v59 = vmul.f32 %v2303_v48, %v7613_v40  ;;  %v2425_v51 = vrot.slane %v2424_v2, 2  ;;  %v2408_v47 = vadd.f32 %v2407_v6, %v2406_v8  ;;  %v7622_v40 = vld [vmem:[#allocation59_spill] sm:$0xff] }
 0x6b1   : > { %v2417_v48 = vadd.f32 %v2416_v62, %v2415_v53 }
 0x6b2   : > { %v2431_v12 = vadd.f32 %v2430_v45, %v2380_v59  ;;  %v2439_v60 = vadd.f32 %v2438_v57, %v2383_v23  ;;  %v2426_v46 = vadd.f32 %v2425_v51, %v2424_v2  ;;  %v2400_v57 = vrot.slane %v2399_v10, 1  ;;  %v2566_v2 = vld [vmem:[#allocation25 + $0x20] sm:$0xff] }
 0x6b3   : > { %v2352_v29 = vpop.permute.xlu1 %2351  ;;  %v2322_v36 = vpop.permute.xlu0 %2321  ;;  %v2418_v7 = vrot.slane %v2417_v48, 1 }
 0x6b4   : > { %v2384_v33 = vmul.f32 %v2322_v36, %v7615_v61  ;;  %v2432_v31 = vrot.slane %v2431_v12, 4  ;;  %v2390_v58 = vmul.f32 %v2352_v29, %v7618_v5  ;;  %v2409_v29 = vrot.slane %v2408_v47, 1 }
 0x6b5   : > { %v2427_v36 = vrot.slane %v2426_v46, 1  ;;  %v7076_v54 = vadd.f32 %v2418_v7, %v2417_v48  ;;  %v2591_v48 = vld [vmem:[#allocation25 + $0xe8] sm:$0xff] }
 0x6b6   : > { %v2440_v14 = vadd.f32 %v2439_v60, %v2384_v33  ;;  %v2433_v38 = vadd.f32 %v2432_v31, %v2431_v12  ;;  %v2456_v27 = vadd.f32 %v2390_v58, %v2389_v37  ;;  %v7074_v60 = vadd.f32 %v2400_v57, %v2399_v10  ;;  %v2495_v58 = vld [vmem:[#allocation23 + $0x68] sm:$0xff]  ;;  %v2581_v37 = vld [vmem:[#allocation25 + $0x98] sm:$0xff]  ;;  %v2510_v10 = vld [vmem:[#allocation23 + $0xe0] sm:$0xff] }
 0x6b7   : > { %v2337_v41 = vpop.permute.xlu1 %2336  ;;  %v2341_v9 = vpop.permute.xlu0 %2340  ;;  %v7078_v39 = vadd.f32 %v2409_v29, %v2408_v47  ;;  %v7080_v15 = vadd.f32 %v2427_v36, %v2426_v46  ;;  %v2509_v46 = vld [vmem:[#allocation23 + $0xd8] sm:$0xff]  ;;  %v2596_v57 = vld [vmem:[#allocation25 + $0x110] sm:$0xff]  ;;  %v2519_v7 = vld [vmem:[#allocation23 + $0x128] sm:$0xff] }
 0x6b8   : > { %v2441_v13 = vrot.slane %v2440_v14, 4  ;;  %v2387_v21 = vmul.f32 %v2337_v41, %v7617_v22  ;;  %v2388_v19 = vmul.f32 %v2341_v9, %v7619_v30  ;;  %v2434_v17 = vrot.slane %v2433_v38, 2  ;;  %v2571_v22 = vld [vmem:[#allocation25 + $0x48] sm:$0xff]  ;;  %v2525_v29 = vld [vmem:[#allocation23 + $0x158] sm:$0xff]  ;;  %v2530_v36 = vld [vmem:[#allocation23 + $0x180] sm:$0xff] }
 0x6b9   : > { %v2473_v53 = vsel %vm2180_vm5, %v7078_v39, %v7074_v60  ;;  %v5078_v6 = vpack.c.bf16 %v2571_v22, %v2566_v2  ;;  %v2616_v22 = vld [vmem:[#allocation25 + $0x1b0] sm:$0xff] }
 0x6ba   : > { %v2442_v25 = vadd.f32 %v2441_v13, %v2440_v14  ;;  %v2448_v16 = vadd.f32 %v2447_v11, %v2387_v21  ;;  %v2435_v42 = vadd.f32 %v2434_v17, %v2433_v38  ;;  %v2474_v11 = vsel %vm2182_vm6, %v7076_v54, %v2473_v53  ;;  %v2484_v21 = vld [vmem:[#allocation23 + $0x10] sm:$0xff]  ;;  %v2505_v17 = vld [vmem:[#allocation23 + $0xb8] sm:$0xff]  ;;  %v2535_v53 = vld [vmem:[#allocation23 + $0x1a8] sm:$0xff] }
 0x6bb   : > { %v2356_v3 = vpop.permute.xlu1 %2355  ;;  %v2475_v38 = vsel %vm2184_vm7, %v7080_v15, %v2474_v11  ;;  %v5135_v62 = vpack.c.bf16 %v2489_v49, %v2484_v21  ;;  %v5141_v47 = vpack.c.bf16 %v2510_v10, %v2505_v17  ;;  %v2621_v49 = vld [vmem:[#allocation25 + $0x1d8] sm:$0xff]  ;;  %v2636_v10 = vld [vmem:[#allocation25 + $0x250] sm:$0xff] }
 0x6bc   : > { %v2449_v20 = vadd.f32 %v2448_v16, %v2388_v19  ;;  %v2391_v44 = vmul.f32 %v2356_v3, %v7621_v55  ;;  %v2443_v43 = vrot.slane %v2442_v25, 2  ;;  %v2436_v56 = vrot.slane %v2435_v42, 1  ;;  %v2576_v3 = vld [vmem:[#allocation25 + $0x70] sm:$0xff]  ;;  %v2499_v55 = vld [vmem:[#allocation23 + $0x88] sm:$0xff] }
 0x6be   : > { %v2450_v32 = vrot.slane %v2449_v20, 4  ;;  %v2457_v23 = vadd.f32 %v2456_v27, %v2391_v44  ;;  %v2444_v12 = vadd.f32 %v2443_v43, %v2442_v25  ;;  %v7082_v8 = vadd.f32 %v2436_v56, %v2435_v42  ;;  %v2500_v25 = vld [vmem:[#allocation23 + $0x90] sm:$0xff]  ;;  %v2606_v56 = vld [vmem:[#allocation25 + $0x160] sm:$0xff] }
 0x6bf   : > { %v2360_v45 = vpop.permute.xlu1 %2359  ;;  %v5137_v34 = vpack.c.bf16 %v2500_v25, %v2495_v58  ;;  %v5081_v27 = vpack.c.bf16 %v2581_v37, %v2576_v3  ;;  %v2545_v58 = vld [vmem:[#allocation23 + $0x1f8] sm:$0xff]  ;;  %v2550_v25 = vld [vmem:[#allocation23 + $0x220] sm:$0xff]  ;;  %v2631_v3 = vld [vmem:[#allocation25 + $0x228] sm:$0xff] }
 0x6c0   : > { %v2451_v35 = vadd.f32 %v2450_v32, %v2449_v20  ;;  %v2392_v59 = vmul.f32 %v2360_v45, %v7622_v40  ;;  %v2445_v61 = vrot.slane %v2444_v12, 1  ;;  %v2476_v16 = vsel %vm2186_vm8, %v7082_v8, %v2475_v38  ;;  %v2494_v20 = vld [vmem:[#allocation23 + $0x60] sm:$0xff]  ;;  %v2504_v45 = vld [vmem:[#allocation23 + $0xb0] sm:$0xff]  ;;  %v2555_v37 = vld [vmem:[#allocation23 + $0x248] sm:$0xff] }
 0x6c1   : > { %v5139_v43 = vpack.c.bf16 %v2499_v55, %v2494_v20  ;;  %v2586_v32 = vld [vmem:[#allocation25 + $0xc0] sm:$0xff]  ;;  %v7623_v40 = vmov 0.0   ;;  %v5143_v42 = vpack.c.bf16 %v2509_v46, %v2504_v45  ;;  %v2560_v20 = vld [vmem:[#allocation23 + $0x270] sm:$0xff] }
 0x6c2   : > { %v2452_v18 = vrot.slane %v2451_v35, 2  ;;  %v2458_v28 = vadd.f32 %v2457_v23, %v2392_v59  ;;  %v7087_v41 = vadd.f32 %v2445_v61, %v2444_v12  ;;  %v2520_v23 = vld [vmem:[#allocation23 + $0x130] sm:$0xff]  ;;  %v5084_v59 = vpack.c.bf16 %v2591_v48, %v2586_v32  ;;  %v2534_v38 = vld [vmem:[#allocation23 + $0x1a0] sm:$0xff]  ;;  %v2483_v48 = vld [vmem:[#allocation23 + $0x8] sm:$0xff] }
 0x6c3   : > { %v5149_v61 = vpack.c.bf16 %v2530_v36, %v2525_v29  ;;  %v2554_v32 = vld [vmem:[#allocation23 + $0x240] sm:$0xff]  ;;  %v2488_v45 = vld [vmem:[#allocation23 + $0x30] sm:$0xff] }
 0x6c4   : > { %v2453_v26 = vadd.f32 %v2452_v18, %v2451_v35  ;;  %v2459_v4 = vrot.slane %v2458_v28, 4  ;;  %v2477_v19 = vsel %vm2188_vm9, %v7087_v41, %v2476_v16  ;;  %v2515_v35 = vld [vmem:[#allocation23 + $0x108] sm:$0xff]  ;;  %v2601_v18 = vld [vmem:[#allocation25 + $0x138] sm:$0xff]  ;;  %v5093_v16 = vpack.c.bf16 %v2621_v49, %v2616_v22  ;;  %v2492_v36 = vld [vmem:[#allocation23 + $0x50] sm:$0xff] }
 0x6c5   : > { %v5145_v12 = vpack.c.bf16 %v2520_v23, %v2515_v35  ;;  %v2482_v23 = vld [vmem:[#allocation23] sm:$0xff]  ;;  %v2507_v22 = vld [vmem:[#allocation23 + $0xc8] sm:$0xff] }
 0x6c6   : > { %v2460_v33 = vadd.f32 %v2459_v4, %v2458_v28  ;;  %v2454_v31 = vrot.slane %v2453_v26, 1  ;;  %v2514_v28 = vld [vmem:[#allocation23 + $0x100] sm:$0xff]  ;;  %v2511_v49 = vld [vmem:[#allocation23 + $0xe8] sm:$0xff] }
 0x6c7   : > { %v5147_v4 = vpack.c.bf16 %v2519_v7, %v2514_v28  ;;  %v2498_v28 = vld [vmem:[#allocation23 + $0x80] sm:$0xff] }
 0x6c8   : > { %v2461_v14 = vrot.slane %v2460_v33, 2  ;;  %v7091_v13 = vadd.f32 %v2454_v31, %v2453_v26  ;;  %v5087_v26 = vpack.c.bf16 %v2601_v18, %v2596_v57  ;;  %v2524_v31 = vld [vmem:[#allocation23 + $0x150] sm:$0xff]  ;;  %v2486_v57 = vld [vmem:[#allocation23 + $0x20] sm:$0xff]  ;;  %v2493_v18 = vld [vmem:[#allocation23 + $0x58] sm:$0xff] }
 0x6ca   : > { %v2462_v9 = vadd.f32 %v2461_v14, %v2460_v33  ;;  %v2478_v51 = vsel %vm2190_vm10, %v7091_v13, %v2477_v19  ;;  %v2611_v33 = vld [vmem:[#allocation25 + $0x188] sm:$0xff]  ;;  %v2529_v14 = vld [vmem:[#allocation23 + $0x178] sm:$0xff] }
 0x6cb   : > { %v5090_v2 = vpack.c.bf16 %v2611_v33, %v2606_v56  ;;  %v5151_v11 = vpack.c.bf16 %v2529_v14, %v2524_v31  ;;  %v2496_v56 = vld [vmem:[#allocation23 + $0x70] sm:$0xff]  ;;  %v2503_v33 = vld [vmem:[#allocation23 + $0xa8] sm:$0xff]  ;;  %v7624_v14 = vld [vmem:[#allocation45_spill] sm:$0xff] }
 0x6cc   : > { %v2463_v5 = vrot.slane %v2462_v9, 1  ;;  %v2508_v31 = vld [vmem:[#allocation23 + $0xd0] sm:$0xff] }
 0x6ce   : > { %v7097_v30 = vadd.f32 %v2463_v5, %v2462_v9  ;;  %v2540_v9 = vld [vmem:[#allocation23 + $0x1d0] sm:$0xff]  ;;  %v2539_v5 = vld [vmem:[#allocation23 + $0x1c8] sm:$0xff] }
 0x6cf   : > { %v5153_v21 = vpack.c.bf16 %v2540_v9, %v2535_v53  ;;  %v5155_v19 = vpack.c.bf16 %v2539_v5, %v2534_v38  ;;  %v2513_v38 = vld [vmem:[#allocation23 + $0xf8] sm:$0xff]  ;;  %v2518_v5 = vld [vmem:[#allocation23 + $0x120] sm:$0xff] }
 0x6d0   : > { %v7105_v44 = vsel %vm2192_vm11, %v7097_v30, %v2478_v51  ;;  %v2544_v51 = vld [vmem:[#allocation23 + $0x1f0] sm:$0xff] }
 0x6d1   : > { %2481 = vst [vmem:[#allocation32] sm:$0xff] %v7105_v44  ;;  %2741 = vmatmul.mubr.f32.vlgmr.msra.gmra.mrb[6].mxu0 %v7105_v44  ;;  %2812 = vmatmul.mubr.f32.vlgmr.msra.gmra.mrb[6].mxu1 %v7105_v44 }
 0x6d2   : > { %5079 = vmatpush3.bf16.msra.mxu0 %v5078_v6  ;;  %5136 = vmatpush1.bf16.msra.mxu1 %v5135_v62  ;;  %v2626_v6 = vld [vmem:[#allocation25 + $0x200] sm:$0xff]  ;;  %v5157_v62 = vpack.c.bf16 %v2550_v25, %v2545_v58 }
 0x6d3   : > { %5080 = vmatprep.subr.bf16.mxu0 %v7608_v24  ;;  %5138 = vmatprep.subr.bf16.mxu1 %v5137_v34  ;;  %v2549_v34 = vld [vmem:[#allocation23 + $0x218] sm:$0xff]  ;;  %v5096_v55 = vpack.c.bf16 %v2631_v3, %v2626_v6 }
 0x6d4   : > { %4626 = vmatprep.mubr.msk.f32.mxu0 %vm6143_vm1, %v7623_v40  ;;  %3023 = vmatprep.mubr.f32.mxu1 %v7623_v40  ;;  %v5159_v17 = vpack.c.bf16 %v2549_v34, %v2544_v51  ;;  %v2517_v6 = vld [vmem:[#allocation23 + $0x118] sm:$0xff]  ;;  %v2523_v51 = vld [vmem:[#allocation23 + $0x148] sm:$0xff]  ;;  %v2528_v34 = vld [vmem:[#allocation23 + $0x170] sm:$0xff] }
 0x6d5   : > { %v2521_v3 = vld [vmem:[#allocation23 + $0x138] sm:$0xff] }
 0x6d6   : > { %5082 = vmatpush3.bf16.msra.mxu0 %v5081_v27  ;;  %5140 = vmatpush1.bf16.msra.mxu1 %v5139_v43  ;;  %v5161_v27 = vpack.c.bf16 %v2560_v20, %v2555_v37  ;;  %v2641_v43 = vld [vmem:[#allocation25 + $0x278] sm:$0xff] }
 0x6d7   : > { %5083 = vmatprep.subr.bf16.mxu0 %v7608_v24  ;;  %5142 = vmatprep.subr.bf16.mxu1 %v5141_v47  ;;  %v2559_v47 = vld [vmem:[#allocation23 + $0x268] sm:$0xff]  ;;  %v5099_v46 = vpack.c.bf16 %v2641_v43, %v2636_v10 }
 0x6d8   : > { %v5163_v35 = vpack.c.bf16 %v2559_v47, %v2554_v32  ;;  %v2527_v10 = vld [vmem:[#allocation23 + $0x168] sm:$0xff]  ;;  %v2533_v32 = vld [vmem:[#allocation23 + $0x198] sm:$0xff]  ;;  %v2538_v47 = vld [vmem:[#allocation23 + $0x1c0] sm:$0xff] }
 0x6d9   : > { %v2531_v43 = vld [vmem:[#allocation23 + $0x188] sm:$0xff] }
 0x6da   : > { %5085 = vmatpush3.bf16.msra.mxu0 %v5084_v59  ;;  %5144 = vmatpush1.bf16.msra.mxu1 %v5143_v42  ;;  %v5101_v59 = vpack.c.bf16 %v2488_v45, %v2483_v48  ;;  %v2487_v42 = vld [vmem:[#allocation23 + $0x28] sm:$0xff] }
 0x6db   : > { %5086 = vmatprep.subr.bf16.mxu0 %v7608_v24  ;;  %5146 = vmatprep.subr.bf16.mxu1 %v5145_v12  ;;  %v2491_v12 = vld [vmem:[#allocation23 + $0x48] sm:$0xff]  ;;  %v5103_v7 = vpack.c.bf16 %v2487_v42, %v2482_v23  ;;  %v2537_v23 = vld [vmem:[#allocation23 + $0x1b8] sm:$0xff] }
 0x6dc   : > { %v5166_v29 = vpack.c.bf16 %v2491_v12, %v2486_v57  ;;  %v2541_v42 = vld [vmem:[#allocation23 + $0x1d8] sm:$0xff]  ;;  %v2543_v57 = vld [vmem:[#allocation23 + $0x1e8] sm:$0xff]  ;;  %v2548_v12 = vld [vmem:[#allocation23 + $0x210] sm:$0xff] }
 0x6de   : > { %5088 = vmatpush3.bf16.msra.mxu0 %v5087_v26  ;;  %5148 = vmatpush1.bf16.msra.mxu1 %v5147_v4  ;;  %v5105_v26 = vpack.c.bf16 %v2498_v28, %v2493_v18  ;;  %v2497_v4 = vld [vmem:[#allocation23 + $0x78] sm:$0xff] }
 0x6df   : > { %5089 = vmatprep.subr.bf16.mxu0 %v7608_v24  ;;  %5150 = vmatprep.subr.bf16.mxu1 %v5149_v61  ;;  %v2501_v61 = vld [vmem:[#allocation23 + $0x98] sm:$0xff]  ;;  %v5107_v53 = vpack.c.bf16 %v2497_v4, %v2492_v36  ;;  %v2547_v36 = vld [vmem:[#allocation23 + $0x208] sm:$0xff] }
 0x6e0   : > { %v5169_v9 = vpack.c.bf16 %v2501_v61, %v2496_v56  ;;  %v2551_v4 = vld [vmem:[#allocation23 + $0x228] sm:$0xff]  ;;  %v2553_v56 = vld [vmem:[#allocation23 + $0x238] sm:$0xff]  ;;  %v2558_v61 = vld [vmem:[#allocation23 + $0x260] sm:$0xff] }
 0x6e2   : > { %5091 = vmatpush3.bf16.msra.mxu0 %v5090_v2  ;;  %5152 = vmatpush1.bf16.msra.mxu1 %v5151_v11  ;;  %v2502_v2 = vld [vmem:[#allocation23 + $0xa0] sm:$0xff]  ;;  %v5109_v11 = vpack.c.bf16 %v2508_v31, %v2503_v33 }
 0x6e3   : > { %5092 = vmatprep.subr.bf16.mxu0 %v7608_v24  ;;  %5154 = vmatprep.subr.bf16.mxu1 %v5153_v21  ;;  %v2506_v21 = vld [vmem:[#allocation23 + $0xc0] sm:$0xff]  ;;  %v5111_v58 = vpack.c.bf16 %v2507_v22, %v2502_v2  ;;  %v2557_v2 = vld [vmem:[#allocation23 + $0x258] sm:$0xff] }
 0x6e4   : > { %v5172_v25 = vpack.c.bf16 %v2511_v49, %v2506_v21  ;;  %v2561_v22 = vld [vmem:[#allocation23 + $0x278] sm:$0xff] }
 0x6e6   : > { %5094 = vmatpush3.bf16.msra.mxu0 %v5093_v16  ;;  %5156 = vmatpush1.bf16.msra.mxu1 %v5155_v19  ;;  %v2512_v16 = vld [vmem:[#allocation23 + $0xf0] sm:$0xff]  ;;  %v5113_v19 = vpack.c.bf16 %v2518_v5, %v2513_v38  ;;  %v2643_v38 = vld [vmem:[#allocation28] sm:$0xff] }
 0x6e7   : > { %5095 = vmatprep.subr.bf16.mxu0 %v7608_v24  ;;  %5158 = vmatprep.subr.bf16.mxu1 %v5157_v62  ;;  %v2516_v62 = vld [vmem:[#allocation23 + $0x110] sm:$0xff]  ;;  %v5115_v37 = vpack.c.bf16 %v2517_v6, %v2512_v16  ;;  %v2646_v16 = vld [vmem:[#allocation28 + $0x18] sm:$0xff]  ;;  %v2647_v6 = vld [vmem:[#allocation28 + $0x20] sm:$0xff] }
 0x6e8   : > { %v5175_v20 = vpack.c.bf16 %v2521_v3, %v2516_v62  ;;  %v2644_v5 = vld [vmem:[#allocation28 + $0x8] sm:$0xff] }
 0x6e9   : > { %v2648_v62 = vld [vmem:[#allocation28 + $0x28] sm:$0xff] }
 0x6ea   : > { %5097 = vmatpush3.bf16.msra.mxu0 %v5096_v55  ;;  %5160 = vmatpush1.bf16.msra.mxu1 %v5159_v17  ;;  %v2522_v55 = vld [vmem:[#allocation23 + $0x140] sm:$0xff]  ;;  %v5117_v17 = vpack.c.bf16 %v2528_v34, %v2523_v51  ;;  %v5220_v3 = vpack.c.bf16 %v2648_v62, %v2647_v6  ;;  %v2660_v34 = vld [vmem:[#allocation29 + $0x8] sm:$0xff] }
 0x6eb   : > { %5098 = vmatprep.subr.bf16.mxu0 %v7608_v24  ;;  %5162 = vmatprep.subr.bf16.mxu1 %v5161_v27  ;;  %v2526_v27 = vld [vmem:[#allocation23 + $0x160] sm:$0xff]  ;;  %v5119_v48 = vpack.c.bf16 %v2527_v10, %v2522_v55  ;;  %v2661_v10 = vld [vmem:[#allocation29 + $0x10] sm:$0xff] }
 0x6ec   : > { %v5178_v45 = vpack.c.bf16 %v2531_v43, %v2526_v27  ;;  %v2659_v51 = vld [vmem:[#allocation29] sm:$0xff]  ;;  %v2650_v55 = vld [vmem:[#allocation28 + $0x38] sm:$0xff] }
 0x6ed   : > { %v2662_v27 = vld [vmem:[#allocation29 + $0x18] sm:$0xff]  ;;  %v2651_v43 = vld [vmem:[#allocation28 + $0x40] sm:$0xff] }
 0x6ee   : > { %5100 = vmatpush3.bf16.msra.mxu0 %v5099_v46  ;;  %5164 = vmatpush1.bf16.msra.mxu1 %v5163_v35  ;;  %v2532_v46 = vld [vmem:[#allocation23 + $0x190] sm:$0xff]  ;;  %v5121_v35 = vpack.c.bf16 %v2538_v47, %v2533_v32  ;;  %v5193_v32 = vpack.c.bf16 %v2662_v27, %v2661_v10 }
 0x6ef   : > { %5102 = vmatprep.subr.bf16.mxu0 %v5101_v59  ;;  %5165 = vmatprep.subr.bf16.mxu1 %v7608_v24  ;;  %v2536_v59 = vld [vmem:[#allocation23 + $0x1b0] sm:$0xff]  ;;  %v5123_v18 = vpack.c.bf16 %v2537_v23, %v2532_v46 }
 0x6f0   : > { %v5181_v28 = vpack.c.bf16 %v2541_v42, %v2536_v59  ;;  %v2652_v47 = vld [vmem:[#allocation28 + $0x48] sm:$0xff]  ;;  %v2654_v59 = vld [vmem:[#allocation28 + $0x58] sm:$0xff] }
 0x6f1   : > { %4627 = vmatmul.mubr.f32.vlgmr.msra.gmra.mrb[8].mxu0 %v7105_v44  ;;  %3024 = vmatmul.mubr.f32.vlgmr.msra.gmra.mrb[6].mxu1 %v7624_v14  ;;  %v2664_v46 = vld [vmem:[#allocation29 + $0x28] sm:$0xff] }
 0x6f2   : > { %5104 = vmatpush1.bf16.msra.mxu0 %v5103_v7  ;;  %5167 = vmatpush3.bf16.msra.mxu1 %v5166_v29  ;;  %v2542_v7 = vld [vmem:[#allocation23 + $0x1e0] sm:$0xff]  ;;  %v5125_v29 = vpack.c.bf16 %v2548_v12, %v2543_v57  ;;  %v2665_v57 = vld [vmem:[#allocation29 + $0x30] sm:$0xff] }
 0x6f3   : > { %5106 = vmatprep.subr.bf16.mxu0 %v5105_v26  ;;  %5168 = vmatprep.subr.bf16.mxu1 %v7608_v24  ;;  %v2546_v26 = vld [vmem:[#allocation23 + $0x200] sm:$0xff]  ;;  %v5127_v33 = vpack.c.bf16 %v2547_v36, %v2542_v7  ;;  %v2656_v7 = vld [vmem:[#allocation28 + $0x68] sm:$0xff] }
 0x6f4   : > { %2952 = vmatprep.mubr.f32.mxu0 %v7623_v40  ;;  %4661 = vmatprep.mubr.msk.f32.mxu1 %vm6143_vm1, %v7623_v40  ;;  %v5184_v31 = vpack.c.bf16 %v2551_v4, %v2546_v26  ;;  %v2666_v12 = vld [vmem:[#allocation29 + $0x38] sm:$0xff]  ;;  %v2668_v36 = vld [vmem:[#allocation29 + $0x48] sm:$0xff]  ;;  %v2657_v4 = vld [vmem:[#allocation28 + $0x70] sm:$0xff] }
 0x6f6   : > { %5108 = vmatpush1.bf16.msra.mxu0 %v5107_v53  ;;  %5170 = vmatpush3.bf16.msra.mxu1 %v5169_v9  ;;  %v2552_v53 = vld [vmem:[#allocation23 + $0x230] sm:$0xff]  ;;  %v5129_v9 = vpack.c.bf16 %v2558_v61, %v2553_v56  ;;  %v2658_v56 = vld [vmem:[#allocation28 + $0x78] sm:$0xff] }
 0x6f7   : > { %5110 = vmatprep.subr.bf16.mxu0 %v5109_v11  ;;  %5171 = vmatprep.subr.bf16.mxu1 %v7608_v24  ;;  %v2556_v11 = vld [vmem:[#allocation23 + $0x250] sm:$0xff]  ;;  %v5131_v21 = vpack.c.bf16 %v2557_v2, %v2552_v53  ;;  %v2670_v53 = vld [vmem:[#allocation29 + $0x58] sm:$0xff]  ;;  %v2671_v2 = vld [vmem:[#allocation29 + $0x60] sm:$0xff] }
 0x6f8   : > { %v5187_v49 = vpack.c.bf16 %v2561_v22, %v2556_v11  ;;  %v2672_v11 = vld [vmem:[#allocation29 + $0x68] sm:$0xff] }
 0x6f9   : > { %v5208_v22 = vpack.c.bf16 %v2672_v11, %v2671_v2 }
 0x6fa   : > { %5112 = vmatpush1.bf16.msra.mxu0 %v5111_v58  ;;  %5173 = vmatpush3.bf16.msra.mxu1 %v5172_v25  ;;  %v5214_v58 = vpack.c.bf16 %v2644_v5, %v2643_v38  ;;  %v2645_v25 = vld [vmem:[#allocation28 + $0x10] sm:$0xff]  ;;  %v2642_v5 = vld [vmem:[#allocation26] sm:$0x1f] }
 0x6fb   : > { %5114 = vmatprep.subr.bf16.mxu0 %v5113_v19  ;;  %5174 = vmatprep.subr.bf16.mxu1 %v7608_v24  ;;  %v5217_v19 = vpack.c.bf16 %v2646_v16, %v2645_v25  ;;  %v3116_v25 = vrot.slane %v2642_v5, %v6778_v52 }
 0x6fe   : > { %5116 = vmatpush1.bf16.msra.mxu0 %v5115_v37  ;;  %5176 = vmatpush3.bf16.msra.mxu1 %v5175_v20  ;;  %v2649_v37 = vld [vmem:[#allocation28 + $0x30] sm:$0xff]  ;;  %v5190_v20 = vpack.c.bf16 %v2660_v34, %v2659_v51 }
 0x6ff   : > { %5118 = vmatprep.subr.bf16.mxu0 %v5117_v17  ;;  %5177 = vmatprep.subr.bf16.mxu1 %v7608_v24  ;;  %v5223_v17 = vpack.c.bf16 %v2650_v55, %v2649_v37  ;;  %v3104_v37 = vrot.slane %v2642_v5, %v6783_v63  ;;  %v3120_v55 = vrot.slane %v2642_v5, %v6789_v1 }
 0x702   : > { %5120 = vmatpush1.bf16.msra.mxu0 %v5119_v48  ;;  %5179 = vmatpush3.bf16.msra.mxu1 %v5178_v45  ;;  %v5226_v48 = vpack.c.bf16 %v2652_v47, %v2651_v43  ;;  %v2663_v45 = vld [vmem:[#allocation29 + $0x20] sm:$0xff] }
 0x703   : > { %5122 = vmatprep.subr.bf16.mxu0 %v5121_v35  ;;  %5180 = vmatprep.subr.bf16.mxu1 %v7608_v24  ;;  %v2653_v35 = vld [vmem:[#allocation28 + $0x50] sm:$0xff]  ;;  %v5196_v23 = vpack.c.bf16 %v2664_v46, %v2663_v45 }
 0x704   : > { %v5229_v42 = vpack.c.bf16 %v2654_v59, %v2653_v35 }
 0x706   : > { %5124 = vmatpush1.bf16.msra.mxu0 %v5123_v18  ;;  %5182 = vmatpush3.bf16.msra.mxu1 %v5181_v28  ;;  %v2655_v18 = vld [vmem:[#allocation28 + $0x60] sm:$0xff]  ;;  %v5199_v28 = vpack.c.bf16 %v2666_v12, %v2665_v57 }
 0x707   : > { %5126 = vmatprep.subr.bf16.mxu0 %v5125_v29  ;;  %5183 = vmatprep.subr.bf16.mxu1 %v7608_v24  ;;  %v2667_v29 = vld [vmem:[#allocation29 + $0x40] sm:$0xff]  ;;  %v5232_v26 = vpack.c.bf16 %v2656_v7, %v2655_v18 }
 0x708   : > { %v5202_v61 = vpack.c.bf16 %v2668_v36, %v2667_v29 }
 0x70a   : > { %5128 = vmatpush1.bf16.msra.mxu0 %v5127_v33  ;;  %5185 = vmatpush3.bf16.msra.mxu1 %v5184_v31  ;;  %v5235_v33 = vpack.c.bf16 %v2658_v56, %v2657_v4  ;;  %v2669_v31 = vld [vmem:[#allocation29 + $0x50] sm:$0xff] }
 0x70b   : > { %5130 = vmatprep.subr.bf16.mxu0 %v5129_v9  ;;  %5186 = vmatprep.subr.bf16.mxu1 %v7608_v24  ;;  %v5205_v9 = vpack.c.bf16 %v2670_v53, %v2669_v31 }
 0x70e   : > { %5132 = vmatpush1.bf16.msra.mxu0 %v5131_v21  ;;  %5188 = vmatpush3.bf16.msra.mxu1 %v5187_v49  ;;  %v2673_v21 = vld [vmem:[#allocation29 + $0x70] sm:$0xff]  ;;  %v2674_v49 = vld [vmem:[#allocation29 + $0x78] sm:$0xff] }
 0x70f   : > { %5213 = vmatprep.subr.bf16.mxu1 %v7608_v24  ;;  %5189 = vmatprep.subr.bf16.mxu0 %v7608_v24  ;;  %v5211_v38 = vpack.c.bf16 %v2674_v49, %v2673_v21 }
 0x711   : > { %2953 = vmatmul.mubr.f32.vlgmr.msra.gmra.mrb[6].mxu0 %v7624_v14  ;;  %4662 = vmatmul.mubr.f32.vlgmr.msra.gmra.mrb[8].mxu1 %v7624_v14 }
 0x712   : > { %4731 = vmatprep.mubr.msk.f32.mxu1 %vm6143_vm1, %v7623_v40  ;;  %4696 = vmatprep.mubr.msk.f32.mxu0 %vm6143_vm1, %v7623_v40 }
 0x713   : > { %5215 = vmatpush3.bf16.msra.mxu1 %v5214_v58  ;;  %5191 = vmatpush3.bf16.msra.mxu0 %v5190_v20  ;;  %v3112_v58 = vrot.slane %v2642_v5, %v6775_v50  ;;  %v3108_v20 = vrot.slane %v2642_v5, %v6786_v0 }
 0x714   : > { %5216 = vmatprep.subr.bf16.mxu1 %v7608_v24  ;;  %5192 = vmatprep.subr.bf16.mxu0 %v7608_v24 }
 0x717   : > { %5218 = vmatpush3.bf16.msra.mxu1 %v5217_v19  ;;  %5194 = vmatpush3.bf16.msra.mxu0 %v5193_v32 }
 0x718   : > { %5219 = vmatprep.subr.bf16.mxu1 %v7608_v24  ;;  %5195 = vmatprep.subr.bf16.mxu0 %v7608_v24 }
 0x71b   : > { %5221 = vmatpush3.bf16.msra.mxu1 %v5220_v3  ;;  %5197 = vmatpush3.bf16.msra.mxu0 %v5196_v23 }
 0x71c   : > { %5222 = vmatprep.subr.bf16.mxu1 %v7608_v24  ;;  %5198 = vmatprep.subr.bf16.mxu0 %v7608_v24 }
 0x71f   : > { %5224 = vmatpush3.bf16.msra.mxu1 %v5223_v17  ;;  %5200 = vmatpush3.bf16.msra.mxu0 %v5199_v28 }
 0x720   : > { %5225 = vmatprep.subr.bf16.mxu1 %v7608_v24  ;;  %5201 = vmatprep.subr.bf16.mxu0 %v7608_v24 }
 0x723   : > { %5227 = vmatpush3.bf16.msra.mxu1 %v5226_v48  ;;  %5203 = vmatpush3.bf16.msra.mxu0 %v5202_v61 }
 0x724   : > { %5228 = vmatprep.subr.bf16.mxu1 %v7608_v24  ;;  %5204 = vmatprep.subr.bf16.mxu0 %v7608_v24 }
 0x727   : > { %5230 = vmatpush3.bf16.msra.mxu1 %v5229_v42  ;;  %5206 = vmatpush3.bf16.msra.mxu0 %v5205_v9 }
 0x728   : > { %5231 = vmatprep.subr.bf16.mxu1 %v7608_v24  ;;  %5207 = vmatprep.subr.bf16.mxu0 %v7608_v24 }
 0x72b   : > { %5233 = vmatpush3.bf16.msra.mxu1 %v5232_v26  ;;  %5209 = vmatpush3.bf16.msra.mxu0 %v5208_v22 }
 0x72c   : > { %5234 = vmatprep.subr.bf16.mxu1 %v7608_v24  ;;  %5210 = vmatprep.subr.bf16.mxu0 %v7608_v24 }
 0x72f   : > { %5236 = vmatpush3.bf16.msra.mxu1 %v5235_v33  ;;  %5212 = vmatpush3.bf16.msra.mxu0 %v5211_v38 }
 0x730   : > { %5237 = vmatprep.subr.bf16.mxu0 %v7608_v24 }
 0x7c4   : > { %v2884_v16 = vpop.f32.mrb[8].mxu0  ;;  %v3025_v19 = vpop.f32.mrb[6].mxu1 }
 0x7c5   : > { %v3128_v6 = vadd.f32 %v3112_v58, %v3025_v19  ;;  %v4628_v62 = vpop.f32.mrb[9].mxu0  ;;  %v3027_v3 = vpop.f32.mrb[7].mxu1 }
 0x7c6   : > { %v3129_v51 = vadd.f32 %v3116_v25, %v3027_v3 }
 0x7c8   : > { %v3143_v34 = vmax.f32 %v3128_v6, %v3129_v51 }
 0x7e4   : > { %v2954_v17 = vpop.f32.mrb[6].mxu0  ;;  %v3096_v10 = vpop.f32.mrb[8].mxu1 }
 0x7e5   : > { %v3126_v27 = vadd.f32 %v3104_v37, %v2954_v17  ;;  %v3097_v43 = vadd.f32 %v3096_v10, %v2884_v16  ;;  %v2956_v50 = vpop.f32.mrb[7].mxu0  ;;  %v4663_v32 = vpop.f32.mrb[9].mxu1  ;;  %v3362_v17 = vld [vmem:[%s7625_s30 + $0x8] sm:$0xff]  ;;  %v3363_v10 = vld [vmem:[%s7625_s30 + $0x10] sm:$0xff] }
 0x7e6   : > { %v3127_v52 = vadd.f32 %v3108_v20, %v2956_v50  ;;  %v3366_v32 = vld [vmem:[%s7625_s30 + $0x28] sm:$0xff] }
 0x7e7   : > { %v4270_v47 = vmul.f32 -1.442695, %v3126_v27  ;;  %v3130_v48 = vadd.f32 %v3120_v55, %v3097_v43  ;;  %v3364_v43 = vld [vmem:[%s7625_s30 + $0x18] sm:$0xff] }
 0x7e8   : > { %v4271_v45 = vmul.f32 -1.442695, %v3127_v52  ;;  %v5241_v50 = vpack.c.bf16 %v3364_v43, %v3363_v10 }
 0x7e9   : > { %5519 = vpow2.f32 %v4270_v47  ;;  %v3144_v46 = vmax.f32 %v3143_v34, %v3130_v48  ;;  %v3367_v47 = vld [vmem:[%s7625_s30 + $0x30] sm:$0xff] }
 0x7ea   : > { %5521 = vpow2.f32 %v4271_v45  ;;  %v3369_v45 = vld [vmem:[%s7625_s30 + $0x40] sm:$0xff] }
 0x7eb   : > { %v3145_v35 = vsub.f32 %v3128_v6, %v3144_v46  ;;  %v3148_v23 = vsub.f32 %v3129_v51, %v3144_v46  ;;  %v3151_v63 = vsub.f32 %v3130_v48, %v3144_v46  ;;  %v3368_v48 = vld [vmem:[%s7625_s30 + $0x38] sm:$0xff] }
 0x7ec   : > { %v5247_v46 = vpack.c.bf16 %v3368_v48, %v3367_v47 }
 0x7ed   : > { %v3146_v59 = vmul.f32 1.442695, %v3145_v35  ;;  %v3149_v0 = vmul.f32 1.442695, %v3148_v23  ;;  %v3152_v42 = vmul.f32 1.442695, %v3151_v63 }
 0x7ee   : > { %v3370_v35 = vld [vmem:[%s7625_s30 + $0x48] sm:$0xff]  ;;  %v3371_v63 = vld [vmem:[%s7625_s30 + $0x50] sm:$0xff] }
 0x7ef   : > { %5523 = vpow2.f32 %v3146_v59  ;;  %v5250_v23 = vpack.c.bf16 %v3370_v35, %v3369_v45  ;;  %v3372_v59 = vld [vmem:[%s7625_s30 + $0x58] sm:$0xff] }
 0x7f0   : > { %5525 = vpow2.f32 %v3149_v0  ;;  %v5253_v0 = vpack.c.bf16 %v3372_v59, %v3371_v63 }
 0x7f1   : > { %5527 = vpow2.f32 %v3152_v42  ;;  %v3373_v42 = vld [vmem:[%s7625_s30 + $0x60] sm:$0xff] }
 0x7f3   : > { %v5520_v1 = vpop.eup %5519 }
 0x7f4   : > { %v5522_v57 = vpop.eup %5521  ;;  %v3134_v12 = vadd.f32 1.0, %v5520_v1  ;;  %v3374_v1 = vld [vmem:[%s7625_s30 + $0x68] sm:$0xff] }
 0x7f5   : > { %v3140_v18 = vadd.f32 1.0, %v5522_v57  ;;  %v5256_v57 = vpack.c.bf16 %v3374_v1, %v3373_v42 }
 0x7f6   : > { %5529 = vrcp.f32 %v3134_v12  ;;  %v3375_v12 = vld [vmem:[%s7625_s30 + $0x70] sm:$0xff] }
 0x7f7   : > { %5531 = vrcp.f32 %v3140_v18  ;;  %v3376_v18 = vld [vmem:[%s7625_s30 + $0x78] sm:$0xff] }
 0x7f9   : > { %v5524_v28 = vpop.eup %5523 }
 0x7fa   : > { %v5526_v7 = vpop.eup %5525  ;;  %v3354_v29 = vmul.f32 %v5524_v28, %v7624_v14 }
 0x7fb   : > { %v3154_v36 = vadd.f32 %v5526_v7, %v5524_v28  ;;  %v3355_v26 = vmul.f32 %v5526_v7, %v7105_v44  ;;  %v7163_v4 = vpop.eup %5527  ;;  %v5259_v28 = vpack.c.bf16 %v3376_v18, %v3375_v12 }
 0x7fd   : > { %v7166_v56 = vadd.f32 %v7163_v4, %v3154_v36  ;;  %v7168_v61 = vadd.f32 %v3355_v26, %v3354_v29  ;;  %v4272_v36 = vld [vmem:[%s7626_s20] ss:$0 sm:$0xff] }
 0x800   : > { %v5530_v33 = vpop.eup %5529 }
 0x801   : > { %v5532_v31 = vpop.eup %5531  ;;  %v3158_v53 = vmul.f32 %v5530_v33, %v7624_v14 }
 0x802   : > { %v3160_v9 = vrot.slane %v5532_v31, 1  ;;  %v3161_v2 = vrot.slane %v5532_v31, 2  ;;  %v3162_v11 = vrot.slane %v5532_v31, 3  ;;  %v3163_v22 = vrot.slane %v5532_v31, 4 }
 0x803   : > { %4732 = vmatmul.mubr.f32.vlgmr.msra.gmra.mrb[10].mxu1 %v3158_v53  ;;  %v3164_v21 = vrot.slane %v5532_v31, 5  ;;  %v3165_v49 = vrot.slane %v5532_v31, 6  ;;  %v3166_v38 = vrot.slane %v5532_v31, 7  ;;  %v3175_v16 = vmul.f32 %v5532_v31, %v7074_v60 }
 0x804   : > { %v3176_v44 = vmul.f32 %v3160_v9, %v7078_v39  ;;  %v3177_v5 = vmul.f32 %v3161_v2, %v7076_v54  ;;  %v3178_v58 = vmul.f32 %v3162_v11, %v7080_v15  ;;  %v3179_v25 = vmul.f32 %v3163_v22, %v7082_v8 }
 0x805   : > { %v3180_v14 = vmul.f32 %v3164_v21, %v7087_v41  ;;  %v3181_v62 = vmul.f32 %v3165_v49, %v7091_v13  ;;  %v3182_v3 = vmul.f32 %v3166_v38, %v7097_v30  ;;  %v3361_v30 = vld [vmem:[%s7625_s30] sm:$0xff] }
 0x806   : > { %v3191_v19 = vrot.slane %v3176_v44, 7  ;;  %v3193_v6 = vrot.slane %v3177_v5, 6  ;;  %v3195_v34 = vrot.slane %v3178_v58, 5  ;;  %v3197_v54 = vrot.slane %v3179_v25, 4  ;;  %v4273_v21 = vld [vmem:[%s7627_s11] ss:$0 sm:$0xff] }
 0x807   : > { %v3199_v37 = vrot.slane %v3180_v14, 3  ;;  %v3201_v60 = vrot.slane %v3181_v62, 2  ;;  %v3203_v20 = vrot.slane %v3182_v3, 1  ;;  %v5238_v27 = vpack.c.bf16 %v3362_v17, %v3361_v30 }
 0x808   : > { %v3192_v51 = vsel %vm2180_vm5, %v3191_v19, %v3175_v16 }
 0x809   : > { %v3194_v39 = vsel %vm2182_vm6, %v3193_v6, %v3192_v51 }
 0x80a   : > { %v3196_v15 = vsel %vm2184_vm7, %v3195_v34, %v3194_v39 }
 0x80b   : > { %v3198_v8 = vsel %vm2186_vm8, %v3197_v54, %v3196_v15 }
 0x80c   : > { %v3200_v41 = vsel %vm2188_vm9, %v3199_v37, %v3198_v8 }
 0x80d   : > { %v3202_v55 = vsel %vm2190_vm10, %v3201_v60, %v3200_v41 }
 0x80e   : > { %v3204_v13 = vsel %vm2192_vm11, %v3203_v20, %v3202_v55 }
 0x80f   : > { %4697 = vmatmul.mubr.f32.vlgmr.msra.gmra.mrb[10].mxu0 %v3204_v13 }
 0x810   : > { %4766 = vmatprep.mubr.msk.f32.mxu0 %vm6143_vm1, %v7623_v40  ;;  %5239 = vmatpush3.bf16.msra.mxu0 %v5238_v27  ;;  %v3365_v40 = vld [vmem:[%s7625_s30 + $0x20] sm:$0xff] }
 0x811   : > { %5240 = vmatprep.subr.bf16.mxu0 %v7608_v24  ;;  %v5244_v52 = vpack.c.bf16 %v3366_v32, %v3365_v40 }
 0x814   : > { %5242 = vmatpush3.bf16.msra.mxu0 %v5241_v50 }
 0x815   : > { %5243 = vmatprep.subr.bf16.mxu0 %v7608_v24 }
 0x818   : > { %5245 = vmatpush3.bf16.msra.mxu0 %v5244_v52 }
 0x819   : > { %5246 = vmatprep.subr.bf16.mxu0 %v7608_v24 }
 0x81c   : > { %5248 = vmatpush3.bf16.msra.mxu0 %v5247_v46 }
 0x81d   : > { %5249 = vmatprep.subr.bf16.mxu0 %v7608_v24 }
 0x820   : > { %5251 = vmatpush3.bf16.msra.mxu0 %v5250_v23 }
 0x821   : > { %5252 = vmatprep.subr.bf16.mxu0 %v7608_v24 }
 0x824   : > { %5254 = vmatpush3.bf16.msra.mxu0 %v5253_v0 }
 0x825   : > { %5255 = vmatprep.subr.bf16.mxu0 %v7608_v24 }
 0x828   : > { %5257 = vmatpush3.bf16.msra.mxu0 %v5256_v57 }
 0x829   : > { %5258 = vmatprep.subr.bf16.mxu0 %v7608_v24 }
 0x82c   : > { %5260 = vmatpush3.bf16.msra.mxu0 %v5259_v28 }
 0x8d6   : > { %v3342_v7 = vpop.f32.mrb[10].mxu1 }
 0x8d7   : > { %v4733_v29 = vpop.f32.mrb[11].mxu1 }
 0x8e2   : > { %v3272_v26 = vpop.f32.mrb[10].mxu0 }
 0x8e3   : > { %v3343_v33 = vadd.f32 %v3342_v7, %v3272_v26  ;;  %v4698_v31 = vpop.f32.mrb[11].mxu0 }
 0x8e5   : > { %v3352_v53 = vadd.f32 %v4272_v36, %v3343_v33 }
 0x8e7   : > { %5533 = vtanh.f32 %v3352_v53 }
 0x8e8   : > { %5535 = vrcp.f32 %v7166_v56 }
 0x8f1   : > { %v5534_v9 = vpop.eup %5533 }
 0x8f2   : > { %v3357_v2 = vmul.f32 %v5534_v9, %v7163_v4  ;;  %v5536_v24 = vpop.eup %5535 }
 0x8f4   : > { %v3358_v11 = vadd.f32 %v3357_v2, %v7168_v61 }
 0x8f6   : > { %v3359_v22 = vmul.f32 %v5536_v24, %v3358_v11 }
 0x8f8   : > { %3360 = vst [vmem:[#allocation2] sm:$0xff] %v3359_v22  ;;  %4767 = vmatmul.mubr.f32.vlgmr.msra.gmra.mrb[12].mxu0 %v3359_v22 }
 0x9cb   : > { %v3450_v49 = vpop.f32.mrb[12].mxu0 }
 0x9cc   : > { %v3451_v38 = vadd.f32 %v4273_v21, %v3450_v49  ;;  %v4768_v44 = vpop.f32.mrb[13].mxu0 }
 0x9ce   : > { %v3455_v5 = vsel %vm3454_vm14, %v3451_v38, -inf }
 0x9cf   : > { %3456 = vmax.xlane.f32.xlu0 %v3455_v5 }
 0xa5c   : > { %v3457_v56 = vpop.xlane.xlu0 %3456 }
 0xa5d   : > { %v3458_v58 = vsub.f32 %v3451_v38, %v3457_v56 }
 0xa5f   : > { %v3459_v4 = vmul.f32 1.442695, %v3458_v58 }
 0xa61   : > { %5537 = vpow2.f32 %v3459_v4 }
 0xa6b   : > { %v5538_v61 = vpop.eup %5537 }
 0xa6c   : > { %v3461_v25 = vsel %vm3454_vm14, %v5538_v61, 0.0 }
 0xa6d   : > { %3462 = vadd.xlane.f32.xlu1 %v3461_v25 }
 0xafa   : > { %v3463_v16 = vpop.xlane.xlu1 %3462 }
 0xafb   : > { %5539 = vrcp.f32 %v3463_v16 }
 0xb05   : > { %v5540_v14 = vpop.eup %5539 }
 0xb06   : > { %v3465_v19 = vmul.f32 %v5540_v14, %v5538_v61 }
 0xb08   : > { %3466 = vst.msk [vmem:[#allocation3] sm:$0xff] %vm3454_vm14, %v3465_v19 }
 0xb09 PF: > { %p4274_p9 = scmp.ne.s32.totalorder %s6112_s3, 0 }
 0xb0a   : > { %s7628_s4 = sld [smem:[#allocation72_spill]] (!%p4274_p9)  ;;  %v6145_v62 = vmov (!%p4274_p9), 0.0   ;;  %vm6146_vm15 = vmmov (!%p4274_p9), 0   ;;  %v3473_v8 = vld [vmem:[#allocation2] sm:$0xff] (!%p4274_p9)  ;;  %s7629_s11 = sld [smem:[#allocation73_spill]] (!%p4274_p9)  ;;  %v6147_v10 = vmov (!%p4274_p9), 0  }
 0xb0b   : > { %3472 = sbr.rel (%p4274_p9) target bundleno = 3510 (0xdb6), region = 168  ;;  %4769 = vmatprep.subr.bf16.mxu0 (!%p4274_p9), %v6145_v62  ;;  %4785 = vmatprep.mubr.msk.bf16.mxu0 (!%p4274_p9), %vm6146_vm15, %v6145_v62  ;;  %v3474_v60 = vpack.c.bf16 (!%p4274_p9), %v3473_v8, %v3473_v8  ;;  %v3589_v27 = vld [vmem:[#allocation5] sm:$0xff] (!%p4274_p9)  ;;  %vm3609_vm0 = vcmask (!%p4274_p9), 7168   ;;  %v3593_v35 = vld [vmem:[#allocation6] sm:$0xff] (!%p4274_p9) }
 0xb0c   : > { %5541 = vset.pattern.permute.xlu0 (!%p4274_p9), %v6147_v10 }
 0xb10   : > { %v5542_v6 = vld [vmem:[%s7628_s4] sm:$0xff] (!%p4274_p9)   ;;  %v5543_v3 = vld [vmem:[%s7628_s4 + $0x8] sm:$0xff] (!%p4274_p9)   ;;  %v5544_v51 = vld [vmem:[%s7628_s4 + $0x10] sm:$0xff] (!%p4274_p9)  }
 0xb11   : > { %4770 = vmatpush3.bf16.msra.mxu0 (!%p4274_p9), %v5542_v6  ;;  %v5545_v34 = vld [vmem:[%s7628_s4 + $0x18] sm:$0xff] (!%p4274_p9)   ;;  %v5546_v39 = vld [vmem:[%s7628_s4 + $0x20] sm:$0xff] (!%p4274_p9)   ;;  %v5547_v54 = vld [vmem:[%s7628_s4 + $0x28] sm:$0xff] (!%p4274_p9)  }
 0xb12   : > { %4771 = vmatprep.subr.bf16.mxu0 %v6145_v62  ;;  %v5548_v15 = vld [vmem:[%s7628_s4 + $0x30] sm:$0xff]   ;;  %v5549_v37 = vld [vmem:[%s7628_s4 + $0x38] sm:$0xff]   ;;  %v4275_v41 = vld [vmem:[%s7629_s11] ss:$0 sm:$0xff] }
 0xb15   : > { %4772 = vmatpush3.bf16.msra.mxu0 %v5543_v3 }
 0xb16   : > { %4773 = vmatprep.subr.bf16.mxu0 %v6145_v62 }
 0xb19   : > { %4774 = vmatpush3.bf16.msra.mxu0 %v5544_v51 }
 0xb1a   : > { %4775 = vmatprep.subr.bf16.mxu0 %v6145_v62 }
 0xb1d   : > { %4776 = vmatpush3.bf16.msra.mxu0 %v5545_v34 }
 0xb1e   : > { %4777 = vmatprep.subr.bf16.mxu0 %v6145_v62 }
 0xb21   : > { %4778 = vmatpush3.bf16.msra.mxu0 %v5546_v39 }
 0xb22   : > { %4779 = vmatprep.subr.bf16.mxu0 %v6145_v62 }
 0xb25   : > { %4780 = vmatpush3.bf16.msra.mxu0 %v5547_v54 }
 0xb26   : > { %4781 = vmatprep.subr.bf16.mxu0 %v6145_v62 }
 0xb29   : > { %4782 = vmatpush3.bf16.msra.mxu0 %v5548_v15 }
 0xb2a   : > { %4783 = vmatprep.subr.bf16.mxu0 %v6145_v62 }
 0xb2d   : > { %4784 = vmatpush3.bf16.msra.mxu0 %v5549_v37 }
 0xb30   : > { %4786 = vmatmul.mubr.bf16.vlgmr.msra.gmra.mrb[0].mxu0 %v3474_v60 }
 0xc03   : > { %v3580_v20 = vpop.f32.mrb[0].mxu0 }
 0xc04   : > { %v3581_v55 = vadd.f32 %v4275_v41, %v3580_v20  ;;  %v4787_v13 = vpop.f32.mrb[1].mxu0 }
 0xc05   : > { %v3583_v30 = vpop.f32.mrb[2].mxu0 }
 0xc06   : > { %3588 = vst [vmem:[#allocation7] sm:$0xff] %v3581_v55  ;;  %3590 = vmax.xlane.f32.xlu0 %v3581_v55  ;;  %v4788_v17 = vpop.f32.mrb[3].mxu0 }
 0xc93   : > { %v3591_v43 = vpop.xlane.xlu0 %3590 }
 0xc94   : > { %v3592_v50 = vmax.f32 %v3589_v27, %v3591_v43 }
 0xc96   : > { %v3594_v40 = vsub.f32 %v3589_v27, %v3592_v50  ;;  %3611 = vst.msk [vmem:[#allocation5] sm:$0xff] %vm3609_vm0, %v3592_v50  ;;  %3600 = vperm.xlu0 %5541, %v3592_v50  }
 0xc98   : > { %v3595_v45 = vmul.f32 1.442695, %v3594_v40 }
 0xd15   : > { %v3601_v32 = vpop.permute.xlu0 %3600 }
 0xd16   : > { %v3603_v52 = vsub.f32 %v3581_v55, %v3601_v32 }
 0xd18   : > { %v3604_v47 = vmul.f32 1.442695, %v3603_v52 }
 0xd1a   : > { %5550 = vpow2.f32 %v3604_v47 }
 0xd1b   : > { %5552 = vpow2.f32 %v3595_v45 }
 0xd24   : > { %v5551_v48 = vpop.eup %5550 }
 0xd25   : > { %3606 = vadd.xlane.f32.xlu1 %v5551_v48  ;;  %v5553_v46 = vpop.eup %5552 }
 0xd26   : > { %v3597_v23 = vmul.f32 %v5553_v46, %v3593_v35 }
 0xdb2   : > { %v3607_v63 = vpop.xlane.xlu1 %3606 }
 0xdb3   : > { %v3608_v59 = vadd.f32 %v3607_v63, %v3597_v23 }
 0xdb5   : > { %3610 = vst.msk [vmem:[#allocation6] sm:$0xff] %vm3609_vm0, %v3608_v59 }
 0xdb6 PF: > { %p4284_p2 = scmp.ne.s32.totalorder %s6112_s3, 1 }
 0xdb7   : > { %v7286_v0 = vld [vmem:[#allocation13] sm:$0xff] (!%p4284_p2)  ;;  %v6148_v42 = vmov (!%p4284_p2), 0   ;;  %v6149_v1 = vmov (!%p4284_p2), 1   ;;  %v7292_v12 = vld [vmem:[#allocation4] sm:$0xff] (!%p4284_p2)  ;;  %v3619_v18 = vld [vmem:[#allocation5] sm:$0xff] (!%p4284_p2)  ;;  %v6150_v7 = vmov (!%p4284_p2), 2   ;;  %v3638_v3 = vlaneseq (!%p4284_p2) }
 0xdb8   : > { %3615 = sbr.rel (%p4284_p2) target bundleno = 3850 (0xf0a), region = 172  ;;  %5554 = vset.pattern.permute.xlu1 (!%p4284_p2), %v6148_v42  ;;  %5555 = vset.pattern.permute.xlu0 (!%p4284_p2), %v6149_v1  ;;  %v6151_v29 = vmov (!%p4284_p2), 3   ;;  %v6152_v36 = vmov (!%p4284_p2), 4   ;;  %v6153_v26 = vmov (!%p4284_p2), 5   ;;  %v6154_v33 = vmov (!%p4284_p2), 7   ;;  %v7346_v62 = vld [vmem:[#allocation3] sm:$0xff] (!%p4284_p2) }
 0xdb9   : > { %3644 = vperm.xlu1 (!%p4284_p2), %5554, %v7286_v0   ;;  %3655 = vperm.xlu0 (!%p4284_p2), %5555, %v7286_v0   ;;  %v6155_v31 = vmov (!%p4284_p2), 8   ;;  %v6156_v53 = vmov (!%p4284_p2), 6   ;;  %v6157_v9 = vmov (!%p4284_p2), 10   ;;  %v6158_v2 = vmov (!%p4284_p2), 11   ;;  %v3618_v54 = vld [vmem:[#allocation7] sm:$0xff] (!%p4284_p2) }
 0xdba   : > { %v6159_v11 = vmov (!%p4284_p2), 13   ;;  %v6160_v24 = vmov (!%p4284_p2), 14   ;;  %v6161_v22 = vmov (!%p4284_p2), 9   ;;  %v6162_v21 = vmov (!%p4284_p2), 16  }
 0xdbb   : > { %v6163_v49 = vmov (!%p4284_p2), 17   ;;  %v6164_v38 = vmov (!%p4284_p2), 19   ;;  %v6165_v44 = vmov (!%p4284_p2), 12   ;;  %v6166_v5 = vmov (!%p4284_p2), 20  }
 0xdbc   : > { %v3628_v57 = vld [vmem:[#allocation6] sm:$0xff] (!%p4284_p2)  ;;  %v6167_v56 = vmov (!%p4284_p2), 22   ;;  %v6168_v58 = vmov (!%p4284_p2), 23   ;;  %v6169_v4 = vmov (!%p4284_p2), 25   ;;  %v6170_v61 = vmov (!%p4284_p2), 15  }
 0xdbd   : > { %5610 = vrcp.f32 (!%p4284_p2), %v3628_v57  ;;  %3649 = vperm.xlu1 (!%p4284_p2), %5554, %v7292_v12   ;;  %5556 = vset.pattern.permute.xlu0 (!%p4284_p2), %v6148_v42  ;;  %v6171_v25 = vmov (!%p4284_p2), 26   ;;  %v6172_v16 = vmov (!%p4284_p2), 28   ;;  %v6173_v14 = vmov (!%p4284_p2), 29  }
 0xdbe   : > { %3622 = vperm.xlu0 (!%p4284_p2), %5556, %v3619_v18   ;;  %v6174_v19 = vmov (!%p4284_p2), 31   ;;  %v6175_v6 = vmov (!%p4284_p2), 18   ;;  %v7353_v51 = vand.u32 (!%p4284_p2), 127, %v3638_v3  ;;  %v6176_v8 = vmov (!%p4284_p2), 21  }
 0xdbf   : > { %v6177_v46 = vmov 24  }
 0xdc1   : > { %5557 = vset.pattern.permute.xlu1 %v6149_v1 }
 0xdc2   : > { %3659 = vperm.xlu1 %5557, %v7292_v12  }
 0xdc6   : > { %5558 = vset.pattern.permute.xlu1 %v6150_v7 }
 0xdc7   : > { %v5611_v28 = vpop.eup %5610  ;;  %3665 = vperm.xlu1 %5558, %v7286_v0  }
 0xdc8   : > { %3632 = vperm.xlu0 %5556, %v5611_v28  }
 0xdcb   : > { %5560 = vset.pattern.permute.xlu1 %v6151_v29 }
 0xdcc   : > { %5559 = vset.pattern.permute.xlu0 %v6150_v7  ;;  %3675 = vperm.xlu1 %5560, %v7286_v0  }
 0xdcd   : > { %3669 = vperm.xlu0 %5559, %v7292_v12  }
 0xdd0   : > { %3679 = vperm.xlu1 %5560, %v7292_v12  }
 0xdd1   : > { %5561 = vset.pattern.permute.xlu0 %v6152_v36 }
 0xdd2   : > { %3685 = vperm.xlu0 %5561, %v7286_v0  }
 0xdd4   : > { %5562 = vset.pattern.permute.xlu1 %v6152_v36 }
 0xdd5   : > { %3689 = vperm.xlu1 %5562, %v7292_v12  }
 0xdd6   : > { %5564 = vset.pattern.permute.xlu0 %v6153_v26 }
 0xdd7   : > { %3699 = vperm.xlu0 %5564, %v7292_v12  }
 0xdd9   : > { %5563 = vset.pattern.permute.xlu1 %v6153_v26 }
 0xdda   : > { %3695 = vperm.xlu1 %5563, %v7286_v0  }
 0xddb   : > { %5566 = vset.pattern.permute.xlu0 %v6154_v33 }
 0xddc   : > { %3715 = vperm.xlu0 %5566, %v7286_v0  }
 0xdde   : > { %5565 = vset.pattern.permute.xlu1 %v6156_v53 }
 0xddf   : > { %3705 = vperm.xlu1 %5565, %v7286_v0  }
 0xde0   : > { %5569 = vset.pattern.permute.xlu0 %v6155_v31 }
 0xde1   : > { %3729 = vperm.xlu0 %5569, %v7292_v12  }
 0xde3   : > { %3709 = vperm.xlu1 %5565, %v7292_v12  }
 0xde5   : > { %5571 = vset.pattern.permute.xlu0 %v6157_v9 }
 0xde6   : > { %3745 = vperm.xlu0 %5571, %v7286_v0  }
 0xde7   : > { %5567 = vset.pattern.permute.xlu1 %v6154_v33  ;;  %v6178_v33 = vmov 27  }
 0xde8   : > { %3719 = vperm.xlu1 %5567, %v7292_v12  }
 0xdea   : > { %5574 = vset.pattern.permute.xlu0 %v6158_v2 }
 0xdeb   : > { %3759 = vperm.xlu0 %5574, %v7292_v12  }
 0xdec   : > { %5568 = vset.pattern.permute.xlu1 %v6155_v31 }
 0xded   : > { %3725 = vperm.xlu1 %5568, %v7286_v0  }
 0xdef   : > { %5576 = vset.pattern.permute.xlu0 %v6159_v11 }
 0xdf0   : > { %3775 = vperm.xlu0 %5576, %v7286_v0  }
 0xdf1   : > { %5570 = vset.pattern.permute.xlu1 %v6161_v22 }
 0xdf2   : > { %3735 = vperm.xlu1 %5570, %v7286_v0  }
 0xdf4   : > { %5579 = vset.pattern.permute.xlu0 %v6160_v24 }
 0xdf5   : > { %3789 = vperm.xlu0 %5579, %v7292_v12  }
 0xdf6   : > { %3739 = vperm.xlu1 %5570, %v7292_v12  }
 0xdf9   : > { %5581 = vset.pattern.permute.xlu0 %v6162_v21 }
 0xdfa   : > { %3805 = vperm.xlu0 %5581, %v7286_v0   ;;  %5572 = vset.pattern.permute.xlu1 %v6157_v9 }
 0xdfb   : > { %3749 = vperm.xlu1 %5572, %v7292_v12  }
 0xdfe   : > { %5584 = vset.pattern.permute.xlu0 %v6163_v49 }
 0xdff   : > { %3819 = vperm.xlu0 %5584, %v7292_v12   ;;  %5573 = vset.pattern.permute.xlu1 %v6158_v2 }
 0xe00   : > { %3755 = vperm.xlu1 %5573, %v7286_v0  }
 0xe03   : > { %5586 = vset.pattern.permute.xlu0 %v6164_v38 }
 0xe04   : > { %3835 = vperm.xlu0 %5586, %v7286_v0   ;;  %5575 = vset.pattern.permute.xlu1 %v6165_v44 }
 0xe05   : > { %3765 = vperm.xlu1 %5575, %v7286_v0  }
 0xe08   : > { %5589 = vset.pattern.permute.xlu0 %v6166_v5 }
 0xe09   : > { %3849 = vperm.xlu0 %5589, %v7292_v12   ;;  %3769 = vperm.xlu1 %5575, %v7292_v12  }
 0xe0d   : > { %5591 = vset.pattern.permute.xlu0 %v6167_v56  ;;  %5577 = vset.pattern.permute.xlu1 %v6159_v11 }
 0xe0e   : > { %3865 = vperm.xlu0 %5591, %v7286_v0   ;;  %3779 = vperm.xlu1 %5577, %v7292_v12  }
 0xe12   : > { %5594 = vset.pattern.permute.xlu0 %v6168_v58  ;;  %5578 = vset.pattern.permute.xlu1 %v6160_v24 }
 0xe13   : > { %3879 = vperm.xlu0 %5594, %v7292_v12   ;;  %3785 = vperm.xlu1 %5578, %v7286_v0  }
 0xe17   : > { %5596 = vset.pattern.permute.xlu0 %v6169_v4  ;;  %5580 = vset.pattern.permute.xlu1 %v6170_v61 }
 0xe18   : > { %3895 = vperm.xlu0 %5596, %v7286_v0   ;;  %3795 = vperm.xlu1 %5580, %v7286_v0  }
 0xe1c   : > { %5599 = vset.pattern.permute.xlu0 %v6171_v25  ;;  %3799 = vperm.xlu1 %5580, %v7292_v12  }
 0xe1d   : > { %3909 = vperm.xlu0 %5599, %v7292_v12  }
 0xe20   : > { %5582 = vset.pattern.permute.xlu1 %v6162_v21 }
 0xe21   : > { %5601 = vset.pattern.permute.xlu0 %v6172_v16  ;;  %3809 = vperm.xlu1 %5582, %v7292_v12  }
 0xe22   : > { %3925 = vperm.xlu0 %5601, %v7286_v0  }
 0xe25   : > { %5583 = vset.pattern.permute.xlu1 %v6163_v49 }
 0xe26   : > { %5604 = vset.pattern.permute.xlu0 %v6173_v14  ;;  %3815 = vperm.xlu1 %5583, %v7286_v0  }
 0xe27   : > { %3939 = vperm.xlu0 %5604, %v7292_v12  }
 0xe2a   : > { %5585 = vset.pattern.permute.xlu1 %v6175_v6 }
 0xe2b   : > { %5606 = vset.pattern.permute.xlu0 %v6174_v19  ;;  %3825 = vperm.xlu1 %5585, %v7286_v0  }
 0xe2c   : > { %3955 = vperm.xlu0 %5606, %v7286_v0  }
 0xe2f   : > { %3829 = vperm.xlu1 %5585, %v7292_v12  }
 0xe30   : > { %5609 = vset.pattern.permute.xlu0 %v6149_v1 }
 0xe31   : > { %3972 = vperm.xlu0 %5609, %v7346_v62  }
 0xe33   : > { %5587 = vset.pattern.permute.xlu1 %v6164_v38 }
 0xe34   : > { %3839 = vperm.xlu1 %5587, %v7292_v12  }
 0xe38   : > { %5588 = vset.pattern.permute.xlu1 %v6166_v5  ;;  %v3645_v34 = vpop.permute.xlu1 %3644  ;;  %v3656_v39 = vpop.permute.xlu0 %3655 }
 0xe39   : > { %3845 = vperm.xlu1 %5588, %v7286_v0   ;;  %vm3646_vm1 = vcmp.eq.s32.totalorder %v7353_v51, %v3645_v34  ;;  %vm3657_vm2 = vcmp.eq.s32.totalorder %v7353_v51, %v3656_v39 }
 0xe3c   : > { %v3650_v15 = vpop.permute.xlu1 %3649 }
 0xe3d   : > { %v3652_v37 = vsel %vm3646_vm1, %v3650_v15, 0.0  ;;  %5590 = vset.pattern.permute.xlu1 %v6176_v8  ;;  %v3623_v60 = vpop.permute.xlu0 %3622 }
 0xe3e   : > { %3855 = vperm.xlu1 %5590, %v7286_v0   ;;  %v3625_v41 = vsub.f32 %v3618_v54, %v3623_v60 }
 0xe40   : > { %v3626_v20 = vmul.f32 1.442695, %v3625_v41 }
 0xe41   : > { %v3660_v55 = vpop.permute.xlu1 %3659 }
 0xe42   : > { %5612 = vpow2.f32 %v3626_v20  ;;  %v3662_v13 = vsel %vm3657_vm2, %v3660_v55, 0.0  ;;  %3859 = vperm.xlu1 %5590, %v7292_v12  }
 0xe43   : > { %v3663_v30 = vadd.f32 %v3662_v13, %v3652_v37 }
 0xe46   : > { %5592 = vset.pattern.permute.xlu1 %v6167_v56  ;;  %v3666_v10 = vpop.permute.xlu1 %3665  ;;  %v6179_v56 = vmov 30  }
 0xe47   : > { %v3633_v17 = vpop.permute.xlu0 %3632  ;;  %vm3667_vm3 = vcmp.eq.s32.totalorder %v7353_v51, %v3666_v10  ;;  %3869 = vperm.xlu1 %5592, %v7292_v12  }
 0xe4b   : > { %5593 = vset.pattern.permute.xlu1 %v6168_v58  ;;  %v3676_v40 = vpop.permute.xlu1 %3675 }
 0xe4c   : > { %v3670_v27 = vpop.permute.xlu0 %3669  ;;  %v5613_v32 = vpop.eup %5612  ;;  %3875 = vperm.xlu1 %5593, %v7286_v0   ;;  %vm3677_vm4 = vcmp.eq.s32.totalorder %v7353_v51, %v3676_v40 }
 0xe4d   : > { %v3672_v43 = vsel %vm3667_vm3, %v3670_v27, 0.0  ;;  %v7365_v52 = vmul.f32 %v5613_v32, %v3633_v17 }
 0xe4e   : > { %v3673_v50 = vadd.f32 %v3672_v43, %v3663_v30 }
 0xe4f   : > { %v3680_v47 = vpop.permute.xlu1 %3679 }
 0xe50   : > { %v3682_v45 = vsel %vm3677_vm4, %v3680_v47, 0.0  ;;  %5595 = vset.pattern.permute.xlu1 %v6177_v46 }
 0xe51   : > { %v3686_v48 = vpop.permute.xlu0 %3685  ;;  %v3683_v35 = vadd.f32 %v3682_v45, %v3673_v50  ;;  %3885 = vperm.xlu1 %5595, %v7286_v0  }
 0xe52   : > { %vm3687_vm5 = vcmp.eq.s32.totalorder %v7353_v51, %v3686_v48 }
 0xe54   : > { %v3690_v23 = vpop.permute.xlu1 %3689 }
 0xe55   : > { %v3692_v63 = vsel %vm3687_vm5, %v3690_v23, 0.0  ;;  %3889 = vperm.xlu1 %5595, %v7292_v12  }
 0xe56   : > { %v3693_v59 = vadd.f32 %v3692_v63, %v3683_v35  ;;  %v3700_v1 = vpop.permute.xlu0 %3699 }
 0xe59   : > { %5597 = vset.pattern.permute.xlu1 %v6169_v4  ;;  %v3696_v57 = vpop.permute.xlu1 %3695 }
 0xe5a   : > { %vm3697_vm6 = vcmp.eq.s32.totalorder %v7353_v51, %v3696_v57  ;;  %3899 = vperm.xlu1 %5597, %v7292_v12  }
 0xe5b   : > { %v3702_v18 = vsel %vm3697_vm6, %v3700_v1, 0.0  ;;  %v3716_v36 = vpop.permute.xlu0 %3715 }
 0xe5c   : > { %v3703_v28 = vadd.f32 %v3702_v18, %v3693_v59  ;;  %vm3717_vm8 = vcmp.eq.s32.totalorder %v7353_v51, %v3716_v36 }
 0xe5e   : > { %5598 = vset.pattern.permute.xlu1 %v6171_v25  ;;  %v3706_v7 = vpop.permute.xlu1 %3705 }
 0xe5f   : > { %3905 = vperm.xlu1 %5598, %v7286_v0   ;;  %vm3707_vm7 = vcmp.eq.s32.totalorder %v7353_v51, %v3706_v7 }
 0xe60   : > { %v3730_v11 = vpop.permute.xlu0 %3729 }
 0xe62   : > { %v3710_v29 = vpop.permute.xlu1 %3709 }
 0xe63   : > { %v3712_v26 = vsel %vm3707_vm7, %v3710_v29, 0.0  ;;  %5600 = vset.pattern.permute.xlu1 %v6178_v33 }
 0xe64   : > { %v3713_v31 = vadd.f32 %v3712_v26, %v3703_v28  ;;  %3915 = vperm.xlu1 %5600, %v7286_v0  }
 0xe65   : > { %v3746_v44 = vpop.permute.xlu0 %3745 }
 0xe66   : > { %vm3747_vm11 = vcmp.eq.s32.totalorder %v7353_v51, %v3746_v44 }
 0xe67   : > { %v3720_v53 = vpop.permute.xlu1 %3719 }
 0xe68   : > { %v3722_v9 = vsel %vm3717_vm8, %v3720_v53, 0.0  ;;  %3919 = vperm.xlu1 %5600, %v7292_v12  }
 0xe69   : > { %v3723_v2 = vadd.f32 %v3722_v9, %v3713_v31 }
 0xe6c   : > { %5602 = vset.pattern.permute.xlu1 %v6172_v16  ;;  %v3726_v24 = vpop.permute.xlu1 %3725  ;;  %v3760_v16 = vpop.permute.xlu0 %3759 }
 0xe6d   : > { %vm3727_vm9 = vcmp.eq.s32.totalorder %v7353_v51, %v3726_v24  ;;  %3929 = vperm.xlu1 %5602, %v7292_v12  }
 0xe6e   : > { %v3732_v22 = vsel %vm3727_vm9, %v3730_v11, 0.0 }
 0xe6f   : > { %v3733_v21 = vadd.f32 %v3732_v22, %v3723_v2 }
 0xe70   : > { %v3776_v10 = vpop.permute.xlu0 %3775 }
 0xe71   : > { %5603 = vset.pattern.permute.xlu1 %v6173_v14  ;;  %v3736_v49 = vpop.permute.xlu1 %3735  ;;  %vm3777_vm14 = vcmp.eq.s32.totalorder %v7353_v51, %v3776_v10 }
 0xe72   : > { %3935 = vperm.xlu1 %5603, %v7286_v0   ;;  %vm3737_vm10 = vcmp.eq.s32.totalorder %v7353_v51, %v3736_v49 }
 0xe74   : > { %v3790_v27 = vpop.permute.xlu0 %3789 }
 0xe75   : > { %v3740_v38 = vpop.permute.xlu1 %3739 }
 0xe76   : > { %v3742_v5 = vsel %vm3737_vm10, %v3740_v38, 0.0  ;;  %5605 = vset.pattern.permute.xlu1 %v6179_v56 }
 0xe77   : > { %v3743_v58 = vadd.f32 %v3742_v5, %v3733_v21  ;;  %3945 = vperm.xlu1 %5605, %v7286_v0  }
 0xe79   : > { %v3806_v50 = vpop.permute.xlu0 %3805 }
 0xe7a   : > { %v3750_v4 = vpop.permute.xlu1 %3749  ;;  %vm3807_vm1 = vcmp.eq.s32.totalorder %v7353_v51, %v3806_v50 }
 0xe7b   : > { %v3752_v61 = vsel %vm3747_vm11, %v3750_v4, 0.0  ;;  %3949 = vperm.xlu1 %5605, %v7292_v12  }
 0xe7c   : > { %v3753_v25 = vadd.f32 %v3752_v61, %v3743_v58 }
 0xe7e   : > { %v3820_v32 = vpop.permute.xlu0 %3819 }
 0xe7f   : > { %5607 = vset.pattern.permute.xlu1 %v6174_v19  ;;  %v3756_v14 = vpop.permute.xlu1 %3755 }
 0xe80   : > { %vm3757_vm12 = vcmp.eq.s32.totalorder %v7353_v51, %v3756_v14  ;;  %3959 = vperm.xlu1 %5607, %v7292_v12  }
 0xe81   : > { %v3762_v6 = vsel %vm3757_vm12, %v3760_v16, 0.0 }
 0xe82   : > { %v3763_v3 = vadd.f32 %v3762_v6, %v3753_v25 }
 0xe83   : > { %v3836_v45 = vpop.permute.xlu0 %3835 }
 0xe84   : > { %5608 = vset.pattern.permute.xlu1 %v6148_v42  ;;  %v3766_v0 = vpop.permute.xlu1 %3765  ;;  %vm3837_vm4 = vcmp.eq.s32.totalorder %v7353_v51, %v3836_v45 }
 0xe85   : > { %3967 = vperm.xlu1 %5608, %v7346_v62   ;;  %vm3767_vm13 = vcmp.eq.s32.totalorder %v7353_v51, %v3766_v0 }
 0xe88   : > { %v3770_v34 = vpop.permute.xlu1 %3769  ;;  %v3850_v63 = vpop.permute.xlu0 %3849 }
 0xe89   : > { %v3772_v39 = vsel %vm3767_vm13, %v3770_v34, 0.0 }
 0xe8a   : > { %v3773_v54 = vadd.f32 %v3772_v39, %v3763_v3 }
 0xe8d   : > { %v3780_v15 = vpop.permute.xlu1 %3779  ;;  %v3866_v7 = vpop.permute.xlu0 %3865 }
 0xe8e   : > { %v3782_v48 = vsel %vm3777_vm14, %v3780_v15, 0.0  ;;  %vm3867_vm7 = vcmp.eq.s32.totalorder %v7353_v51, %v3866_v7 }
 0xe8f   : > { %v3783_v35 = vadd.f32 %v3782_v48, %v3773_v54 }
 0xe92   : > { %v3786_v37 = vpop.permute.xlu1 %3785  ;;  %v3880_v53 = vpop.permute.xlu0 %3879 }
 0xe93   : > { %vm3787_vm15 = vcmp.eq.s32.totalorder %v7353_v51, %v3786_v37 }
 0xe94   : > { %v3792_v46 = vsel %vm3787_vm15, %v3790_v27, 0.0 }
 0xe95   : > { %v3793_v1 = vadd.f32 %v3792_v46, %v3783_v35 }
 0xe97   : > { %v3796_v19 = vpop.permute.xlu1 %3795  ;;  %v3896_v21 = vpop.permute.xlu0 %3895 }
 0xe98   : > { %vm3797_vm0 = vcmp.eq.s32.totalorder %v7353_v51, %v3796_v19  ;;  %vm3897_vm10 = vcmp.eq.s32.totalorder %v7353_v51, %v3896_v21 }
 0xe9b   : > { %v3800_v8 = vpop.permute.xlu1 %3799 }
 0xe9c   : > { %v3802_v23 = vsel %vm3797_vm0, %v3800_v8, 0.0  ;;  %v3910_v58 = vpop.permute.xlu0 %3909 }
 0xe9d   : > { %v3803_v18 = vadd.f32 %v3802_v23, %v3793_v1 }
 0xea0   : > { %v3810_v60 = vpop.permute.xlu1 %3809 }
 0xea1   : > { %v3812_v57 = vsel %vm3807_vm1, %v3810_v60, 0.0  ;;  %v3926_v6 = vpop.permute.xlu0 %3925 }
 0xea2   : > { %v3813_v29 = vadd.f32 %v3812_v57, %v3803_v18  ;;  %vm3927_vm13 = vcmp.eq.s32.totalorder %v7353_v51, %v3926_v6 }
 0xea5   : > { %v3816_v41 = vpop.permute.xlu1 %3815 }
 0xea6   : > { %vm3817_vm2 = vcmp.eq.s32.totalorder %v7353_v51, %v3816_v41  ;;  %v3940_v54 = vpop.permute.xlu0 %3939 }
 0xea7   : > { %v3822_v28 = vsel %vm3817_vm2, %v3820_v32, 0.0 }
 0xea8   : > { %v3823_v33 = vadd.f32 %v3822_v28, %v3813_v29 }
 0xeaa   : > { %v3826_v20 = vpop.permute.xlu1 %3825 }
 0xeab   : > { %vm3827_vm3 = vcmp.eq.s32.totalorder %v7353_v51, %v3826_v20  ;;  %v3956_v20 = vpop.permute.xlu0 %3955 }
 0xeac   : > { %vm3957_vm0 = vcmp.eq.s32.totalorder %v7353_v51, %v3956_v20 }
 0xeae   : > { %v3830_v12 = vpop.permute.xlu1 %3829 }
 0xeaf   : > { %v3832_v26 = vsel %vm3827_vm3, %v3830_v12, 0.0 }
 0xeb0   : > { %v3833_v9 = vadd.f32 %v3832_v26, %v3823_v33 }
 0xeb3   : > { %v3840_v55 = vpop.permute.xlu1 %3839 }
 0xeb4   : > { %v3842_v31 = vsel %vm3837_vm4, %v3840_v55, 0.0 }
 0xeb5   : > { %v3843_v24 = vadd.f32 %v3842_v31, %v3833_v9 }
 0xeb8   : > { %v3846_v13 = vpop.permute.xlu1 %3845 }
 0xeb9   : > { %vm3847_vm5 = vcmp.eq.s32.totalorder %v7353_v51, %v3846_v13 }
 0xeba   : > { %v3852_v11 = vsel %vm3847_vm5, %v3850_v63, 0.0 }
 0xebb   : > { %v3853_v49 = vadd.f32 %v3852_v11, %v3843_v24 }
 0xebd   : > { %v3856_v30 = vpop.permute.xlu1 %3855 }
 0xebe   : > { %vm3857_vm6 = vcmp.eq.s32.totalorder %v7353_v51, %v3856_v30 }
 0xec1   : > { %v3860_v42 = vpop.permute.xlu1 %3859 }
 0xec2   : > { %v3862_v22 = vsel %vm3857_vm6, %v3860_v42, 0.0 }
 0xec3   : > { %v3863_v5 = vadd.f32 %v3862_v22, %v3853_v49 }
 0xec6   : > { %v3870_v17 = vpop.permute.xlu1 %3869 }
 0xec7   : > { %v3872_v38 = vsel %vm3867_vm7, %v3870_v17, 0.0 }
 0xec8   : > { %v3873_v4 = vadd.f32 %v3872_v38, %v3863_v5 }
 0xecb   : > { %v3876_v62 = vpop.permute.xlu1 %3875 }
 0xecc   : > { %vm3877_vm8 = vcmp.eq.s32.totalorder %v7353_v51, %v3876_v62  ;;  %v3973_v62 = vpop.permute.xlu0 %3972 }
 0xecd   : > { %v3882_v56 = vsel %vm3877_vm8, %v3880_v53, 0.0 }
 0xece   : > { %v3883_v25 = vadd.f32 %v3882_v56, %v3873_v4 }
 0xed0   : > { %v3886_v43 = vpop.permute.xlu1 %3885 }
 0xed1   : > { %vm3887_vm9 = vcmp.eq.s32.totalorder %v7353_v51, %v3886_v43 }
 0xed4   : > { %v3890_v40 = vpop.permute.xlu1 %3889 }
 0xed5   : > { %v3892_v61 = vsel %vm3887_vm9, %v3890_v40, 0.0 }
 0xed6   : > { %v3893_v3 = vadd.f32 %v3892_v61, %v3883_v25 }
 0xed9   : > { %v3900_v47 = vpop.permute.xlu1 %3899 }
 0xeda   : > { %v3902_v14 = vsel %vm3897_vm10, %v3900_v47, 0.0 }
 0xedb   : > { %v3903_v34 = vadd.f32 %v3902_v14, %v3893_v3 }
 0xede   : > { %v3906_v59 = vpop.permute.xlu1 %3905 }
 0xedf   : > { %vm3907_vm11 = vcmp.eq.s32.totalorder %v7353_v51, %v3906_v59 }
 0xee0   : > { %v3912_v0 = vsel %vm3907_vm11, %v3910_v58, 0.0 }
 0xee1   : > { %v3913_v37 = vadd.f32 %v3912_v0, %v3903_v34 }
 0xee3   : > { %v3916_v36 = vpop.permute.xlu1 %3915 }
 0xee4   : > { %vm3917_vm12 = vcmp.eq.s32.totalorder %v7353_v51, %v3916_v36 }
 0xee7   : > { %v3920_v2 = vpop.permute.xlu1 %3919 }
 0xee8   : > { %v3922_v39 = vsel %vm3917_vm12, %v3920_v2, 0.0 }
 0xee9   : > { %v3923_v8 = vadd.f32 %v3922_v39, %v3913_v37 }
 0xeec   : > { %v3930_v44 = vpop.permute.xlu1 %3929 }
 0xeed   : > { %v3932_v19 = vsel %vm3927_vm13, %v3930_v44, 0.0 }
 0xeee   : > { %v3933_v12 = vadd.f32 %v3932_v19, %v3923_v8 }
 0xef1   : > { %v3936_v16 = vpop.permute.xlu1 %3935 }
 0xef2   : > { %vm3937_vm14 = vcmp.eq.s32.totalorder %v7353_v51, %v3936_v16 }
 0xef3   : > { %v3942_v60 = vsel %vm3937_vm14, %v3940_v54, 0.0 }
 0xef4   : > { %v3943_v13 = vadd.f32 %v3942_v60, %v3933_v12 }
 0xef6   : > { %v3946_v15 = vpop.permute.xlu1 %3945 }
 0xef7   : > { %vm3947_vm15 = vcmp.eq.s32.totalorder %v7353_v51, %v3946_v15 }
 0xefa   : > { %v3950_v41 = vpop.permute.xlu1 %3949 }
 0xefb   : > { %v3952_v55 = vsel %vm3947_vm15, %v3950_v41, 0.0 }
 0xefc   : > { %v3953_v30 = vadd.f32 %v3952_v55, %v3943_v13 }
 0xeff   : > { %v3960_v42 = vpop.permute.xlu1 %3959 }
 0xf00   : > { %v3962_v17 = vsel %vm3957_vm0, %v3960_v42, 0.0 }
 0xf01   : > { %v3963_v10 = vadd.f32 %v3962_v17, %v3953_v30 }
 0xf03   : > { %v3975_v43 = vmul.f32 %v3973_v62, %v3963_v10 }
 0xf04   : > { %v3968_v27 = vpop.permute.xlu1 %3967 }
 0xf05   : > { %v3970_v50 = vmul.f32 %v3968_v27, %v7365_v52 }
 0xf07   : > { %v3976_v40 = vadd.f32 %v3975_v43, %v3970_v50 }
 0xf09   : > { %3977 = vst [vmem:[#allocation31] sm:$0xff] %v3976_v40 }
 0xf0a PF: > { %s7630_s3 = sld [smem:[#allocation44_spill]]  ;;  %s6180_s26 = smov [#allocation31]  }
 0xf0b   : > { %s3993_s18 = sshll.u32 %s6180_s26, 4  ;;  %s6181_s10 = smov [#allocation32]   ;;  %s3994_s18 = int_to_ptr.vmem [resolvable:$true] %s3993_s18 }
 0xf0c   : > { %s4004_s21 = sshll.u32 %s6181_s10, 4  ;;  %s6006_s7 = scalar_lea.vmem %s3994_s18, 128  ;;  %s7421_s21 = int_to_ptr.vmem [resolvable:$true] %s4004_s21 }
 0xf0d   : > { %p6007_p10 = scmp.ne.s32.totalorder %s3994_s18, %s6006_s7  ;;  %s6012_s1 = scalar_lea.vmem %s3994_s18, 256 }
 0xf0e   : > { %p6013_p13 = scmp.lt.s32.totalorder %s3994_s18, %s3994_s18  ;;  %p6014_p0 = scmp.lt.s32.totalorder %s6012_s1, %s6006_s7 }
 0xf10   : > { %s7631_s13 = sadd.s32 4294967295, %s7630_s3   ;;  %p6015_p1 = por %p6014_p0, %p6013_p13 }
 0xf11   : > { %p7417_p3 = scmp.eq.s32.totalorder %s7631_s13, 1 }
 0xf13   : > { %p6008_p11 = pnand %p6007_p10, %p7417_p3 }
 0xf15   : > { %p6009_p12 = pneg %p6008_p11 }
 0xf17   : > { %p6016_p4 = pnand %p6015_p1, %p6009_p12 }
 0xf19   : > { %6019 = shalt.err (!%p6016_p4)
}
 0xf1a   : > { %s7633_s24 = sld [smem:[#allocation76_spill]] }
 0xf20   : > { %s6020_s16 = scalar_lea.hbm %s7633_s24, 128 }
 0xf21   : > { %p6021_p6 = scmp.ne.s32.totalorder %s7633_s24, %s6020_s16  ;;  %p6026_p5 = scmp.lt.u32.totalorder %s6020_s16, %s7633_s24 }
 0xf23   : > { %p6022_p8 = pnand %p6021_p6, %p7417_p3 }
 0xf25   : > { %p6023_p7 = pneg %p6022_p8 }
 0xf27   : > { %p6028_p9 = pnand %p6026_p5, %p6023_p7 }
 0xf29   : > { %6031 = shalt.err (!%p6028_p9)
}
 0xf2a   : > { %5326 = dma.vmem_to_hbm [thread:$0]  (%p7417_p3), %s3994_s18, 128, %s7633_s24, [#allocation10]  }
 0xf2b   : > { %s6032_s11 = scalar_lea.vmem %s7421_s21, 128  ;;  %p6039_p12 = scmp.lt.s32.totalorder %s7421_s21, %s7421_s21 }
 0xf2c   : > { %p6033_p2 = scmp.ne.s32.totalorder %s7421_s21, %s6032_s11  ;;  %p6040_p13 = scmp.lt.s32.totalorder %s6032_s11, %s6032_s11 }
 0xf2e   : > { %p6034_p10 = pnand %p6033_p2, %p7417_p3  ;;  %p6041_p0 = por %p6040_p13, %p6039_p12 }
 0xf30   : > { %p6035_p11 = pneg %p6034_p10 }
 0xf32   : > { %p6042_p1 = pnand %p6041_p0, %p6035_p11 }
 0xf34   : > { %6045 = shalt.err (!%p6042_p1)
}
 0xf35   : > { %s7634_s26 = sld [smem:[#allocation77_spill]] }
 0xf3b   : > { %s6046_s10 = scalar_lea.hbm %s7634_s26, 128 }
 0xf3c   : > { %p6047_p4 = scmp.ne.s32.totalorder %s7634_s26, %s6046_s10  ;;  %p6052_p7 = scmp.lt.u32.totalorder %s6046_s10, %s7634_s26 }
 0xf3e   : > { %p6048_p6 = pnand %p6047_p4, %p7417_p3 }
 0xf40   : > { %p6049_p8 = pneg %p6048_p6 }
 0xf42   : > { %p6054_p5 = pnand %p6052_p7, %p6049_p8 }
 0xf44   : > { %6057 = shalt.err (!%p6054_p5)
}
 0xf45   : > { %5328 = dma.vmem_to_hbm [thread:$0]  (%p7417_p3), %s7421_s21, 128, %s7634_s26, [#allocation33]  }
 0xf46   : > { %6103 = dma.done.wait (%p7417_p3), [#allocation33], 128  }
 0xf47   : > { %6105 = vsyncadd (%p7417_p3), [#allocation33], 4294967168 }
 0xf48 PF: > { %s7635_s29 = sld [smem:[#allocation44_spill]] }
 0xf4e   : > { %p5411_p9 = scmp.ge.s32.totalorder %s7635_s29, 2  ;;  %s7636_s23 = sadd.s32 4294967294, %s7635_s29  }
 0xf4f   : > { %p5412_p2 = scmp.eq.s32.totalorder %s7636_s23, 1 }
 0xf51   : > { %p5377_p10 = pnand %p5412_p2, %p5411_p9 }
 0xf53   : > { %6107 = dma.done.wait (!%p5377_p10), [#allocation10], 128  }
 0xf54   : > { %6109 = vsyncadd (!%p5377_p10), [#allocation10], 4294967168  ;;  %s45_s29 = sadd.s32 1, %s7635_s29   ;;  %s7637_s3 = smov %s6116_s28 }
 0xf55   : > { %p42_p11 = scmp.ge.s32.totalorder %s45_s29, 4   ;;  %s7638_s28 = smov %s7640_s2 }
 0xf57   :  { %44 = sbr.rel (!%p42_p11) target bundleno = 31 (0x1f), region = 221 }
 0xf5e   :  { %4026 = vsyncpa [#allocation9], 1 }
 0xf5f   :  { %4028 = vsyncpa [#allocation9 + $0x1], 1 }
 0xf60   :  { %4029 = vsyncpa [#allocation12], 1 }
 0xf61   :  { %4030 = vsyncpa [#allocation15], 1 }
 0xf62   :  { %4031 = vsyncpa [#allocation18], 1 }
 0xf63   :  { %4032 = vsyncpa [#allocation21], 1 }
 0xf64   :  { %4033 = vsyncpa [#allocation24], 1 }
 0xf65   :  { %4034 = vsyncpa [#allocation27], 1 }
 0xf66   :  { %4035 = vsyncpa [#allocation30], 1 }
 0xf67   :  { %4036 = vsyncpa [#allocation10], 1 }
 0xf68   :  { %4038 = vsyncpa [#allocation10 + $0x1], 1 }
 0xf69   :  { %4039 = vsyncpa [#allocation33], 1 }

</bundles_post_ra>
